<compile_context>
chip_gen: v7x
topology: tpu7x:2x2x1
jax: 0.10.0
libtpu: 0.0.40
codegen_flags: <defaults>
</compile_context>

<pallas_src>
import math
import functools

import numpy as np
import jax
import jax.numpy as jnp
from jax import lax
from jax.experimental import pallas as pl
from jax.experimental.pallas import tpu as pltpu


# ---------------------------------------------------------------------------
# Helpers
# ---------------------------------------------------------------------------
def _layernorm(x, g, b, eps=1e-5):
    # One-pass variance: E[x^2] - mean^2 (halves cross-lane reduction traffic).
    mu = jnp.mean(x, axis=-1, keepdims=True)
    mu2 = jnp.mean(x * x, axis=-1, keepdims=True)
    var = jnp.maximum(mu2 - mu * mu, 0.0)
    return (x - mu) * lax.rsqrt(var + eps) * g + b


# ---------------------------------------------------------------------------
# Fused FFT block kernel:
#   [optional PE add] -> MHA -> add&norm ->
#   Conv1d(k=9,'same') + ReLU + Conv1d(k=1) -> add&norm
# one batch element per grid step.
# ---------------------------------------------------------------------------
def _fft_block_kernel(n_head, kernel_size, add_pe, x_ref, mask_ref, *refs):
    refs = list(refs)
    if add_pe:
        pe_ref = refs.pop(0)
    (wqkv_ref, bqkv_ref, wo_ref, bo_ref,
     ln1g_ref, ln1b_ref,
     w1_ref, b1_ref, w2_ref, b2_ref,
     ln2g_ref, ln2b_ref,
     o_ref, ctx_ref) = refs

    x = x_ref[0].astype(jnp.float32)            # (S, D) f32 working precision
    if add_pe:
        x = x + pe_ref[...]
    mask_add = mask_ref[0]                      # (1, S) additive mask (0 / -1e30)

    S, D = x.shape
    hd = D // n_head
    scale = 1.0 / math.sqrt(hd)

    # --- multi-head self-attention ---------------------------------------
    # Fused QKV: one (S,D)@(D,3D) bf16 MXU matmul, f32 accumulation.
    xb = x.astype(jnp.bfloat16)
    qkv = jnp.dot(xb, wqkv_ref[...],
                  preferred_element_type=jnp.float32) + bqkv_ref[...]
    qkvb = qkv.astype(jnp.bfloat16)

    def heads(lo):                              # -> (n_head, S, hd) bf16
        return jnp.stack([qkvb[:, lo + h * hd: lo + (h + 1) * hd]
                          for h in range(n_head)], axis=0)

    qh, kh, vh = heads(0), heads(D), heads(2 * D)

    # Head-batched scores / softmax / context (single batched dots, no loop).
    s = jnp.einsum('hqd,hkd->hqk', qh, kh,
                   preferred_element_type=jnp.float32) * scale      # (H,S,S)
    s = s + mask_add[None, :, :]
    s = s - jnp.max(s, axis=-1, keepdims=True)
    e = jnp.exp(s)
    p = e * pl.reciprocal(jnp.sum(e, axis=-1, keepdims=True), approx=True)
    ctx = jnp.einsum('hqk,hkd->hqd', p.astype(jnp.bfloat16), vh,
                     preferred_element_type=jnp.float32)            # (H,S,hd)

    # Write each head into the lane-dense context slab (no lane-axis concat),
    # then one full-width output projection.
    for h in range(n_head):
        ctx_ref[:, h * hd:(h + 1) * hd] = ctx[h].astype(jnp.bfloat16)
    attn = jnp.dot(ctx_ref[...], wo_ref[...],
                   preferred_element_type=jnp.float32) + bo_ref[...]

    x1 = _layernorm(x + attn, ln1g_ref[...], ln1b_ref[...])

    # --- position-wise FFN: Conv1d(k=9,'same') -> ReLU -> Conv1d(k=1) ------
    # Accumulate k shifted (S,D)@(D,d_inner) dots; shifts via pltpu.roll (XLU)
    # + iota edge mask.  No padded im2col intermediate.
    pad = (kernel_size - 1) // 2
    row = lax.broadcasted_iota(jnp.int32, (S, 1), 0)
    acc = None
    for kk in range(kernel_size):
        off = kk - pad                          # tap reads input row s + off
        tap = x1 if off % S == 0 else pltpu.roll(x1, shift=(-off) % S, axis=0)
        if off != 0:
            src = row + off
            valid = jnp.logical_and(src >= 0, src < S).astype(jnp.float32)
            tap = tap * valid                   # zero the 'same'-padding rows
        d = jnp.dot(tap.astype(jnp.bfloat16), w1_ref[kk],
                    preferred_element_type=jnp.float32)
        acc = d if acc is None else acc + d
    hid = jnp.maximum(acc + b1_ref[...], 0.0)
    y = jnp.dot(hid.astype(jnp.bfloat16), w2_ref[...],
                preferred_element_type=jnp.float32) + b2_ref[...]

    o_ref[0] = _layernorm(x1 + y, ln2g_ref[...], ln2b_ref[...]).astype(o_ref.dtype)


# ---------------------------------------------------------------------------
# pallas_call wrapper
# ---------------------------------------------------------------------------
_SINGLE_BUFFER_WEIGHTS = [True]   # probed once; falls back if unsupported


def _fft_block_call(B, S, D, d_inner, n_heads, kernel_size, add_pe,
                    in_dtype, out_dtype, single_buffer):
    def inv(shape):
        n = len(shape)
        if single_buffer:
            # Grid-invariant weights: single-buffer (no wasted 2nd VMEM copy).
            return pl.BlockSpec(shape, lambda b, n=n: (0,) * n,
                                pipeline_mode=pl.Buffered(1))
        return pl.BlockSpec(shape, lambda b, n=n: (0,) * n)

    in_specs = [
        pl.BlockSpec((1, S, D), lambda b: (b, 0, 0)),   # x
        pl.BlockSpec((1, 1, S), lambda b: (b, 0, 0)),   # additive mask
    ]
    if add_pe:
        in_specs.append(inv((S, D)))                    # positional encoding
    in_specs += [
        inv((D, 3 * D)), inv((1, 3 * D)),               # fused Wqkv, bqkv
        inv((D, D)), inv((1, D)),                       # Wo, bo
        inv((1, D)), inv((1, D)),                       # ln1 g, b
        inv((kernel_size, D, d_inner)), inv((1, d_inner)),   # conv1 W, b
        inv((d_inner, D)), inv((1, D)),                 # conv2 W, b
        inv((1, D)), inv((1, D)),                       # ln2 g, b
    ]

    # VMEM budget: (single-buffered) weights + double-buffered x/out/mask +
    # the in-flight working set (all-head scores, FFN hidden, f32 temps).
    # Capped at 60 MiB so we never exceed v7x's 64 MiB/TC physical VMEM.
    in_b, out_b = jnp.dtype(in_dtype).itemsize, jnp.dtype(out_dtype).itemsize
    w_bytes = (4 * D * D + kernel_size * D * d_inner + d_inner * D) * 2 \
        + (9 * D + d_inner) * 4
    w_bytes *= 1 if single_buffer else 2
    act_bytes = 2 * S * D * (in_b + out_b) + 4 * S * 4 + S * D * 4
    work_bytes = 2 * n_heads * S * S * 4 + 2 * S * d_inner * 4 + 12 * S * D * 4
    est = 2 * (w_bytes + act_bytes + work_bytes)
    vmem_limit = int(min(60 * 1024 * 1024, max(32 * 1024 * 1024, est)))

    kernel = functools.partial(_fft_block_kernel, n_heads, kernel_size, add_pe)
    return pl.pallas_call(
        kernel,
        out_shape=jax.ShapeDtypeStruct((B, S, D), out_dtype),
        grid=(B,),
        in_specs=in_specs,
        out_specs=pl.BlockSpec((1, S, D), lambda b: (b, 0, 0)),
        scratch_shapes=[pltpu.VMEM((S, D), jnp.bfloat16)],   # context slab
        compiler_params=pltpu.CompilerParams(
            dimension_semantics=("parallel",),
            vmem_limit_bytes=vmem_limit),
    )


def fft_block(x, mask_add, params, n_heads, kernel_size=9, pe=None,
              out_dtype=jnp.bfloat16):
    B, S, D = x.shape
    d_inner = params["w1"].shape[2]
    add_pe = pe is not None

    inputs = [x, mask_add]
    if add_pe:
        inputs.append(pe)
    inputs += [params[name] for name in
               ("wqkv", "bqkv", "wo", "bo", "ln1_g", "ln1_b",
                "w1", "b1", "w2", "b2", "ln2_g", "ln2_b")]

    if _SINGLE_BUFFER_WEIGHTS[0]:
        try:
            call = _fft_block_call(B, S, D, d_inner, n_heads, kernel_size,
                                   add_pe, x.dtype, out_dtype, True)
            return call(*inputs)
        except Exception:
            # pipeline_mode=pl.Buffered(1) unsupported here -> default buffering.
            _SINGLE_BUFFER_WEIGHTS[0] = False
    call = _fft_block_call(B, S, D, d_inner, n_heads, kernel_size,
                           add_pe, x.dtype, out_dtype, False)
    return call(*inputs)


# ---------------------------------------------------------------------------
# Parameters (deterministic synthetic init, shapes from the PyTorch module).
# Matmul weights stored in bf16 (MXU-native); biases / LN params in f32.
# ---------------------------------------------------------------------------
def init_params(key, hidden_dim, n_layers, n_heads, d_inner, kernel_size=9):
    D = hidden_dim
    layers = []
    for i in range(n_layers):
        keys = jax.random.split(jax.random.fold_in(key, i), 8)

        def w(k, shape, scale=0.05):
            return (scale * jax.random.normal(k, shape)).astype(jnp.bfloat16)

        def b(k, shape, scale=0.05):
            return (scale * jax.random.normal(k, shape)).astype(jnp.float32)

        layers.append(dict(
            # MultiheadAttention in_proj fused & pre-transposed: x @ wqkv
            wqkv=w(keys[0], (D, 3 * D)),
            bqkv=b(keys[1], (1, 3 * D)),
            # out_proj (pre-transposed) + bias
            wo=w(keys[2], (D, D)), bo=b(keys[3], (1, D)),
            # LayerNorm 1
            ln1_g=jnp.ones((1, D), jnp.float32),
            ln1_b=jnp.zeros((1, D), jnp.float32),
            # Conv1d(D, d_inner, k=9): w1[kk] == W1[:, :, kk].T
            w1=w(keys[4], (kernel_size, D, d_inner)),
            b1=b(keys[5], (1, d_inner)),
            # Conv1d(d_inner, D, k=1): w2 == W2[:, :, 0].T
            w2=w(keys[6], (d_inner, D)),
            b2=b(keys[7], (1, D)),
            # LayerNorm 2
            ln2_g=jnp.ones((1, D), jnp.float32),
            ln2_b=jnp.zeros((1, D), jnp.float32),
        ))
    return layers


# ---------------------------------------------------------------------------
# Full Transformer forward
# ---------------------------------------------------------------------------
def transformer_forward(x, mask, layers, n_heads, kernel_size=9):
    B, S, D = x.shape

    # Sinusoidal PE table (tiny, host-side); the add is fused into the first
    # FFT block kernel (no standalone elementwise pass over HBM).
    position = np.arange(S, dtype=np.float32)[:, None]
    div_term = np.exp(np.arange(0, D, 2, dtype=np.float32)
                      * (-math.log(10000.0) / D))
    pe_np = np.zeros((S, D), np.float32)
    pe_np[:, 0::2] = np.sin(position * div_term)
    pe_np[:, 1::2] = np.cos(position * div_term)
    pe = jnp.asarray(pe_np)

    # key_padding_mask (True == ignore) -> additive mask (B, 1, S).
    if mask is None:
        mask_add = jnp.zeros((B, 1, S), jnp.float32)
    else:
        mask_add = jnp.where(mask, jnp.float32(-1e30),
                             jnp.float32(0.0))[:, None, :]

    n_layers = len(layers)
    for i, p in enumerate(layers):
        # Inter-layer activations travel HBM in bf16; final layer emits f32.
        out_dtype = jnp.float32 if i == n_layers - 1 else jnp.bfloat16
        x = fft_block(x, mask_add, p, n_heads, kernel_size,
                      pe=pe if i == 0 else None, out_dtype=out_dtype)
    return x


# ---------------------------------------------------------------------------
if __name__ == "__main__":
    B, S, D = 2, 16, 32
    n_heads, d_inner, n_layers = 4, 64, 2

    key = jax.random.PRNGKey(0)
    kx, kp = jax.random.split(key)
    x = jax.random.normal(kx, (B, S, D), dtype=jnp.float32)

    # key padding mask: True == padded key position
    lengths = jnp.array([S, S - 4])
    mask = jnp.arange(S)[None, :] >= lengths[:, None]

    params = init_params(kp, D, n_layers, n_heads, d_inner)

    out = transformer_forward(x, mask, params, n_heads)
    out = jax.block_until_ready(out)

    assert out.shape == (B, S, D), out.shape
    assert out.dtype == jnp.float32, out.dtype
    assert bool(jnp.all(jnp.isfinite(out)))
    print("KERNEL_OK")
</pallas_src>

<mosaic_0001>
module attributes {stable_mosaic.version = 11 : i64} {
  func.func @_fft_block_kernel(%arg0: i32, %arg1: memref<1x16x32xf32, #tpu.memory_space<vmem>>, %arg2: memref<1x1x16xf32, #tpu.memory_space<vmem>>, %arg3: memref<16x32xf32, #tpu.memory_space<vmem>>, %arg4: memref<32x96xbf16, #tpu.memory_space<vmem>>, %arg5: memref<1x96xf32, #tpu.memory_space<vmem>>, %arg6: memref<32x32xbf16, #tpu.memory_space<vmem>>, %arg7: memref<1x32xf32, #tpu.memory_space<vmem>>, %arg8: memref<1x32xf32, #tpu.memory_space<vmem>>, %arg9: memref<1x32xf32, #tpu.memory_space<vmem>>, %arg10: memref<9x32x64xbf16, #tpu.memory_space<vmem>>, %arg11: memref<1x64xf32, #tpu.memory_space<vmem>>, %arg12: memref<64x32xbf16, #tpu.memory_space<vmem>>, %arg13: memref<1x32xf32, #tpu.memory_space<vmem>>, %arg14: memref<1x32xf32, #tpu.memory_space<vmem>>, %arg15: memref<1x32xf32, #tpu.memory_space<vmem>>, %arg16: memref<1x16x32xbf16, #tpu.memory_space<vmem>>, %arg17: memref<16x32xbf16, #tpu.memory_space<vmem>>) attributes {dimension_semantics = [#tpu.dimension_semantics<parallel>], iteration_bounds = array<i64: 2>, scalar_prefetch = 0 : i64, scratch_operands = 1 : i64, tpu.core_type = #tpu.core_type<tc>, window_params = [{transform_indices = @transform_0, window_bounds = array<i64: 1, 16, 32>}, {transform_indices = @transform_1, window_bounds = array<i64: 1, 1, 16>}, {pipeline_mode = #tpu.pipeline_mode<synchronous>, transform_indices = @transform_2, window_bounds = array<i64: 16, 32>}, {pipeline_mode = #tpu.pipeline_mode<synchronous>, transform_indices = @transform_3, window_bounds = array<i64: 32, 96>}, {pipeline_mode = #tpu.pipeline_mode<synchronous>, transform_indices = @transform_4, window_bounds = array<i64: 1, 96>}, {pipeline_mode = #tpu.pipeline_mode<synchronous>, transform_indices = @transform_5, window_bounds = array<i64: 32, 32>}, {pipeline_mode = #tpu.pipeline_mode<synchronous>, transform_indices = @transform_6, window_bounds = array<i64: 1, 32>}, {pipeline_mode = #tpu.pipeline_mode<synchronous>, transform_indices = @transform_7, window_bounds = array<i64: 1, 32>}, {pipeline_mode = #tpu.pipeline_mode<synchronous>, transform_indices = @transform_8, window_bounds = array<i64: 1, 32>}, {pipeline_mode = #tpu.pipeline_mode<synchronous>, transform_indices = @transform_9, window_bounds = array<i64: 9, 32, 64>}, {pipeline_mode = #tpu.pipeline_mode<synchronous>, transform_indices = @transform_10, window_bounds = array<i64: 1, 64>}, {pipeline_mode = #tpu.pipeline_mode<synchronous>, transform_indices = @transform_11, window_bounds = array<i64: 64, 32>}, {pipeline_mode = #tpu.pipeline_mode<synchronous>, transform_indices = @transform_12, window_bounds = array<i64: 1, 32>}, {pipeline_mode = #tpu.pipeline_mode<synchronous>, transform_indices = @transform_13, window_bounds = array<i64: 1, 32>}, {pipeline_mode = #tpu.pipeline_mode<synchronous>, transform_indices = @transform_14, window_bounds = array<i64: 1, 32>}, {transform_indices = @transform_15, window_bounds = array<i64: 1, 16, 32>}]} {
    %c0 = arith.constant 0 : index
    %c0_0 = arith.constant 0 : index
    %c0_1 = arith.constant 0 : index
    %0 = vector.load %arg1[%c0, %c0_0, %c0_1] : memref<1x16x32xf32, #tpu.memory_space<vmem>>, vector<1x16x32xf32>
    %1 = vector.shape_cast %0 : vector<1x16x32xf32> to vector<16x32xf32>
    %c0_2 = arith.constant 0 : index
    %c0_3 = arith.constant 0 : index
    %2 = vector.load %arg3[%c0_2, %c0_3] : memref<16x32xf32, #tpu.memory_space<vmem>>, vector<16x32xf32>
    %3 = arith.addf %1, %2 : vector<16x32xf32>
    %c0_4 = arith.constant 0 : index
    %c0_5 = arith.constant 0 : index
    %c0_6 = arith.constant 0 : index
    %4 = vector.load %arg2[%c0_4, %c0_5, %c0_6] : memref<1x1x16xf32, #tpu.memory_space<vmem>>, vector<1x1x16xf32>
    %5 = vector.shape_cast %4 : vector<1x1x16xf32> to vector<1x16xf32>
    %6 = arith.truncf %3 : vector<16x32xf32> to vector<16x32xbf16>
    %c0_7 = arith.constant 0 : index
    %c0_8 = arith.constant 0 : index
    %7 = vector.load %arg4[%c0_7, %c0_8] : memref<32x96xbf16, #tpu.memory_space<vmem>>, vector<32x96xbf16>
    %cst = arith.constant dense<0.000000e+00> : vector<16x96xf32>
    %8 = tpu.matmul %6, %7, %cst {dimension_numbers = #tpu.dot_dimension_numbers<[1], [0], [0], [1], [0, 0, 1, 1], [], []>} : vector<16x32xbf16>, vector<32x96xbf16>, vector<16x96xf32> -> vector<16x96xf32>
    %c0_9 = arith.constant 0 : index
    %c0_10 = arith.constant 0 : index
    %9 = vector.load %arg5[%c0_9, %c0_10] : memref<1x96xf32, #tpu.memory_space<vmem>>, vector<1x96xf32>
    %10 = vector.broadcast %9 : vector<1x96xf32> to vector<16x96xf32>
    %11 = arith.addf %8, %10 : vector<16x96xf32>
    %12 = arith.truncf %11 : vector<16x96xf32> to vector<16x96xbf16>
    %13 = vector.extract_strided_slice %12 {offsets = [0, 0], sizes = [16, 8], strides = [1, 1]} : vector<16x96xbf16> to vector<16x8xbf16>
    %14 = vector.extract_strided_slice %12 {offsets = [0, 8], sizes = [16, 8], strides = [1, 1]} : vector<16x96xbf16> to vector<16x8xbf16>
    %15 = vector.extract_strided_slice %12 {offsets = [0, 16], sizes = [16, 8], strides = [1, 1]} : vector<16x96xbf16> to vector<16x8xbf16>
    %16 = vector.extract_strided_slice %12 {offsets = [0, 24], sizes = [16, 8], strides = [1, 1]} : vector<16x96xbf16> to vector<16x8xbf16>
    %17 = vector.shape_cast %13 : vector<16x8xbf16> to vector<1x16x8xbf16>
    %18 = vector.shape_cast %14 : vector<16x8xbf16> to vector<1x16x8xbf16>
    %19 = vector.shape_cast %15 : vector<16x8xbf16> to vector<1x16x8xbf16>
    %20 = vector.shape_cast %16 : vector<16x8xbf16> to vector<1x16x8xbf16>
    %21 = tpu.concatenate %17, %18, %19, %20 in 0 : vector<1x16x8xbf16>, vector<1x16x8xbf16>, vector<1x16x8xbf16>, vector<1x16x8xbf16> -> vector<4x16x8xbf16>
    %22 = vector.extract_strided_slice %12 {offsets = [0, 32], sizes = [16, 8], strides = [1, 1]} : vector<16x96xbf16> to vector<16x8xbf16>
    %23 = vector.extract_strided_slice %12 {offsets = [0, 40], sizes = [16, 8], strides = [1, 1]} : vector<16x96xbf16> to vector<16x8xbf16>
    %24 = vector.extract_strided_slice %12 {offsets = [0, 48], sizes = [16, 8], strides = [1, 1]} : vector<16x96xbf16> to vector<16x8xbf16>
    %25 = vector.extract_strided_slice %12 {offsets = [0, 56], sizes = [16, 8], strides = [1, 1]} : vector<16x96xbf16> to vector<16x8xbf16>
    %26 = vector.shape_cast %22 : vector<16x8xbf16> to vector<1x16x8xbf16>
    %27 = vector.shape_cast %23 : vector<16x8xbf16> to vector<1x16x8xbf16>
    %28 = vector.shape_cast %24 : vector<16x8xbf16> to vector<1x16x8xbf16>
    %29 = vector.shape_cast %25 : vector<16x8xbf16> to vector<1x16x8xbf16>
    %30 = tpu.concatenate %26, %27, %28, %29 in 0 : vector<1x16x8xbf16>, vector<1x16x8xbf16>, vector<1x16x8xbf16>, vector<1x16x8xbf16> -> vector<4x16x8xbf16>
    %31 = vector.extract_strided_slice %12 {offsets = [0, 64], sizes = [16, 8], strides = [1, 1]} : vector<16x96xbf16> to vector<16x8xbf16>
    %32 = vector.extract_strided_slice %12 {offsets = [0, 72], sizes = [16, 8], strides = [1, 1]} : vector<16x96xbf16> to vector<16x8xbf16>
    %33 = vector.extract_strided_slice %12 {offsets = [0, 80], sizes = [16, 8], strides = [1, 1]} : vector<16x96xbf16> to vector<16x8xbf16>
    %34 = vector.extract_strided_slice %12 {offsets = [0, 88], sizes = [16, 8], strides = [1, 1]} : vector<16x96xbf16> to vector<16x8xbf16>
    %35 = vector.shape_cast %31 : vector<16x8xbf16> to vector<1x16x8xbf16>
    %36 = vector.shape_cast %32 : vector<16x8xbf16> to vector<1x16x8xbf16>
    %37 = vector.shape_cast %33 : vector<16x8xbf16> to vector<1x16x8xbf16>
    %38 = vector.shape_cast %34 : vector<16x8xbf16> to vector<1x16x8xbf16>
    %39 = tpu.concatenate %35, %36, %37, %38 in 0 : vector<1x16x8xbf16>, vector<1x16x8xbf16>, vector<1x16x8xbf16>, vector<1x16x8xbf16> -> vector<4x16x8xbf16>
    "tpu.trace_start"() <{level = 10 : i32, message = "hqd,hkd->hqk"}> : () -> ()
    %cst_11 = arith.constant dense<0.000000e+00> : vector<4x16x16xf32>
    %40 = tpu.matmul %21, %30, %cst_11 {dimension_numbers = #tpu.dot_dimension_numbers<[2], [2], [1], [1], [0, 0, 0, 1, 1, 1], [0], [0]>} : vector<4x16x8xbf16>, vector<4x16x8xbf16>, vector<4x16x16xf32> -> vector<4x16x16xf32>
    "tpu.trace_stop"() : () -> ()
    %cst_12 = arith.constant 0.353553385 : f32
    %41 = vector.broadcast %cst_12 : f32 to vector<4x16x16xf32>
    %42 = arith.mulf %40, %41 : vector<4x16x16xf32>
    %43 = vector.shape_cast %5 : vector<1x16xf32> to vector<1x1x16xf32>
    %44 = vector.broadcast %43 : vector<1x1x16xf32> to vector<4x16x16xf32>
    %45 = arith.addf %42, %44 : vector<4x16x16xf32>
    %cst_13 = arith.constant dense<0xFF800000> : vector<4x16xf32>
    %46 = vector.multi_reduction <maximumf>, %45, %cst_13 [2] : vector<4x16x16xf32> to vector<4x16xf32>
    %47 = vector.shape_cast %46 : vector<4x16xf32> to vector<4x16x1xf32>
    %48 = vector.broadcast %47 : vector<4x16x1xf32> to vector<4x16x16xf32>
    %49 = arith.subf %45, %48 : vector<4x16x16xf32>
    %50 = math.exp %49 : vector<4x16x16xf32>
    %cst_14 = arith.constant dense<0.000000e+00> : vector<4x16xf32>
    %51 = vector.multi_reduction <add>, %50, %cst_14 [2] : vector<4x16x16xf32> to vector<4x16xf32>
    %52 = vector.shape_cast %51 : vector<4x16xf32> to vector<4x16x1xf32>
    %53 = tpu.reciprocal %52 {approx = true} : vector<4x16x1xf32> -> vector<4x16x1xf32>
    %54 = vector.broadcast %53 : vector<4x16x1xf32> to vector<4x16x16xf32>
    %55 = arith.mulf %50, %54 : vector<4x16x16xf32>
    %56 = arith.truncf %55 : vector<4x16x16xf32> to vector<4x16x16xbf16>
    "tpu.trace_start"() <{level = 10 : i32, message = "hqk,hkd->hqd"}> : () -> ()
    %cst_15 = arith.constant dense<0.000000e+00> : vector<4x16x8xf32>
    %57 = tpu.matmul %56, %39, %cst_15 {dimension_numbers = #tpu.dot_dimension_numbers<[2], [1], [1], [2], [0, 0, 0, 1, 1, 2], [0], [0]>} : vector<4x16x16xbf16>, vector<4x16x8xbf16>, vector<4x16x8xf32> -> vector<4x16x8xf32>
    "tpu.trace_stop"() : () -> ()
    %58 = vector.extract_strided_slice %57 {offsets = [0, 0, 0], sizes = [1, 16, 8], strides = [1, 1, 1]} : vector<4x16x8xf32> to vector<1x16x8xf32>
    %59 = vector.shape_cast %58 : vector<1x16x8xf32> to vector<16x8xf32>
    %60 = arith.truncf %59 : vector<16x8xf32> to vector<16x8xbf16>
    %c0_16 = arith.constant 0 : index
    %c0_17 = arith.constant 0 : index
    %61 = vector.load %arg17[%c0_16, %c0_17] : memref<16x32xbf16, #tpu.memory_space<vmem>>, vector<16x8xbf16>
    tpu.vector_store %arg17[%c0_16, %c0_17], %60 {strides = array<i32>} : memref<16x32xbf16, #tpu.memory_space<vmem>>, vector<16x8xbf16>,
    %62 = vector.extract_strided_slice %57 {offsets = [1, 0, 0], sizes = [1, 16, 8], strides = [1, 1, 1]} : vector<4x16x8xf32> to vector<1x16x8xf32>
    %63 = vector.shape_cast %62 : vector<1x16x8xf32> to vector<16x8xf32>
    %64 = arith.truncf %63 : vector<16x8xf32> to vector<16x8xbf16>
    %c0_18 = arith.constant 0 : index
    %c8 = arith.constant 8 : index
    %65 = vector.load %arg17[%c0_18, %c8] : memref<16x32xbf16, #tpu.memory_space<vmem>>, vector<16x8xbf16>
    tpu.vector_store %arg17[%c0_18, %c8], %64 {strides = array<i32>} : memref<16x32xbf16, #tpu.memory_space<vmem>>, vector<16x8xbf16>,
    %66 = vector.extract_strided_slice %57 {offsets = [2, 0, 0], sizes = [1, 16, 8], strides = [1, 1, 1]} : vector<4x16x8xf32> to vector<1x16x8xf32>
    %67 = vector.shape_cast %66 : vector<1x16x8xf32> to vector<16x8xf32>
    %68 = arith.truncf %67 : vector<16x8xf32> to vector<16x8xbf16>
    %c0_19 = arith.constant 0 : index
    %c16 = arith.constant 16 : index
    %69 = vector.load %arg17[%c0_19, %c16] : memref<16x32xbf16, #tpu.memory_space<vmem>>, vector<16x8xbf16>
    tpu.vector_store %arg17[%c0_19, %c16], %68 {strides = array<i32>} : memref<16x32xbf16, #tpu.memory_space<vmem>>, vector<16x8xbf16>,
    %70 = vector.extract_strided_slice %57 {offsets = [3, 0, 0], sizes = [1, 16, 8], strides = [1, 1, 1]} : vector<4x16x8xf32> to vector<1x16x8xf32>
    %71 = vector.shape_cast %70 : vector<1x16x8xf32> to vector<16x8xf32>
    %72 = arith.truncf %71 : vector<16x8xf32> to vector<16x8xbf16>
    %c0_20 = arith.constant 0 : index
    %c24 = arith.constant 24 : index
    %73 = vector.load %arg17[%c0_20, %c24] : memref<16x32xbf16, #tpu.memory_space<vmem>>, vector<16x8xbf16>
    tpu.vector_store %arg17[%c0_20, %c24], %72 {strides = array<i32>} : memref<16x32xbf16, #tpu.memory_space<vmem>>, vector<16x8xbf16>,
    %c0_21 = arith.constant 0 : index
    %c0_22 = arith.constant 0 : index
    %74 = vector.load %arg17[%c0_21, %c0_22] : memref<16x32xbf16, #tpu.memory_space<vmem>>, vector<16x32xbf16>
    %c0_23 = arith.constant 0 : index
    %c0_24 = arith.constant 0 : index
    %75 = vector.load %arg6[%c0_23, %c0_24] : memref<32x32xbf16, #tpu.memory_space<vmem>>, vector<32x32xbf16>
    %cst_25 = arith.constant dense<0.000000e+00> : vector<16x32xf32>
    %76 = tpu.matmul %74, %75, %cst_25 {dimension_numbers = #tpu.dot_dimension_numbers<[1], [0], [0], [1], [0, 0, 1, 1], [], []>} : vector<16x32xbf16>, vector<32x32xbf16>, vector<16x32xf32> -> vector<16x32xf32>
    %c0_26 = arith.constant 0 : index
    %c0_27 = arith.constant 0 : index
    %77 = vector.load %arg7[%c0_26, %c0_27] : memref<1x32xf32, #tpu.memory_space<vmem>>, vector<1x32xf32>
    %78 = vector.broadcast %77 : vector<1x32xf32> to vector<16x32xf32>
    %79 = arith.addf %76, %78 : vector<16x32xf32>
    %80 = arith.addf %3, %79 : vector<16x32xf32>
    %c0_28 = arith.constant 0 : index
    %c0_29 = arith.constant 0 : index
    %81 = vector.load %arg8[%c0_28, %c0_29] : memref<1x32xf32, #tpu.memory_space<vmem>>, vector<1x32xf32>
    %c0_30 = arith.constant 0 : index
    %c0_31 = arith.constant 0 : index
    %82 = vector.load %arg9[%c0_30, %c0_31] : memref<1x32xf32, #tpu.memory_space<vmem>>, vector<1x32xf32>
    %cst_32 = arith.constant dense<0.000000e+00> : vector<16xf32>
    %83 = vector.multi_reduction <add>, %80, %cst_32 [1] : vector<16x32xf32> to vector<16xf32>
    %84 = vector.shape_cast %83 : vector<16xf32> to vector<16x1xf32>
    %cst_33 = arith.constant 3.200000e+01 : f32
    %85 = vector.broadcast %cst_33 : f32 to vector<16x1xf32>
    %86 = arith.divf %84, %85 : vector<16x1xf32>
    %87 = arith.mulf %80, %80 : vector<16x32xf32>
    %cst_34 = arith.constant dense<0.000000e+00> : vector<16xf32>
    %88 = vector.multi_reduction <add>, %87, %cst_34 [1] : vector<16x32xf32> to vector<16xf32>
    %89 = vector.shape_cast %88 : vector<16xf32> to vector<16x1xf32>
    %cst_35 = arith.constant 3.200000e+01 : f32
    %90 = vector.broadcast %cst_35 : f32 to vector<16x1xf32>
    %91 = arith.divf %89, %90 : vector<16x1xf32>
    %92 = arith.mulf %86, %86 : vector<16x1xf32>
    %93 = arith.subf %91, %92 : vector<16x1xf32>
    %cst_36 = arith.constant 0.000000e+00 : f32
    %94 = vector.broadcast %cst_36 : f32 to vector<16x1xf32>
    %95 = arith.maximumf %93, %94 : vector<16x1xf32>
    %96 = vector.broadcast %86 : vector<16x1xf32> to vector<16x32xf32>
    %97 = arith.subf %80, %96 : vector<16x32xf32>
    %cst_37 = arith.constant 9.99999974E-6 : f32
    %98 = vector.broadcast %cst_37 : f32 to vector<16x1xf32>
    %99 = arith.addf %95, %98 : vector<16x1xf32>
    %100 = math.rsqrt %99 : vector<16x1xf32>
    %101 = vector.broadcast %100 : vector<16x1xf32> to vector<16x32xf32>
    %102 = arith.mulf %97, %101 : vector<16x32xf32>
    %103 = vector.broadcast %81 : vector<1x32xf32> to vector<16x32xf32>
    %104 = arith.mulf %102, %103 : vector<16x32xf32>
    %105 = vector.broadcast %82 : vector<1x32xf32> to vector<16x32xf32>
    %106 = arith.addf %104, %105 : vector<16x32xf32>
    %107 = tpu.iota {dimensions = array<i32: 0>} : vector<16x1xi32>
    %c4_i32 = arith.constant 4 : i32
    %108 = tpu.dynamic_rotate %106 by %c4_i32 dim 0 : vector<16x32xf32>, i32 -> vector<16x32xf32>
    %c-4_i32 = arith.constant -4 : i32
    %109 = vector.broadcast %c-4_i32 : i32 to vector<16x1xi32>
    %110 = arith.addi %107, %109 : vector<16x1xi32>
    %c0_i32 = arith.constant 0 : i32
    %111 = vector.broadcast %c0_i32 : i32 to vector<16x1xi32>
    %112 = arith.cmpi sge, %110, %111 : vector<16x1xi32>
    %c16_i32 = arith.constant 16 : i32
    %113 = vector.broadcast %c16_i32 : i32 to vector<16x1xi32>
    %114 = arith.cmpi slt, %110, %113 : vector<16x1xi32>
    %115 = arith.andi %112, %114 : vector<16x1xi1>
    %116 = arith.extui %115 : vector<16x1xi1> to vector<16x1xi32>
    %117 = arith.sitofp %116 : vector<16x1xi32> to vector<16x1xf32>
    %118 = vector.broadcast %117 : vector<16x1xf32> to vector<16x32xf32>
    %119 = arith.mulf %108, %118 : vector<16x32xf32>
    %120 = arith.truncf %119 : vector<16x32xf32> to vector<16x32xbf16>
    %c0_38 = arith.constant 0 : index
    %c0_39 = arith.constant 0 : index
    %c0_40 = arith.constant 0 : index
    %121 = vector.load %arg10[%c0_38, %c0_39, %c0_40] : memref<9x32x64xbf16, #tpu.memory_space<vmem>>, vector<1x32x64xbf16>
    %122 = vector.shape_cast %121 : vector<1x32x64xbf16> to vector<32x64xbf16>
    %cst_41 = arith.constant dense<0.000000e+00> : vector<16x64xf32>
    %123 = tpu.matmul %120, %122, %cst_41 {dimension_numbers = #tpu.dot_dimension_numbers<[1], [0], [0], [1], [0, 0, 1, 1], [], []>} : vector<16x32xbf16>, vector<32x64xbf16>, vector<16x64xf32> -> vector<16x64xf32>
    %c3_i32 = arith.constant 3 : i32
    %124 = tpu.dynamic_rotate %106 by %c3_i32 dim 0 : vector<16x32xf32>, i32 -> vector<16x32xf32>
    %c-3_i32 = arith.constant -3 : i32
    %125 = vector.broadcast %c-3_i32 : i32 to vector<16x1xi32>
    %126 = arith.addi %107, %125 : vector<16x1xi32>
    %c0_i32_42 = arith.constant 0 : i32
    %127 = vector.broadcast %c0_i32_42 : i32 to vector<16x1xi32>
    %128 = arith.cmpi sge, %126, %127 : vector<16x1xi32>
    %c16_i32_43 = arith.constant 16 : i32
    %129 = vector.broadcast %c16_i32_43 : i32 to vector<16x1xi32>
    %130 = arith.cmpi slt, %126, %129 : vector<16x1xi32>
    %131 = arith.andi %128, %130 : vector<16x1xi1>
    %132 = arith.extui %131 : vector<16x1xi1> to vector<16x1xi32>
    %133 = arith.sitofp %132 : vector<16x1xi32> to vector<16x1xf32>
    %134 = vector.broadcast %133 : vector<16x1xf32> to vector<16x32xf32>
    %135 = arith.mulf %124, %134 : vector<16x32xf32>
    %136 = arith.truncf %135 : vector<16x32xf32> to vector<16x32xbf16>
    %c1 = arith.constant 1 : index
    %c0_44 = arith.constant 0 : index
    %c0_45 = arith.constant 0 : index
    %137 = vector.load %arg10[%c1, %c0_44, %c0_45] : memref<9x32x64xbf16, #tpu.memory_space<vmem>>, vector<1x32x64xbf16>
    %138 = vector.shape_cast %137 : vector<1x32x64xbf16> to vector<32x64xbf16>
    %cst_46 = arith.constant dense<0.000000e+00> : vector<16x64xf32>
    %139 = tpu.matmul %136, %138, %cst_46 {dimension_numbers = #tpu.dot_dimension_numbers<[1], [0], [0], [1], [0, 0, 1, 1], [], []>} : vector<16x32xbf16>, vector<32x64xbf16>, vector<16x64xf32> -> vector<16x64xf32>
    %140 = arith.addf %123, %139 : vector<16x64xf32>
    %c2_i32 = arith.constant 2 : i32
    %141 = tpu.dynamic_rotate %106 by %c2_i32 dim 0 : vector<16x32xf32>, i32 -> vector<16x32xf32>
    %c-2_i32 = arith.constant -2 : i32
    %142 = vector.broadcast %c-2_i32 : i32 to vector<16x1xi32>
    %143 = arith.addi %107, %142 : vector<16x1xi32>
    %c0_i32_47 = arith.constant 0 : i32
    %144 = vector.broadcast %c0_i32_47 : i32 to vector<16x1xi32>
    %145 = arith.cmpi sge, %143, %144 : vector<16x1xi32>
    %c16_i32_48 = arith.constant 16 : i32
    %146 = vector.broadcast %c16_i32_48 : i32 to vector<16x1xi32>
    %147 = arith.cmpi slt, %143, %146 : vector<16x1xi32>
    %148 = arith.andi %145, %147 : vector<16x1xi1>
    %149 = arith.extui %148 : vector<16x1xi1> to vector<16x1xi32>
    %150 = arith.sitofp %149 : vector<16x1xi32> to vector<16x1xf32>
    %151 = vector.broadcast %150 : vector<16x1xf32> to vector<16x32xf32>
    %152 = arith.mulf %141, %151 : vector<16x32xf32>
    %153 = arith.truncf %152 : vector<16x32xf32> to vector<16x32xbf16>
    %c2 = arith.constant 2 : index
    %c0_49 = arith.constant 0 : index
    %c0_50 = arith.constant 0 : index
    %154 = vector.load %arg10[%c2, %c0_49, %c0_50] : memref<9x32x64xbf16, #tpu.memory_space<vmem>>, vector<1x32x64xbf16>
    %155 = vector.shape_cast %154 : vector<1x32x64xbf16> to vector<32x64xbf16>
    %cst_51 = arith.constant dense<0.000000e+00> : vector<16x64xf32>
    %156 = tpu.matmul %153, %155, %cst_51 {dimension_numbers = #tpu.dot_dimension_numbers<[1], [0], [0], [1], [0, 0, 1, 1], [], []>} : vector<16x32xbf16>, vector<32x64xbf16>, vector<16x64xf32> -> vector<16x64xf32>
    %157 = arith.addf %140, %156 : vector<16x64xf32>
    %c1_i32 = arith.constant 1 : i32
    %158 = tpu.dynamic_rotate %106 by %c1_i32 dim 0 : vector<16x32xf32>, i32 -> vector<16x32xf32>
    %c-1_i32 = arith.constant -1 : i32
    %159 = vector.broadcast %c-1_i32 : i32 to vector<16x1xi32>
    %160 = arith.addi %107, %159 : vector<16x1xi32>
    %c0_i32_52 = arith.constant 0 : i32
    %161 = vector.broadcast %c0_i32_52 : i32 to vector<16x1xi32>
    %162 = arith.cmpi sge, %160, %161 : vector<16x1xi32>
    %c16_i32_53 = arith.constant 16 : i32
    %163 = vector.broadcast %c16_i32_53 : i32 to vector<16x1xi32>
    %164 = arith.cmpi slt, %160, %163 : vector<16x1xi32>
    %165 = arith.andi %162, %164 : vector<16x1xi1>
    %166 = arith.extui %165 : vector<16x1xi1> to vector<16x1xi32>
    %167 = arith.sitofp %166 : vector<16x1xi32> to vector<16x1xf32>
    %168 = vector.broadcast %167 : vector<16x1xf32> to vector<16x32xf32>
    %169 = arith.mulf %158, %168 : vector<16x32xf32>
    %170 = arith.truncf %169 : vector<16x32xf32> to vector<16x32xbf16>
    %c3 = arith.constant 3 : index
    %c0_54 = arith.constant 0 : index
    %c0_55 = arith.constant 0 : index
    %171 = vector.load %arg10[%c3, %c0_54, %c0_55] : memref<9x32x64xbf16, #tpu.memory_space<vmem>>, vector<1x32x64xbf16>
    %172 = vector.shape_cast %171 : vector<1x32x64xbf16> to vector<32x64xbf16>
    %cst_56 = arith.constant dense<0.000000e+00> : vector<16x64xf32>
    %173 = tpu.matmul %170, %172, %cst_56 {dimension_numbers = #tpu.dot_dimension_numbers<[1], [0], [0], [1], [0, 0, 1, 1], [], []>} : vector<16x32xbf16>, vector<32x64xbf16>, vector<16x64xf32> -> vector<16x64xf32>
    %174 = arith.addf %157, %173 : vector<16x64xf32>
    %175 = arith.truncf %106 : vector<16x32xf32> to vector<16x32xbf16>
    %c4 = arith.constant 4 : index
    %c0_57 = arith.constant 0 : index
    %c0_58 = arith.constant 0 : index
    %176 = vector.load %arg10[%c4, %c0_57, %c0_58] : memref<9x32x64xbf16, #tpu.memory_space<vmem>>, vector<1x32x64xbf16>
    %177 = vector.shape_cast %176 : vector<1x32x64xbf16> to vector<32x64xbf16>
    %cst_59 = arith.constant dense<0.000000e+00> : vector<16x64xf32>
    %178 = tpu.matmul %175, %177, %cst_59 {dimension_numbers = #tpu.dot_dimension_numbers<[1], [0], [0], [1], [0, 0, 1, 1], [], []>} : vector<16x32xbf16>, vector<32x64xbf16>, vector<16x64xf32> -> vector<16x64xf32>
    %179 = arith.addf %174, %178 : vector<16x64xf32>
    %c15_i32 = arith.constant 15 : i32
    %180 = tpu.dynamic_rotate %106 by %c15_i32 dim 0 : vector<16x32xf32>, i32 -> vector<16x32xf32>
    %c1_i32_60 = arith.constant 1 : i32
    %181 = vector.broadcast %c1_i32_60 : i32 to vector<16x1xi32>
    %182 = arith.addi %107, %181 : vector<16x1xi32>
    %c0_i32_61 = arith.constant 0 : i32
    %183 = vector.broadcast %c0_i32_61 : i32 to vector<16x1xi32>
    %184 = arith.cmpi sge, %182, %183 : vector<16x1xi32>
    %c16_i32_62 = arith.constant 16 : i32
    %185 = vector.broadcast %c16_i32_62 : i32 to vector<16x1xi32>
    %186 = arith.cmpi slt, %182, %185 : vector<16x1xi32>
    %187 = arith.andi %184, %186 : vector<16x1xi1>
    %188 = arith.extui %187 : vector<16x1xi1> to vector<16x1xi32>
    %189 = arith.sitofp %188 : vector<16x1xi32> to vector<16x1xf32>
    %190 = vector.broadcast %189 : vector<16x1xf32> to vector<16x32xf32>
    %191 = arith.mulf %180, %190 : vector<16x32xf32>
    %192 = arith.truncf %191 : vector<16x32xf32> to vector<16x32xbf16>
    %c5 = arith.constant 5 : index
    %c0_63 = arith.constant 0 : index
    %c0_64 = arith.constant 0 : index
    %193 = vector.load %arg10[%c5, %c0_63, %c0_64] : memref<9x32x64xbf16, #tpu.memory_space<vmem>>, vector<1x32x64xbf16>
    %194 = vector.shape_cast %193 : vector<1x32x64xbf16> to vector<32x64xbf16>
    %cst_65 = arith.constant dense<0.000000e+00> : vector<16x64xf32>
    %195 = tpu.matmul %192, %194, %cst_65 {dimension_numbers = #tpu.dot_dimension_numbers<[1], [0], [0], [1], [0, 0, 1, 1], [], []>} : vector<16x32xbf16>, vector<32x64xbf16>, vector<16x64xf32> -> vector<16x64xf32>
    %196 = arith.addf %179, %195 : vector<16x64xf32>
    %c14_i32 = arith.constant 14 : i32
    %197 = tpu.dynamic_rotate %106 by %c14_i32 dim 0 : vector<16x32xf32>, i32 -> vector<16x32xf32>
    %c2_i32_66 = arith.constant 2 : i32
    %198 = vector.broadcast %c2_i32_66 : i32 to vector<16x1xi32>
    %199 = arith.addi %107, %198 : vector<16x1xi32>
    %c0_i32_67 = arith.constant 0 : i32
    %200 = vector.broadcast %c0_i32_67 : i32 to vector<16x1xi32>
    %201 = arith.cmpi sge, %199, %200 : vector<16x1xi32>
    %c16_i32_68 = arith.constant 16 : i32
    %202 = vector.broadcast %c16_i32_68 : i32 to vector<16x1xi32>
    %203 = arith.cmpi slt, %199, %202 : vector<16x1xi32>
    %204 = arith.andi %201, %203 : vector<16x1xi1>
    %205 = arith.extui %204 : vector<16x1xi1> to vector<16x1xi32>
    %206 = arith.sitofp %205 : vector<16x1xi32> to vector<16x1xf32>
    %207 = vector.broadcast %206 : vector<16x1xf32> to vector<16x32xf32>
    %208 = arith.mulf %197, %207 : vector<16x32xf32>
    %209 = arith.truncf %208 : vector<16x32xf32> to vector<16x32xbf16>
    %c6 = arith.constant 6 : index
    %c0_69 = arith.constant 0 : index
    %c0_70 = arith.constant 0 : index
    %210 = vector.load %arg10[%c6, %c0_69, %c0_70] : memref<9x32x64xbf16, #tpu.memory_space<vmem>>, vector<1x32x64xbf16>
    %211 = vector.shape_cast %210 : vector<1x32x64xbf16> to vector<32x64xbf16>
    %cst_71 = arith.constant dense<0.000000e+00> : vector<16x64xf32>
    %212 = tpu.matmul %209, %211, %cst_71 {dimension_numbers = #tpu.dot_dimension_numbers<[1], [0], [0], [1], [0, 0, 1, 1], [], []>} : vector<16x32xbf16>, vector<32x64xbf16>, vector<16x64xf32> -> vector<16x64xf32>
    %213 = arith.addf %196, %212 : vector<16x64xf32>
    %c13_i32 = arith.constant 13 : i32
    %214 = tpu.dynamic_rotate %106 by %c13_i32 dim 0 : vector<16x32xf32>, i32 -> vector<16x32xf32>
    %c3_i32_72 = arith.constant 3 : i32
    %215 = vector.broadcast %c3_i32_72 : i32 to vector<16x1xi32>
    %216 = arith.addi %107, %215 : vector<16x1xi32>
    %c0_i32_73 = arith.constant 0 : i32
    %217 = vector.broadcast %c0_i32_73 : i32 to vector<16x1xi32>
    %218 = arith.cmpi sge, %216, %217 : vector<16x1xi32>
    %c16_i32_74 = arith.constant 16 : i32
    %219 = vector.broadcast %c16_i32_74 : i32 to vector<16x1xi32>
    %220 = arith.cmpi slt, %216, %219 : vector<16x1xi32>
    %221 = arith.andi %218, %220 : vector<16x1xi1>
    %222 = arith.extui %221 : vector<16x1xi1> to vector<16x1xi32>
    %223 = arith.sitofp %222 : vector<16x1xi32> to vector<16x1xf32>
    %224 = vector.broadcast %223 : vector<16x1xf32> to vector<16x32xf32>
    %225 = arith.mulf %214, %224 : vector<16x32xf32>
    %226 = arith.truncf %225 : vector<16x32xf32> to vector<16x32xbf16>
    %c7 = arith.constant 7 : index
    %c0_75 = arith.constant 0 : index
    %c0_76 = arith.constant 0 : index
    %227 = vector.load %arg10[%c7, %c0_75, %c0_76] : memref<9x32x64xbf16, #tpu.memory_space<vmem>>, vector<1x32x64xbf16>
    %228 = vector.shape_cast %227 : vector<1x32x64xbf16> to vector<32x64xbf16>
    %cst_77 = arith.constant dense<0.000000e+00> : vector<16x64xf32>
    %229 = tpu.matmul %226, %228, %cst_77 {dimension_numbers = #tpu.dot_dimension_numbers<[1], [0], [0], [1], [0, 0, 1, 1], [], []>} : vector<16x32xbf16>, vector<32x64xbf16>, vector<16x64xf32> -> vector<16x64xf32>
    %230 = arith.addf %213, %229 : vector<16x64xf32>
    %c12_i32 = arith.constant 12 : i32
    %231 = tpu.dynamic_rotate %106 by %c12_i32 dim 0 : vector<16x32xf32>, i32 -> vector<16x32xf32>
    %c4_i32_78 = arith.constant 4 : i32
    %232 = vector.broadcast %c4_i32_78 : i32 to vector<16x1xi32>
    %233 = arith.addi %107, %232 : vector<16x1xi32>
    %c0_i32_79 = arith.constant 0 : i32
    %234 = vector.broadcast %c0_i32_79 : i32 to vector<16x1xi32>
    %235 = arith.cmpi sge, %233, %234 : vector<16x1xi32>
    %c16_i32_80 = arith.constant 16 : i32
    %236 = vector.broadcast %c16_i32_80 : i32 to vector<16x1xi32>
    %237 = arith.cmpi slt, %233, %236 : vector<16x1xi32>
    %238 = arith.andi %235, %237 : vector<16x1xi1>
    %239 = arith.extui %238 : vector<16x1xi1> to vector<16x1xi32>
    %240 = arith.sitofp %239 : vector<16x1xi32> to vector<16x1xf32>
    %241 = vector.broadcast %240 : vector<16x1xf32> to vector<16x32xf32>
    %242 = arith.mulf %231, %241 : vector<16x32xf32>
    %243 = arith.truncf %242 : vector<16x32xf32> to vector<16x32xbf16>
    %c8_81 = arith.constant 8 : index
    %c0_82 = arith.constant 0 : index
    %c0_83 = arith.constant 0 : index
    %244 = vector.load %arg10[%c8_81, %c0_82, %c0_83] : memref<9x32x64xbf16, #tpu.memory_space<vmem>>, vector<1x32x64xbf16>
    %245 = vector.shape_cast %244 : vector<1x32x64xbf16> to vector<32x64xbf16>
    %cst_84 = arith.constant dense<0.000000e+00> : vector<16x64xf32>
    %246 = tpu.matmul %243, %245, %cst_84 {dimension_numbers = #tpu.dot_dimension_numbers<[1], [0], [0], [1], [0, 0, 1, 1], [], []>} : vector<16x32xbf16>, vector<32x64xbf16>, vector<16x64xf32> -> vector<16x64xf32>
    %247 = arith.addf %230, %246 : vector<16x64xf32>
    %c0_85 = arith.constant 0 : index
    %c0_86 = arith.constant 0 : index
    %248 = vector.load %arg11[%c0_85, %c0_86] : memref<1x64xf32, #tpu.memory_space<vmem>>, vector<1x64xf32>
    %249 = vector.broadcast %248 : vector<1x64xf32> to vector<16x64xf32>
    %250 = arith.addf %247, %249 : vector<16x64xf32>
    %cst_87 = arith.constant 0.000000e+00 : f32
    %251 = vector.broadcast %cst_87 : f32 to vector<16x64xf32>
    %252 = arith.maximumf %250, %251 : vector<16x64xf32>
    %253 = arith.truncf %252 : vector<16x64xf32> to vector<16x64xbf16>
    %c0_88 = arith.constant 0 : index
    %c0_89 = arith.constant 0 : index
    %254 = vector.load %arg12[%c0_88, %c0_89] : memref<64x32xbf16, #tpu.memory_space<vmem>>, vector<64x32xbf16>
    %cst_90 = arith.constant dense<0.000000e+00> : vector<16x32xf32>
    %255 = tpu.matmul %253, %254, %cst_90 {dimension_numbers = #tpu.dot_dimension_numbers<[1], [0], [0], [1], [0, 0, 1, 1], [], []>} : vector<16x64xbf16>, vector<64x32xbf16>, vector<16x32xf32> -> vector<16x32xf32>
    %c0_91 = arith.constant 0 : index
    %c0_92 = arith.constant 0 : index
    %256 = vector.load %arg13[%c0_91, %c0_92] : memref<1x32xf32, #tpu.memory_space<vmem>>, vector<1x32xf32>
    %257 = vector.broadcast %256 : vector<1x32xf32> to vector<16x32xf32>
    %258 = arith.addf %255, %257 : vector<16x32xf32>
    %259 = arith.addf %106, %258 : vector<16x32xf32>
    %c0_93 = arith.constant 0 : index
    %c0_94 = arith.constant 0 : index
    %260 = vector.load %arg14[%c0_93, %c0_94] : memref<1x32xf32, #tpu.memory_space<vmem>>, vector<1x32xf32>
    %c0_95 = arith.constant 0 : index
    %c0_96 = arith.constant 0 : index
    %261 = vector.load %arg15[%c0_95, %c0_96] : memref<1x32xf32, #tpu.memory_space<vmem>>, vector<1x32xf32>
    %cst_97 = arith.constant dense<0.000000e+00> : vector<16xf32>
    %262 = vector.multi_reduction <add>, %259, %cst_97 [1] : vector<16x32xf32> to vector<16xf32>
    %263 = vector.shape_cast %262 : vector<16xf32> to vector<16x1xf32>
    %cst_98 = arith.constant 3.200000e+01 : f32
    %264 = vector.broadcast %cst_98 : f32 to vector<16x1xf32>
    %265 = arith.divf %263, %264 : vector<16x1xf32>
    %266 = arith.mulf %259, %259 : vector<16x32xf32>
    %cst_99 = arith.constant dense<0.000000e+00> : vector<16xf32>
    %267 = vector.multi_reduction <add>, %266, %cst_99 [1] : vector<16x32xf32> to vector<16xf32>
    %268 = vector.shape_cast %267 : vector<16xf32> to vector<16x1xf32>
    %cst_100 = arith.constant 3.200000e+01 : f32
    %269 = vector.broadcast %cst_100 : f32 to vector<16x1xf32>
    %270 = arith.divf %268, %269 : vector<16x1xf32>
    %271 = arith.mulf %265, %265 : vector<16x1xf32>
    %272 = arith.subf %270, %271 : vector<16x1xf32>
    %cst_101 = arith.constant 0.000000e+00 : f32
    %273 = vector.broadcast %cst_101 : f32 to vector<16x1xf32>
    %274 = arith.maximumf %272, %273 : vector<16x1xf32>
    %275 = vector.broadcast %265 : vector<16x1xf32> to vector<16x32xf32>
    %276 = arith.subf %259, %275 : vector<16x32xf32>
    %cst_102 = arith.constant 9.99999974E-6 : f32
    %277 = vector.broadcast %cst_102 : f32 to vector<16x1xf32>
    %278 = arith.addf %274, %277 : vector<16x1xf32>
    %279 = math.rsqrt %278 : vector<16x1xf32>
    %280 = vector.broadcast %279 : vector<16x1xf32> to vector<16x32xf32>
    %281 = arith.mulf %276, %280 : vector<16x32xf32>
    %282 = vector.broadcast %260 : vector<1x32xf32> to vector<16x32xf32>
    %283 = arith.mulf %281, %282 : vector<16x32xf32>
    %284 = vector.broadcast %261 : vector<1x32xf32> to vector<16x32xf32>
    %285 = arith.addf %283, %284 : vector<16x32xf32>
    %286 = arith.truncf %285 : vector<16x32xf32> to vector<16x32xbf16>
    %c0_103 = arith.constant 0 : index
    %c0_104 = arith.constant 0 : index
    %c0_105 = arith.constant 0 : index
    %287 = vector.load %arg16[%c0_103, %c0_104, %c0_105] : memref<1x16x32xbf16, #tpu.memory_space<vmem>>, vector<1x16x32xbf16>
    %288 = vector.shape_cast %287 : vector<1x16x32xbf16> to vector<16x32xbf16>
    %289 = vector.shape_cast %286 : vector<16x32xbf16> to vector<1x16x32xbf16>
    tpu.vector_store %arg16[%c0_103, %c0_104, %c0_105], %289 {strides = array<i32>} : memref<1x16x32xbf16, #tpu.memory_space<vmem>>, vector<1x16x32xbf16>,
    return
  }
  func.func @transform_0(%arg0: i32) -> (i32, i32, i32) {
    %c0_i32 = arith.constant 0 : i32
    %c0_i32_0 = arith.constant 0 : i32
    %c0_i32_1 = arith.constant 0 : i32
    return %arg0, %c0_i32, %c0_i32_0 : i32, i32, i32
  }
  func.func @transform_1(%arg0: i32) -> (i32, i32, i32) {
    %c0_i32 = arith.constant 0 : i32
    %c0_i32_0 = arith.constant 0 : i32
    %c0_i32_1 = arith.constant 0 : i32
    return %arg0, %c0_i32, %c0_i32_0 : i32, i32, i32
  }
  func.func @transform_2(%arg0: i32) -> (i32, i32) {
    %c0_i32 = arith.constant 0 : i32
    %c0_i32_0 = arith.constant 0 : i32
    %c0_i32_1 = arith.constant 0 : i32
    return %c0_i32, %c0_i32_0 : i32, i32
  }
  func.func @transform_3(%arg0: i32) -> (i32, i32) {
    %c0_i32 = arith.constant 0 : i32
    %c0_i32_0 = arith.constant 0 : i32
    %c0_i32_1 = arith.constant 0 : i32
    return %c0_i32, %c0_i32_0 : i32, i32
  }
  func.func @transform_4(%arg0: i32) -> (i32, i32) {
    %c0_i32 = arith.constant 0 : i32
    %c0_i32_0 = arith.constant 0 : i32
    %c0_i32_1 = arith.constant 0 : i32
    return %c0_i32, %c0_i32_0 : i32, i32
  }
  func.func @transform_5(%arg0: i32) -> (i32, i32) {
    %c0_i32 = arith.constant 0 : i32
    %c0_i32_0 = arith.constant 0 : i32
    %c0_i32_1 = arith.constant 0 : i32
    return %c0_i32, %c0_i32_0 : i32, i32
  }
  func.func @transform_6(%arg0: i32) -> (i32, i32) {
    %c0_i32 = arith.constant 0 : i32
    %c0_i32_0 = arith.constant 0 : i32
    %c0_i32_1 = arith.constant 0 : i32
    return %c0_i32, %c0_i32_0 : i32, i32
  }
  func.func @transform_7(%arg0: i32) -> (i32, i32) {
    %c0_i32 = arith.constant 0 : i32
    %c0_i32_0 = arith.constant 0 : i32
    %c0_i32_1 = arith.constant 0 : i32
    return %c0_i32, %c0_i32_0 : i32, i32
  }
  func.func @transform_8(%arg0: i32) -> (i32, i32) {
    %c0_i32 = arith.constant 0 : i32
    %c0_i32_0 = arith.constant 0 : i32
    %c0_i32_1 = arith.constant 0 : i32
    return %c0_i32, %c0_i32_0 : i32, i32
  }
  func.func @transform_9(%arg0: i32) -> (i32, i32, i32) {
    %c0_i32 = arith.constant 0 : i32
    %c0_i32_0 = arith.constant 0 : i32
    %c0_i32_1 = arith.constant 0 : i32
    %c0_i32_2 = arith.constant 0 : i32
    return %c0_i32, %c0_i32_0, %c0_i32_1 : i32, i32, i32
  }
  func.func @transform_10(%arg0: i32) -> (i32, i32) {
    %c0_i32 = arith.constant 0 : i32
    %c0_i32_0 = arith.constant 0 : i32
    %c0_i32_1 = arith.constant 0 : i32
    return %c0_i32, %c0_i32_0 : i32, i32
  }
  func.func @transform_11(%arg0: i32) -> (i32, i32) {
    %c0_i32 = arith.constant 0 : i32
    %c0_i32_0 = arith.constant 0 : i32
    %c0_i32_1 = arith.constant 0 : i32
    return %c0_i32, %c0_i32_0 : i32, i32
  }
  func.func @transform_12(%arg0: i32) -> (i32, i32) {
    %c0_i32 = arith.constant 0 : i32
    %c0_i32_0 = arith.constant 0 : i32
    %c0_i32_1 = arith.constant 0 : i32
    return %c0_i32, %c0_i32_0 : i32, i32
  }
  func.func @transform_13(%arg0: i32) -> (i32, i32) {
    %c0_i32 = arith.constant 0 : i32
    %c0_i32_0 = arith.constant 0 : i32
    %c0_i32_1 = arith.constant 0 : i32
    return %c0_i32, %c0_i32_0 : i32, i32
  }
  func.func @transform_14(%arg0: i32) -> (i32, i32) {
    %c0_i32 = arith.constant 0 : i32
    %c0_i32_0 = arith.constant 0 : i32
    %c0_i32_1 = arith.constant 0 : i32
    return %c0_i32, %c0_i32_0 : i32, i32
  }
  func.func @transform_15(%arg0: i32) -> (i32, i32, i32) {
    %c0_i32 = arith.constant 0 : i32
    %c0_i32_0 = arith.constant 0 : i32
    %c0_i32_1 = arith.constant 0 : i32
    return %arg0, %c0_i32, %c0_i32_0 : i32, i32, i32
  }
}

module attributes {stable_mosaic.version = 11 : i64} {
  func.func @_fft_block_kernel(%arg0: i32, %arg1: memref<1x16x32xf32, #tpu.memory_space<vmem>>, %arg2: memref<1x1x16xf32, #tpu.memory_space<vmem>>, %arg3: memref<16x32xf32, #tpu.memory_space<vmem>>, %arg4: memref<32x96xbf16, #tpu.memory_space<vmem>>, %arg5: memref<1x96xf32, #tpu.memory_space<vmem>>, %arg6: memref<32x32xbf16, #tpu.memory_space<vmem>>, %arg7: memref<1x32xf32, #tpu.memory_space<vmem>>, %arg8: memref<1x32xf32, #tpu.memory_space<vmem>>, %arg9: memref<1x32xf32, #tpu.memory_space<vmem>>, %arg10: memref<9x32x64xbf16, #tpu.memory_space<vmem>>, %arg11: memref<1x64xf32, #tpu.memory_space<vmem>>, %arg12: memref<64x32xbf16, #tpu.memory_space<vmem>>, %arg13: memref<1x32xf32, #tpu.memory_space<vmem>>, %arg14: memref<1x32xf32, #tpu.memory_space<vmem>>, %arg15: memref<1x32xf32, #tpu.memory_space<vmem>>, %arg16: memref<1x16x32xbf16, #tpu.memory_space<vmem>>, %arg17: memref<16x32xbf16, #tpu.memory_space<vmem>>) attributes {dimension_semantics = [#tpu.dimension_semantics<parallel>], iteration_bounds = array<i64: 2>, scalar_prefetch = 0 : i64, scratch_operands = 1 : i64, tpu.core_type = #tpu.core_type<tc>, window_params = [{transform_indices = @transform_0, window_bounds = array<i64: 1, 16, 32>}, {transform_indices = @transform_1, window_bounds = array<i64: 1, 1, 16>}, {pipeline_mode = #tpu.pipeline_mode<synchronous>, transform_indices = @transform_2, window_bounds = array<i64: 16, 32>}, {pipeline_mode = #tpu.pipeline_mode<synchronous>, transform_indices = @transform_3, window_bounds = array<i64: 32, 96>}, {pipeline_mode = #tpu.pipeline_mode<synchronous>, transform_indices = @transform_4, window_bounds = array<i64: 1, 96>}, {pipeline_mode = #tpu.pipeline_mode<synchronous>, transform_indices = @transform_5, window_bounds = array<i64: 32, 32>}, {pipeline_mode = #tpu.pipeline_mode<synchronous>, transform_indices = @transform_6, window_bounds = array<i64: 1, 32>}, {pipeline_mode = #tpu.pipeline_mode<synchronous>, transform_indices = @transform_7, window_bounds = array<i64: 1, 32>}, {pipeline_mode = #tpu.pipeline_mode<synchronous>, transform_indices = @transform_8, window_bounds = array<i64: 1, 32>}, {pipeline_mode = #tpu.pipeline_mode<synchronous>, transform_indices = @transform_9, window_bounds = array<i64: 9, 32, 64>}, {pipeline_mode = #tpu.pipeline_mode<synchronous>, transform_indices = @transform_10, window_bounds = array<i64: 1, 64>}, {pipeline_mode = #tpu.pipeline_mode<synchronous>, transform_indices = @transform_11, window_bounds = array<i64: 64, 32>}, {pipeline_mode = #tpu.pipeline_mode<synchronous>, transform_indices = @transform_12, window_bounds = array<i64: 1, 32>}, {pipeline_mode = #tpu.pipeline_mode<synchronous>, transform_indices = @transform_13, window_bounds = array<i64: 1, 32>}, {pipeline_mode = #tpu.pipeline_mode<synchronous>, transform_indices = @transform_14, window_bounds = array<i64: 1, 32>}, {transform_indices = @transform_15, window_bounds = array<i64: 1, 16, 32>}]} {
    %c0 = arith.constant 0 : index
    %c0_0 = arith.constant 0 : index
    %c0_1 = arith.constant 0 : index
    %0 = vector.load %arg1[%c0, %c0_0, %c0_1] : memref<1x16x32xf32, #tpu.memory_space<vmem>>, vector<1x16x32xf32>
    %1 = vector.shape_cast %0 : vector<1x16x32xf32> to vector<16x32xf32>
    %c0_2 = arith.constant 0 : index
    %c0_3 = arith.constant 0 : index
    %2 = vector.load %arg3[%c0_2, %c0_3] : memref<16x32xf32, #tpu.memory_space<vmem>>, vector<16x32xf32>
    %3 = arith.addf %1, %2 : vector<16x32xf32>
    %c0_4 = arith.constant 0 : index
    %c0_5 = arith.constant 0 : index
    %c0_6 = arith.constant 0 : index
    %4 = vector.load %arg2[%c0_4, %c0_5, %c0_6] : memref<1x1x16xf32, #tpu.memory_space<vmem>>, vector<1x1x16xf32>
    %5 = vector.shape_cast %4 : vector<1x1x16xf32> to vector<1x16xf32>
    %6 = arith.truncf %3 : vector<16x32xf32> to vector<16x32xbf16>
    %c0_7 = arith.constant 0 : index
    %c0_8 = arith.constant 0 : index
    %7 = vector.load %arg4[%c0_7, %c0_8] : memref<32x96xbf16, #tpu.memory_space<vmem>>, vector<32x96xbf16>
    %cst = arith.constant dense<0.000000e+00> : vector<16x96xf32>
    %8 = tpu.matmul %6, %7, %cst {dimension_numbers = #tpu.dot_dimension_numbers<[1], [0], [0], [1], [0, 0, 1, 1], [], []>} : vector<16x32xbf16>, vector<32x96xbf16>, vector<16x96xf32> -> vector<16x96xf32>
    %c0_9 = arith.constant 0 : index
    %c0_10 = arith.constant 0 : index
    %9 = vector.load %arg5[%c0_9, %c0_10] : memref<1x96xf32, #tpu.memory_space<vmem>>, vector<1x96xf32>
    %10 = vector.broadcast %9 : vector<1x96xf32> to vector<16x96xf32>
    %11 = arith.addf %8, %10 : vector<16x96xf32>
    %12 = arith.truncf %11 : vector<16x96xf32> to vector<16x96xbf16>
    %13 = vector.extract_strided_slice %12 {offsets = [0, 0], sizes = [16, 8], strides = [1, 1]} : vector<16x96xbf16> to vector<16x8xbf16>
    %14 = vector.extract_strided_slice %12 {offsets = [0, 8], sizes = [16, 8], strides = [1, 1]} : vector<16x96xbf16> to vector<16x8xbf16>
    %15 = vector.extract_strided_slice %12 {offsets = [0, 16], sizes = [16, 8], strides = [1, 1]} : vector<16x96xbf16> to vector<16x8xbf16>
    %16 = vector.extract_strided_slice %12 {offsets = [0, 24], sizes = [16, 8], strides = [1, 1]} : vector<16x96xbf16> to vector<16x8xbf16>
    %17 = vector.shape_cast %13 : vector<16x8xbf16> to vector<1x16x8xbf16>
    %18 = vector.shape_cast %14 : vector<16x8xbf16> to vector<1x16x8xbf16>
    %19 = vector.shape_cast %15 : vector<16x8xbf16> to vector<1x16x8xbf16>
    %20 = vector.shape_cast %16 : vector<16x8xbf16> to vector<1x16x8xbf16>
    %21 = tpu.concatenate %17, %18, %19, %20 in 0 : vector<1x16x8xbf16>, vector<1x16x8xbf16>, vector<1x16x8xbf16>, vector<1x16x8xbf16> -> vector<4x16x8xbf16>
    %22 = vector.extract_strided_slice %12 {offsets = [0, 32], sizes = [16, 8], strides = [1, 1]} : vector<16x96xbf16> to vector<16x8xbf16>
    %23 = vector.extract_strided_slice %12 {offsets = [0, 40], sizes = [16, 8], strides = [1, 1]} : vector<16x96xbf16> to vector<16x8xbf16>
    %24 = vector.extract_strided_slice %12 {offsets = [0, 48], sizes = [16, 8], strides = [1, 1]} : vector<16x96xbf16> to vector<16x8xbf16>
    %25 = vector.extract_strided_slice %12 {offsets = [0, 56], sizes = [16, 8], strides = [1, 1]} : vector<16x96xbf16> to vector<16x8xbf16>
    %26 = vector.shape_cast %22 : vector<16x8xbf16> to vector<1x16x8xbf16>
    %27 = vector.shape_cast %23 : vector<16x8xbf16> to vector<1x16x8xbf16>
    %28 = vector.shape_cast %24 : vector<16x8xbf16> to vector<1x16x8xbf16>
    %29 = vector.shape_cast %25 : vector<16x8xbf16> to vector<1x16x8xbf16>
    %30 = tpu.concatenate %26, %27, %28, %29 in 0 : vector<1x16x8xbf16>, vector<1x16x8xbf16>, vector<1x16x8xbf16>, vector<1x16x8xbf16> -> vector<4x16x8xbf16>
    %31 = vector.extract_strided_slice %12 {offsets = [0, 64], sizes = [16, 8], strides = [1, 1]} : vector<16x96xbf16> to vector<16x8xbf16>
    %32 = vector.extract_strided_slice %12 {offsets = [0, 72], sizes = [16, 8], strides = [1, 1]} : vector<16x96xbf16> to vector<16x8xbf16>
    %33 = vector.extract_strided_slice %12 {offsets = [0, 80], sizes = [16, 8], strides = [1, 1]} : vector<16x96xbf16> to vector<16x8xbf16>
    %34 = vector.extract_strided_slice %12 {offsets = [0, 88], sizes = [16, 8], strides = [1, 1]} : vector<16x96xbf16> to vector<16x8xbf16>
    %35 = vector.shape_cast %31 : vector<16x8xbf16> to vector<1x16x8xbf16>
    %36 = vector.shape_cast %32 : vector<16x8xbf16> to vector<1x16x8xbf16>
    %37 = vector.shape_cast %33 : vector<16x8xbf16> to vector<1x16x8xbf16>
    %38 = vector.shape_cast %34 : vector<16x8xbf16> to vector<1x16x8xbf16>
    %39 = tpu.concatenate %35, %36, %37, %38 in 0 : vector<1x16x8xbf16>, vector<1x16x8xbf16>, vector<1x16x8xbf16>, vector<1x16x8xbf16> -> vector<4x16x8xbf16>
    "tpu.trace_start"() <{level = 10 : i32, message = "hqd,hkd->hqk"}> : () -> ()
    %cst_11 = arith.constant dense<0.000000e+00> : vector<4x16x16xf32>
    %40 = tpu.matmul %21, %30, %cst_11 {dimension_numbers = #tpu.dot_dimension_numbers<[2], [2], [1], [1], [0, 0, 0, 1, 1, 1], [0], [0]>} : vector<4x16x8xbf16>, vector<4x16x8xbf16>, vector<4x16x16xf32> -> vector<4x16x16xf32>
    "tpu.trace_stop"() : () -> ()
    %cst_12 = arith.constant 0.353553385 : f32
    %41 = vector.broadcast %cst_12 : f32 to vector<4x16x16xf32>
    %42 = arith.mulf %40, %41 : vector<4x16x16xf32>
    %43 = vector.shape_cast %5 : vector<1x16xf32> to vector<1x1x16xf32>
    %44 = vector.broadcast %43 : vector<1x1x16xf32> to vector<4x16x16xf32>
    %45 = arith.addf %42, %44 : vector<4x16x16xf32>
    %cst_13 = arith.constant dense<0xFF800000> : vector<4x16xf32>
    %46 = vector.multi_reduction <maximumf>, %45, %cst_13 [2] : vector<4x16x16xf32> to vector<4x16xf32>
    %47 = vector.shape_cast %46 : vector<4x16xf32> to vector<4x16x1xf32>
    %48 = vector.broadcast %47 : vector<4x16x1xf32> to vector<4x16x16xf32>
    %49 = arith.subf %45, %48 : vector<4x16x16xf32>
    %50 = math.exp %49 : vector<4x16x16xf32>
    %cst_14 = arith.constant dense<0.000000e+00> : vector<4x16xf32>
    %51 = vector.multi_reduction <add>, %50, %cst_14 [2] : vector<4x16x16xf32> to vector<4x16xf32>
    %52 = vector.shape_cast %51 : vector<4x16xf32> to vector<4x16x1xf32>
    %53 = tpu.reciprocal %52 {approx = true} : vector<4x16x1xf32> -> vector<4x16x1xf32>
    %54 = vector.broadcast %53 : vector<4x16x1xf32> to vector<4x16x16xf32>
    %55 = arith.mulf %50, %54 : vector<4x16x16xf32>
    %56 = arith.truncf %55 : vector<4x16x16xf32> to vector<4x16x16xbf16>
    "tpu.trace_start"() <{level = 10 : i32, message = "hqk,hkd->hqd"}> : () -> ()
    %cst_15 = arith.constant dense<0.000000e+00> : vector<4x16x8xf32>
    %57 = tpu.matmul %56, %39, %cst_15 {dimension_numbers = #tpu.dot_dimension_numbers<[2], [1], [1], [2], [0, 0, 0, 1, 1, 2], [0], [0]>} : vector<4x16x16xbf16>, vector<4x16x8xbf16>, vector<4x16x8xf32> -> vector<4x16x8xf32>
    "tpu.trace_stop"() : () -> ()
    %58 = vector.extract_strided_slice %57 {offsets = [0, 0, 0], sizes = [1, 16, 8], strides = [1, 1, 1]} : vector<4x16x8xf32> to vector<1x16x8xf32>
    %59 = vector.shape_cast %58 : vector<1x16x8xf32> to vector<16x8xf32>
    %60 = arith.truncf %59 : vector<16x8xf32> to vector<16x8xbf16>
    %c0_16 = arith.constant 0 : index
    %c0_17 = arith.constant 0 : index
    %61 = vector.load %arg17[%c0_16, %c0_17] : memref<16x32xbf16, #tpu.memory_space<vmem>>, vector<16x8xbf16>
    tpu.vector_store %arg17[%c0_16, %c0_17], %60 {strides = array<i32>} : memref<16x32xbf16, #tpu.memory_space<vmem>>, vector<16x8xbf16>,
    %62 = vector.extract_strided_slice %57 {offsets = [1, 0, 0], sizes = [1, 16, 8], strides = [1, 1, 1]} : vector<4x16x8xf32> to vector<1x16x8xf32>
    %63 = vector.shape_cast %62 : vector<1x16x8xf32> to vector<16x8xf32>
    %64 = arith.truncf %63 : vector<16x8xf32> to vector<16x8xbf16>
    %c0_18 = arith.constant 0 : index
    %c8 = arith.constant 8 : index
    %65 = vector.load %arg17[%c0_18, %c8] : memref<16x32xbf16, #tpu.memory_space<vmem>>, vector<16x8xbf16>
    tpu.vector_store %arg17[%c0_18, %c8], %64 {strides = array<i32>} : memref<16x32xbf16, #tpu.memory_space<vmem>>, vector<16x8xbf16>,
    %66 = vector.extract_strided_slice %57 {offsets = [2, 0, 0], sizes = [1, 16, 8], strides = [1, 1, 1]} : vector<4x16x8xf32> to vector<1x16x8xf32>
    %67 = vector.shape_cast %66 : vector<1x16x8xf32> to vector<16x8xf32>
    %68 = arith.truncf %67 : vector<16x8xf32> to vector<16x8xbf16>
    %c0_19 = arith.constant 0 : index
    %c16 = arith.constant 16 : index
    %69 = vector.load %arg17[%c0_19, %c16] : memref<16x32xbf16, #tpu.memory_space<vmem>>, vector<16x8xbf16>
    tpu.vector_store %arg17[%c0_19, %c16], %68 {strides = array<i32>} : memref<16x32xbf16, #tpu.memory_space<vmem>>, vector<16x8xbf16>,
    %70 = vector.extract_strided_slice %57 {offsets = [3, 0, 0], sizes = [1, 16, 8], strides = [1, 1, 1]} : vector<4x16x8xf32> to vector<1x16x8xf32>
    %71 = vector.shape_cast %70 : vector<1x16x8xf32> to vector<16x8xf32>
    %72 = arith.truncf %71 : vector<16x8xf32> to vector<16x8xbf16>
    %c0_20 = arith.constant 0 : index
    %c24 = arith.constant 24 : index
    %73 = vector.load %arg17[%c0_20, %c24] : memref<16x32xbf16, #tpu.memory_space<vmem>>, vector<16x8xbf16>
    tpu.vector_store %arg17[%c0_20, %c24], %72 {strides = array<i32>} : memref<16x32xbf16, #tpu.memory_space<vmem>>, vector<16x8xbf16>,
    %c0_21 = arith.constant 0 : index
    %c0_22 = arith.constant 0 : index
    %74 = vector.load %arg17[%c0_21, %c0_22] : memref<16x32xbf16, #tpu.memory_space<vmem>>, vector<16x32xbf16>
    %c0_23 = arith.constant 0 : index
    %c0_24 = arith.constant 0 : index
    %75 = vector.load %arg6[%c0_23, %c0_24] : memref<32x32xbf16, #tpu.memory_space<vmem>>, vector<32x32xbf16>
    %cst_25 = arith.constant dense<0.000000e+00> : vector<16x32xf32>
    %76 = tpu.matmul %74, %75, %cst_25 {dimension_numbers = #tpu.dot_dimension_numbers<[1], [0], [0], [1], [0, 0, 1, 1], [], []>} : vector<16x32xbf16>, vector<32x32xbf16>, vector<16x32xf32> -> vector<16x32xf32>
    %c0_26 = arith.constant 0 : index
    %c0_27 = arith.constant 0 : index
    %77 = vector.load %arg7[%c0_26, %c0_27] : memref<1x32xf32, #tpu.memory_space<vmem>>, vector<1x32xf32>
    %78 = vector.broadcast %77 : vector<1x32xf32> to vector<16x32xf32>
    %79 = arith.addf %76, %78 : vector<16x32xf32>
    %80 = arith.addf %3, %79 : vector<16x32xf32>
    %c0_28 = arith.constant 0 : index
    %c0_29 = arith.constant 0 : index
    %81 = vector.load %arg8[%c0_28, %c0_29] : memref<1x32xf32, #tpu.memory_space<vmem>>, vector<1x32xf32>
    %c0_30 = arith.constant 0 : index
    %c0_31 = arith.constant 0 : index
    %82 = vector.load %arg9[%c0_30, %c0_31] : memref<1x32xf32, #tpu.memory_space<vmem>>, vector<1x32xf32>
    %cst_32 = arith.constant dense<0.000000e+00> : vector<16xf32>
    %83 = vector.multi_reduction <add>, %80, %cst_32 [1] : vector<16x32xf32> to vector<16xf32>
    %84 = vector.shape_cast %83 : vector<16xf32> to vector<16x1xf32>
    %cst_33 = arith.constant 3.200000e+01 : f32
    %85 = vector.broadcast %cst_33 : f32 to vector<16x1xf32>
    %86 = arith.divf %84, %85 : vector<16x1xf32>
    %87 = arith.mulf %80, %80 : vector<16x32xf32>
    %cst_34 = arith.constant dense<0.000000e+00> : vector<16xf32>
    %88 = vector.multi_reduction <add>, %87, %cst_34 [1] : vector<16x32xf32> to vector<16xf32>
    %89 = vector.shape_cast %88 : vector<16xf32> to vector<16x1xf32>
    %cst_35 = arith.constant 3.200000e+01 : f32
    %90 = vector.broadcast %cst_35 : f32 to vector<16x1xf32>
    %91 = arith.divf %89, %90 : vector<16x1xf32>
    %92 = arith.mulf %86, %86 : vector<16x1xf32>
    %93 = arith.subf %91, %92 : vector<16x1xf32>
    %cst_36 = arith.constant 0.000000e+00 : f32
    %94 = vector.broadcast %cst_36 : f32 to vector<16x1xf32>
    %95 = arith.maximumf %93, %94 : vector<16x1xf32>
    %96 = vector.broadcast %86 : vector<16x1xf32> to vector<16x32xf32>
    %97 = arith.subf %80, %96 : vector<16x32xf32>
    %cst_37 = arith.constant 9.99999974E-6 : f32
    %98 = vector.broadcast %cst_37 : f32 to vector<16x1xf32>
    %99 = arith.addf %95, %98 : vector<16x1xf32>
    %100 = math.rsqrt %99 : vector<16x1xf32>
    %101 = vector.broadcast %100 : vector<16x1xf32> to vector<16x32xf32>
    %102 = arith.mulf %97, %101 : vector<16x32xf32>
    %103 = vector.broadcast %81 : vector<1x32xf32> to vector<16x32xf32>
    %104 = arith.mulf %102, %103 : vector<16x32xf32>
    %105 = vector.broadcast %82 : vector<1x32xf32> to vector<16x32xf32>
    %106 = arith.addf %104, %105 : vector<16x32xf32>
    %107 = tpu.iota {dimensions = array<i32: 0>} : vector<16x1xi32>
    %c4_i32 = arith.constant 4 : i32
    %108 = tpu.dynamic_rotate %106 by %c4_i32 dim 0 : vector<16x32xf32>, i32 -> vector<16x32xf32>
    %c-4_i32 = arith.constant -4 : i32
    %109 = vector.broadcast %c-4_i32 : i32 to vector<16x1xi32>
    %110 = arith.addi %107, %109 : vector<16x1xi32>
    %c0_i32 = arith.constant 0 : i32
    %111 = vector.broadcast %c0_i32 : i32 to vector<16x1xi32>
    %112 = arith.cmpi sge, %110, %111 : vector<16x1xi32>
    %c16_i32 = arith.constant 16 : i32
    %113 = vector.broadcast %c16_i32 : i32 to vector<16x1xi32>
    %114 = arith.cmpi slt, %110, %113 : vector<16x1xi32>
    %115 = arith.andi %112, %114 : vector<16x1xi1>
    %116 = arith.extui %115 : vector<16x1xi1> to vector<16x1xi32>
    %117 = arith.sitofp %116 : vector<16x1xi32> to vector<16x1xf32>
    %118 = vector.broadcast %117 : vector<16x1xf32> to vector<16x32xf32>
    %119 = arith.mulf %108, %118 : vector<16x32xf32>
    %120 = arith.truncf %119 : vector<16x32xf32> to vector<16x32xbf16>
    %c0_38 = arith.constant 0 : index
    %c0_39 = arith.constant 0 : index
    %c0_40 = arith.constant 0 : index
    %121 = vector.load %arg10[%c0_38, %c0_39, %c0_40] : memref<9x32x64xbf16, #tpu.memory_space<vmem>>, vector<1x32x64xbf16>
    %122 = vector.shape_cast %121 : vector<1x32x64xbf16> to vector<32x64xbf16>
    %cst_41 = arith.constant dense<0.000000e+00> : vector<16x64xf32>
    %123 = tpu.matmul %120, %122, %cst_41 {dimension_numbers = #tpu.dot_dimension_numbers<[1], [0], [0], [1], [0, 0, 1, 1], [], []>} : vector<16x32xbf16>, vector<32x64xbf16>, vector<16x64xf32> -> vector<16x64xf32>
    %c3_i32 = arith.constant 3 : i32
    %124 = tpu.dynamic_rotate %106 by %c3_i32 dim 0 : vector<16x32xf32>, i32 -> vector<16x32xf32>
    %c-3_i32 = arith.constant -3 : i32
    %125 = vector.broadcast %c-3_i32 : i32 to vector<16x1xi32>
    %126 = arith.addi %107, %125 : vector<16x1xi32>
    %c0_i32_42 = arith.constant 0 : i32
    %127 = vector.broadcast %c0_i32_42 : i32 to vector<16x1xi32>
    %128 = arith.cmpi sge, %126, %127 : vector<16x1xi32>
    %c16_i32_43 = arith.constant 16 : i32
    %129 = vector.broadcast %c16_i32_43 : i32 to vector<16x1xi32>
    %130 = arith.cmpi slt, %126, %129 : vector<16x1xi32>
    %131 = arith.andi %128, %130 : vector<16x1xi1>
    %132 = arith.extui %131 : vector<16x1xi1> to vector<16x1xi32>
    %133 = arith.sitofp %132 : vector<16x1xi32> to vector<16x1xf32>
    %134 = vector.broadcast %133 : vector<16x1xf32> to vector<16x32xf32>
    %135 = arith.mulf %124, %134 : vector<16x32xf32>
    %136 = arith.truncf %135 : vector<16x32xf32> to vector<16x32xbf16>
    %c1 = arith.constant 1 : index
    %c0_44 = arith.constant 0 : index
    %c0_45 = arith.constant 0 : index
    %137 = vector.load %arg10[%c1, %c0_44, %c0_45] : memref<9x32x64xbf16, #tpu.memory_space<vmem>>, vector<1x32x64xbf16>
    %138 = vector.shape_cast %137 : vector<1x32x64xbf16> to vector<32x64xbf16>
    %cst_46 = arith.constant dense<0.000000e+00> : vector<16x64xf32>
    %139 = tpu.matmul %136, %138, %cst_46 {dimension_numbers = #tpu.dot_dimension_numbers<[1], [0], [0], [1], [0, 0, 1, 1], [], []>} : vector<16x32xbf16>, vector<32x64xbf16>, vector<16x64xf32> -> vector<16x64xf32>
    %140 = arith.addf %123, %139 : vector<16x64xf32>
    %c2_i32 = arith.constant 2 : i32
    %141 = tpu.dynamic_rotate %106 by %c2_i32 dim 0 : vector<16x32xf32>, i32 -> vector<16x32xf32>
    %c-2_i32 = arith.constant -2 : i32
    %142 = vector.broadcast %c-2_i32 : i32 to vector<16x1xi32>
    %143 = arith.addi %107, %142 : vector<16x1xi32>
    %c0_i32_47 = arith.constant 0 : i32
    %144 = vector.broadcast %c0_i32_47 : i32 to vector<16x1xi32>
    %145 = arith.cmpi sge, %143, %144 : vector<16x1xi32>
    %c16_i32_48 = arith.constant 16 : i32
    %146 = vector.broadcast %c16_i32_48 : i32 to vector<16x1xi32>
    %147 = arith.cmpi slt, %143, %146 : vector<16x1xi32>
    %148 = arith.andi %145, %147 : vector<16x1xi1>
    %149 = arith.extui %148 : vector<16x1xi1> to vector<16x1xi32>
    %150 = arith.sitofp %149 : vector<16x1xi32> to vector<16x1xf32>
    %151 = vector.broadcast %150 : vector<16x1xf32> to vector<16x32xf32>
    %152 = arith.mulf %141, %151 : vector<16x32xf32>
    %153 = arith.truncf %152 : vector<16x32xf32> to vector<16x32xbf16>
    %c2 = arith.constant 2 : index
    %c0_49 = arith.constant 0 : index
    %c0_50 = arith.constant 0 : index
    %154 = vector.load %arg10[%c2, %c0_49, %c0_50] : memref<9x32x64xbf16, #tpu.memory_space<vmem>>, vector<1x32x64xbf16>
    %155 = vector.shape_cast %154 : vector<1x32x64xbf16> to vector<32x64xbf16>
    %cst_51 = arith.constant dense<0.000000e+00> : vector<16x64xf32>
    %156 = tpu.matmul %153, %155, %cst_51 {dimension_numbers = #tpu.dot_dimension_numbers<[1], [0], [0], [1], [0, 0, 1, 1], [], []>} : vector<16x32xbf16>, vector<32x64xbf16>, vector<16x64xf32> -> vector<16x64xf32>
    %157 = arith.addf %140, %156 : vector<16x64xf32>
    %c1_i32 = arith.constant 1 : i32
    %158 = tpu.dynamic_rotate %106 by %c1_i32 dim 0 : vector<16x32xf32>, i32 -> vector<16x32xf32>
    %c-1_i32 = arith.constant -1 : i32
    %159 = vector.broadcast %c-1_i32 : i32 to vector<16x1xi32>
    %160 = arith.addi %107, %159 : vector<16x1xi32>
    %c0_i32_52 = arith.constant 0 : i32
    %161 = vector.broadcast %c0_i32_52 : i32 to vector<16x1xi32>
    %162 = arith.cmpi sge, %160, %161 : vector<16x1xi32>
    %c16_i32_53 = arith.constant 16 : i32
    %163 = vector.broadcast %c16_i32_53 : i32 to vector<16x1xi32>
    %164 = arith.cmpi slt, %160, %163 : vector<16x1xi32>
    %165 = arith.andi %162, %164 : vector<16x1xi1>
    %166 = arith.extui %165 : vector<16x1xi1> to vector<16x1xi32>
    %167 = arith.sitofp %166 : vector<16x1xi32> to vector<16x1xf32>
    %168 = vector.broadcast %167 : vector<16x1xf32> to vector<16x32xf32>
    %169 = arith.mulf %158, %168 : vector<16x32xf32>
    %170 = arith.truncf %169 : vector<16x32xf32> to vector<16x32xbf16>
    %c3 = arith.constant 3 : index
    %c0_54 = arith.constant 0 : index
    %c0_55 = arith.constant 0 : index
    %171 = vector.load %arg10[%c3, %c0_54, %c0_55] : memref<9x32x64xbf16, #tpu.memory_space<vmem>>, vector<1x32x64xbf16>
    %172 = vector.shape_cast %171 : vector<1x32x64xbf16> to vector<32x64xbf16>
    %cst_56 = arith.constant dense<0.000000e+00> : vector<16x64xf32>
    %173 = tpu.matmul %170, %172, %cst_56 {dimension_numbers = #tpu.dot_dimension_numbers<[1], [0], [0], [1], [0, 0, 1, 1], [], []>} : vector<16x32xbf16>, vector<32x64xbf16>, vector<16x64xf32> -> vector<16x64xf32>
    %174 = arith.addf %157, %173 : vector<16x64xf32>
    %175 = arith.truncf %106 : vector<16x32xf32> to vector<16x32xbf16>
    %c4 = arith.constant 4 : index
    %c0_57 = arith.constant 0 : index
    %c0_58 = arith.constant 0 : index
    %176 = vector.load %arg10[%c4, %c0_57, %c0_58] : memref<9x32x64xbf16, #tpu.memory_space<vmem>>, vector<1x32x64xbf16>
    %177 = vector.shape_cast %176 : vector<1x32x64xbf16> to vector<32x64xbf16>
    %cst_59 = arith.constant dense<0.000000e+00> : vector<16x64xf32>
    %178 = tpu.matmul %175, %177, %cst_59 {dimension_numbers = #tpu.dot_dimension_numbers<[1], [0], [0], [1], [0, 0, 1, 1], [], []>} : vector<16x32xbf16>, vector<32x64xbf16>, vector<16x64xf32> -> vector<16x64xf32>
    %179 = arith.addf %174, %178 : vector<16x64xf32>
    %c15_i32 = arith.constant 15 : i32
    %180 = tpu.dynamic_rotate %106 by %c15_i32 dim 0 : vector<16x32xf32>, i32 -> vector<16x32xf32>
    %c1_i32_60 = arith.constant 1 : i32
    %181 = vector.broadcast %c1_i32_60 : i32 to vector<16x1xi32>
    %182 = arith.addi %107, %181 : vector<16x1xi32>
    %c0_i32_61 = arith.constant 0 : i32
    %183 = vector.broadcast %c0_i32_61 : i32 to vector<16x1xi32>
    %184 = arith.cmpi sge, %182, %183 : vector<16x1xi32>
    %c16_i32_62 = arith.constant 16 : i32
    %185 = vector.broadcast %c16_i32_62 : i32 to vector<16x1xi32>
    %186 = arith.cmpi slt, %182, %185 : vector<16x1xi32>
    %187 = arith.andi %184, %186 : vector<16x1xi1>
    %188 = arith.extui %187 : vector<16x1xi1> to vector<16x1xi32>
    %189 = arith.sitofp %188 : vector<16x1xi32> to vector<16x1xf32>
    %190 = vector.broadcast %189 : vector<16x1xf32> to vector<16x32xf32>
    %191 = arith.mulf %180, %190 : vector<16x32xf32>
    %192 = arith.truncf %191 : vector<16x32xf32> to vector<16x32xbf16>
    %c5 = arith.constant 5 : index
    %c0_63 = arith.constant 0 : index
    %c0_64 = arith.constant 0 : index
    %193 = vector.load %arg10[%c5, %c0_63, %c0_64] : memref<9x32x64xbf16, #tpu.memory_space<vmem>>, vector<1x32x64xbf16>
    %194 = vector.shape_cast %193 : vector<1x32x64xbf16> to vector<32x64xbf16>
    %cst_65 = arith.constant dense<0.000000e+00> : vector<16x64xf32>
    %195 = tpu.matmul %192, %194, %cst_65 {dimension_numbers = #tpu.dot_dimension_numbers<[1], [0], [0], [1], [0, 0, 1, 1], [], []>} : vector<16x32xbf16>, vector<32x64xbf16>, vector<16x64xf32> -> vector<16x64xf32>
    %196 = arith.addf %179, %195 : vector<16x64xf32>
    %c14_i32 = arith.constant 14 : i32
    %197 = tpu.dynamic_rotate %106 by %c14_i32 dim 0 : vector<16x32xf32>, i32 -> vector<16x32xf32>
    %c2_i32_66 = arith.constant 2 : i32
    %198 = vector.broadcast %c2_i32_66 : i32 to vector<16x1xi32>
    %199 = arith.addi %107, %198 : vector<16x1xi32>
    %c0_i32_67 = arith.constant 0 : i32
    %200 = vector.broadcast %c0_i32_67 : i32 to vector<16x1xi32>
    %201 = arith.cmpi sge, %199, %200 : vector<16x1xi32>
    %c16_i32_68 = arith.constant 16 : i32
    %202 = vector.broadcast %c16_i32_68 : i32 to vector<16x1xi32>
    %203 = arith.cmpi slt, %199, %202 : vector<16x1xi32>
    %204 = arith.andi %201, %203 : vector<16x1xi1>
    %205 = arith.extui %204 : vector<16x1xi1> to vector<16x1xi32>
    %206 = arith.sitofp %205 : vector<16x1xi32> to vector<16x1xf32>
    %207 = vector.broadcast %206 : vector<16x1xf32> to vector<16x32xf32>
    %208 = arith.mulf %197, %207 : vector<16x32xf32>
    %209 = arith.truncf %208 : vector<16x32xf32> to vector<16x32xbf16>
    %c6 = arith.constant 6 : index
    %c0_69 = arith.constant 0 : index
    %c0_70 = arith.constant 0 : index
    %210 = vector.load %arg10[%c6, %c0_69, %c0_70] : memref<9x32x64xbf16, #tpu.memory_space<vmem>>, vector<1x32x64xbf16>
    %211 = vector.shape_cast %210 : vector<1x32x64xbf16> to vector<32x64xbf16>
    %cst_71 = arith.constant dense<0.000000e+00> : vector<16x64xf32>
    %212 = tpu.matmul %209, %211, %cst_71 {dimension_numbers = #tpu.dot_dimension_numbers<[1], [0], [0], [1], [0, 0, 1, 1], [], []>} : vector<16x32xbf16>, vector<32x64xbf16>, vector<16x64xf32> -> vector<16x64xf32>
    %213 = arith.addf %196, %212 : vector<16x64xf32>
    %c13_i32 = arith.constant 13 : i32
    %214 = tpu.dynamic_rotate %106 by %c13_i32 dim 0 : vector<16x32xf32>, i32 -> vector<16x32xf32>
    %c3_i32_72 = arith.constant 3 : i32
    %215 = vector.broadcast %c3_i32_72 : i32 to vector<16x1xi32>
    %216 = arith.addi %107, %215 : vector<16x1xi32>
    %c0_i32_73 = arith.constant 0 : i32
    %217 = vector.broadcast %c0_i32_73 : i32 to vector<16x1xi32>
    %218 = arith.cmpi sge, %216, %217 : vector<16x1xi32>
    %c16_i32_74 = arith.constant 16 : i32
    %219 = vector.broadcast %c16_i32_74 : i32 to vector<16x1xi32>
    %220 = arith.cmpi slt, %216, %219 : vector<16x1xi32>
    %221 = arith.andi %218, %220 : vector<16x1xi1>
    %222 = arith.extui %221 : vector<16x1xi1> to vector<16x1xi32>
    %223 = arith.sitofp %222 : vector<16x1xi32> to vector<16x1xf32>
    %224 = vector.broadcast %223 : vector<16x1xf32> to vector<16x32xf32>
    %225 = arith.mulf %214, %224 : vector<16x32xf32>
    %226 = arith.truncf %225 : vector<16x32xf32> to vector<16x32xbf16>
    %c7 = arith.constant 7 : index
    %c0_75 = arith.constant 0 : index
    %c0_76 = arith.constant 0 : index
    %227 = vector.load %arg10[%c7, %c0_75, %c0_76] : memref<9x32x64xbf16, #tpu.memory_space<vmem>>, vector<1x32x64xbf16>
    %228 = vector.shape_cast %227 : vector<1x32x64xbf16> to vector<32x64xbf16>
    %cst_77 = arith.constant dense<0.000000e+00> : vector<16x64xf32>
    %229 = tpu.matmul %226, %228, %cst_77 {dimension_numbers = #tpu.dot_dimension_numbers<[1], [0], [0], [1], [0, 0, 1, 1], [], []>} : vector<16x32xbf16>, vector<32x64xbf16>, vector<16x64xf32> -> vector<16x64xf32>
    %230 = arith.addf %213, %229 : vector<16x64xf32>
    %c12_i32 = arith.constant 12 : i32
    %231 = tpu.dynamic_rotate %106 by %c12_i32 dim 0 : vector<16x32xf32>, i32 -> vector<16x32xf32>
    %c4_i32_78 = arith.constant 4 : i32
    %232 = vector.broadcast %c4_i32_78 : i32 to vector<16x1xi32>
    %233 = arith.addi %107, %232 : vector<16x1xi32>
    %c0_i32_79 = arith.constant 0 : i32
    %234 = vector.broadcast %c0_i32_79 : i32 to vector<16x1xi32>
    %235 = arith.cmpi sge, %233, %234 : vector<16x1xi32>
    %c16_i32_80 = arith.constant 16 : i32
    %236 = vector.broadcast %c16_i32_80 : i32 to vector<16x1xi32>
    %237 = arith.cmpi slt, %233, %236 : vector<16x1xi32>
    %238 = arith.andi %235, %237 : vector<16x1xi1>
    %239 = arith.extui %238 : vector<16x1xi1> to vector<16x1xi32>
    %240 = arith.sitofp %239 : vector<16x1xi32> to vector<16x1xf32>
    %241 = vector.broadcast %240 : vector<16x1xf32> to vector<16x32xf32>
    %242 = arith.mulf %231, %241 : vector<16x32xf32>
    %243 = arith.truncf %242 : vector<16x32xf32> to vector<16x32xbf16>
    %c8_81 = arith.constant 8 : index
    %c0_82 = arith.constant 0 : index
    %c0_83 = arith.constant 0 : index
    %244 = vector.load %arg10[%c8_81, %c0_82, %c0_83] : memref<9x32x64xbf16, #tpu.memory_space<vmem>>, vector<1x32x64xbf16>
    %245 = vector.shape_cast %244 : vector<1x32x64xbf16> to vector<32x64xbf16>
    %cst_84 = arith.constant dense<0.000000e+00> : vector<16x64xf32>
    %246 = tpu.matmul %243, %245, %cst_84 {dimension_numbers = #tpu.dot_dimension_numbers<[1], [0], [0], [1], [0, 0, 1, 1], [], []>} : vector<16x32xbf16>, vector<32x64xbf16>, vector<16x64xf32> -> vector<16x64xf32>
    %247 = arith.addf %230, %246 : vector<16x64xf32>
    %c0_85 = arith.constant 0 : index
    %c0_86 = arith.constant 0 : index
    %248 = vector.load %arg11[%c0_85, %c0_86] : memref<1x64xf32, #tpu.memory_space<vmem>>, vector<1x64xf32>
    %249 = vector.broadcast %248 : vector<1x64xf32> to vector<16x64xf32>
    %250 = arith.addf %247, %249 : vector<16x64xf32>
    %cst_87 = arith.constant 0.000000e+00 : f32
    %251 = vector.broadcast %cst_87 : f32 to vector<16x64xf32>
    %252 = arith.maximumf %250, %251 : vector<16x64xf32>
    %253 = arith.truncf %252 : vector<16x64xf32> to vector<16x64xbf16>
    %c0_88 = arith.constant 0 : index
    %c0_89 = arith.constant 0 : index
    %254 = vector.load %arg12[%c0_88, %c0_89] : memref<64x32xbf16, #tpu.memory_space<vmem>>, vector<64x32xbf16>
    %cst_90 = arith.constant dense<0.000000e+00> : vector<16x32xf32>
    %255 = tpu.matmul %253, %254, %cst_90 {dimension_numbers = #tpu.dot_dimension_numbers<[1], [0], [0], [1], [0, 0, 1, 1], [], []>} : vector<16x64xbf16>, vector<64x32xbf16>, vector<16x32xf32> -> vector<16x32xf32>
    %c0_91 = arith.constant 0 : index
    %c0_92 = arith.constant 0 : index
    %256 = vector.load %arg13[%c0_91, %c0_92] : memref<1x32xf32, #tpu.memory_space<vmem>>, vector<1x32xf32>
    %257 = vector.broadcast %256 : vector<1x32xf32> to vector<16x32xf32>
    %258 = arith.addf %255, %257 : vector<16x32xf32>
    %259 = arith.addf %106, %258 : vector<16x32xf32>
    %c0_93 = arith.constant 0 : index
    %c0_94 = arith.constant 0 : index
    %260 = vector.load %arg14[%c0_93, %c0_94] : memref<1x32xf32, #tpu.memory_space<vmem>>, vector<1x32xf32>
    %c0_95 = arith.constant 0 : index
    %c0_96 = arith.constant 0 : index
    %261 = vector.load %arg15[%c0_95, %c0_96] : memref<1x32xf32, #tpu.memory_space<vmem>>, vector<1x32xf32>
    %cst_97 = arith.constant dense<0.000000e+00> : vector<16xf32>
    %262 = vector.multi_reduction <add>, %259, %cst_97 [1] : vector<16x32xf32> to vector<16xf32>
    %263 = vector.shape_cast %262 : vector<16xf32> to vector<16x1xf32>
    %cst_98 = arith.constant 3.200000e+01 : f32
    %264 = vector.broadcast %cst_98 : f32 to vector<16x1xf32>
    %265 = arith.divf %263, %264 : vector<16x1xf32>
    %266 = arith.mulf %259, %259 : vector<16x32xf32>
    %cst_99 = arith.constant dense<0.000000e+00> : vector<16xf32>
    %267 = vector.multi_reduction <add>, %266, %cst_99 [1] : vector<16x32xf32> to vector<16xf32>
    %268 = vector.shape_cast %267 : vector<16xf32> to vector<16x1xf32>
    %cst_100 = arith.constant 3.200000e+01 : f32
    %269 = vector.broadcast %cst_100 : f32 to vector<16x1xf32>
    %270 = arith.divf %268, %269 : vector<16x1xf32>
    %271 = arith.mulf %265, %265 : vector<16x1xf32>
    %272 = arith.subf %270, %271 : vector<16x1xf32>
    %cst_101 = arith.constant 0.000000e+00 : f32
    %273 = vector.broadcast %cst_101 : f32 to vector<16x1xf32>
    %274 = arith.maximumf %272, %273 : vector<16x1xf32>
    %275 = vector.broadcast %265 : vector<16x1xf32> to vector<16x32xf32>
    %276 = arith.subf %259, %275 : vector<16x32xf32>
    %cst_102 = arith.constant 9.99999974E-6 : f32
    %277 = vector.broadcast %cst_102 : f32 to vector<16x1xf32>
    %278 = arith.addf %274, %277 : vector<16x1xf32>
    %279 = math.rsqrt %278 : vector<16x1xf32>
    %280 = vector.broadcast %279 : vector<16x1xf32> to vector<16x32xf32>
    %281 = arith.mulf %276, %280 : vector<16x32xf32>
    %282 = vector.broadcast %260 : vector<1x32xf32> to vector<16x32xf32>
    %283 = arith.mulf %281, %282 : vector<16x32xf32>
    %284 = vector.broadcast %261 : vector<1x32xf32> to vector<16x32xf32>
    %285 = arith.addf %283, %284 : vector<16x32xf32>
    %286 = arith.truncf %285 : vector<16x32xf32> to vector<16x32xbf16>
    %c0_103 = arith.constant 0 : index
    %c0_104 = arith.constant 0 : index
    %c0_105 = arith.constant 0 : index
    %287 = vector.load %arg16[%c0_103, %c0_104, %c0_105] : memref<1x16x32xbf16, #tpu.memory_space<vmem>>, vector<1x16x32xbf16>
    %288 = vector.shape_cast %287 : vector<1x16x32xbf16> to vector<16x32xbf16>
    %289 = vector.shape_cast %286 : vector<16x32xbf16> to vector<1x16x32xbf16>
    tpu.vector_store %arg16[%c0_103, %c0_104, %c0_105], %289 {strides = array<i32>} : memref<1x16x32xbf16, #tpu.memory_space<vmem>>, vector<1x16x32xbf16>,
    return
  }
  func.func @transform_0(%arg0: i32) -> (i32, i32, i32) {
    %c0_i32 = arith.constant 0 : i32
    %c0_i32_0 = arith.constant 0 : i32
    %c0_i32_1 = arith.constant 0 : i32
    return %arg0, %c0_i32, %c0_i32_0 : i32, i32, i32
  }
  func.func @transform_1(%arg0: i32) -> (i32, i32, i32) {
    %c0_i32 = arith.constant 0 : i32
    %c0_i32_0 = arith.constant 0 : i32
    %c0_i32_1 = arith.constant 0 : i32
    return %arg0, %c0_i32, %c0_i32_0 : i32, i32, i32
  }
  func.func @transform_2(%arg0: i32) -> (i32, i32) {
    %c0_i32 = arith.constant 0 : i32
    %c0_i32_0 = arith.constant 0 : i32
    %c0_i32_1 = arith.constant 0 : i32
    return %c0_i32, %c0_i32_0 : i32, i32
  }
  func.func @transform_3(%arg0: i32) -> (i32, i32) {
    %c0_i32 = arith.constant 0 : i32
    %c0_i32_0 = arith.constant 0 : i32
    %c0_i32_1 = arith.constant 0 : i32
    return %c0_i32, %c0_i32_0 : i32, i32
  }
  func.func @transform_4(%arg0: i32) -> (i32, i32) {
    %c0_i32 = arith.constant 0 : i32
    %c0_i32_0 = arith.constant 0 : i32
    %c0_i32_1 = arith.constant 0 : i32
    return %c0_i32, %c0_i32_0 : i32, i32
  }
  func.func @transform_5(%arg0: i32) -> (i32, i32) {
    %c0_i32 = arith.constant 0 : i32
    %c0_i32_0 = arith.constant 0 : i32
    %c0_i32_1 = arith.constant 0 : i32
    return %c0_i32, %c0_i32_0 : i32, i32
  }
  func.func @transform_6(%arg0: i32) -> (i32, i32) {
    %c0_i32 = arith.constant 0 : i32
    %c0_i32_0 = arith.constant 0 : i32
    %c0_i32_1 = arith.constant 0 : i32
    return %c0_i32, %c0_i32_0 : i32, i32
  }
  func.func @transform_7(%arg0: i32) -> (i32, i32) {
    %c0_i32 = arith.constant 0 : i32
    %c0_i32_0 = arith.constant 0 : i32
    %c0_i32_1 = arith.constant 0 : i32
    return %c0_i32, %c0_i32_0 : i32, i32
  }
  func.func @transform_8(%arg0: i32) -> (i32, i32) {
    %c0_i32 = arith.constant 0 : i32
    %c0_i32_0 = arith.constant 0 : i32
    %c0_i32_1 = arith.constant 0 : i32
    return %c0_i32, %c0_i32_0 : i32, i32
  }
  func.func @transform_9(%arg0: i32) -> (i32, i32, i32) {
    %c0_i32 = arith.constant 0 : i32
    %c0_i32_0 = arith.constant 0 : i32
    %c0_i32_1 = arith.constant 0 : i32
    %c0_i32_2 = arith.constant 0 : i32
    return %c0_i32, %c0_i32_0, %c0_i32_1 : i32, i32, i32
  }
  func.func @transform_10(%arg0: i32) -> (i32, i32) {
    %c0_i32 = arith.constant 0 : i32
    %c0_i32_0 = arith.constant 0 : i32
    %c0_i32_1 = arith.constant 0 : i32
    return %c0_i32, %c0_i32_0 : i32, i32
  }
  func.func @transform_11(%arg0: i32) -> (i32, i32) {
    %c0_i32 = arith.constant 0 : i32
    %c0_i32_0 = arith.constant 0 : i32
    %c0_i32_1 = arith.constant 0 : i32
    return %c0_i32, %c0_i32_0 : i32, i32
  }
  func.func @transform_12(%arg0: i32) -> (i32, i32) {
    %c0_i32 = arith.constant 0 : i32
    %c0_i32_0 = arith.constant 0 : i32
    %c0_i32_1 = arith.constant 0 : i32
    return %c0_i32, %c0_i32_0 : i32, i32
  }
  func.func @transform_13(%arg0: i32) -> (i32, i32) {
    %c0_i32 = arith.constant 0 : i32
    %c0_i32_0 = arith.constant 0 : i32
    %c0_i32_1 = arith.constant 0 : i32
    return %c0_i32, %c0_i32_0 : i32, i32
  }
  func.func @transform_14(%arg0: i32) -> (i32, i32) {
    %c0_i32 = arith.constant 0 : i32
    %c0_i32_0 = arith.constant 0 : i32
    %c0_i32_1 = arith.constant 0 : i32
    return %c0_i32, %c0_i32_0 : i32, i32
  }
  func.func @transform_15(%arg0: i32) -> (i32, i32, i32) {
    %c0_i32 = arith.constant 0 : i32
    %c0_i32_0 = arith.constant 0 : i32
    %c0_i32_1 = arith.constant 0 : i32
    return %arg0, %c0_i32, %c0_i32_0 : i32, i32, i32
  }
}

</mosaic_0001>

<bundles_post_ra>
// kernel: tpu_custom_call.1
= control target key start
LH: loop header
LB: loop body
LE: loop exit
PB: predicated region body
PF: predicated region fallthrough
CT: control target
= control target key end

     0   :  { %s3474_s0 = inlined_call_operand.vmem [shape: f32[2,16,32], index: 0, kind: input, shape index: {}]   ;;  %s3475_s1 = inlined_call_operand.vmem [shape: f32[2,1,16], index: 1, kind: input, shape index: {}]   ;;  %s3476_s2 = inlined_call_operand.vmem [shape: f32[16,32], index: 2, kind: input, shape index: {}]   ;;  %s3477_s3 = inlined_call_operand.hbm [shape: bf16[32,96], index: 3, kind: input, shape index: {}]   ;;  %s3478_s4 = inlined_call_operand.vmem [shape: f32[1,96], index: 4, kind: input, shape index: {}]   ;;  %s3479_s5 = inlined_call_operand.hbm [shape: bf16[32,32], index: 5, kind: input, shape index: {}]   ;;  %s3480_s6 = inlined_call_operand.vmem [shape: f32[1,32], index: 6, kind: input, shape index: {}]   ;;  %s3481_s7 = inlined_call_operand.vmem [shape: f32[1,32], index: 7, kind: input, shape index: {}]   ;;  %s3482_s8 = inlined_call_operand.vmem [shape: f32[1,32], index: 8, kind: input, shape index: {}]   ;;  %s3483_s9 = inlined_call_operand.hbm [shape: bf16[9,32,64], index: 9, kind: input, shape index: {}]   ;;  %s3484_s10 = inlined_call_operand.vmem [shape: f32[1,64], index: 10, kind: input, shape index: {}]   ;;  %s3485_s11 = inlined_call_operand.vmem [shape: bf16[64,32], index: 11, kind: input, shape index: {}]   ;;  %s3486_s12 = inlined_call_operand.vmem [shape: f32[1,32], index: 12, kind: input, shape index: {}]   ;;  %s3487_s13 = inlined_call_operand.vmem [shape: f32[1,32], index: 13, kind: input, shape index: {}]   ;;  %s3488_s14 = inlined_call_operand.vmem [shape: f32[1,32], index: 14, kind: input, shape index: {}]   ;;  %s3489_s15 = inlined_call_operand.hbm [shape: bf16[2,16,32], index: 15, kind: output, shape index: {}]  }
   0x1   :  { %3503 = sst [smem:[#allocation21_spill]] %s3487_s13 }
   0x2   :  { %3504 = sst [smem:[#allocation22_spill]] %s3488_s14 }
   0x3   :  { %3505 = sst [smem:[#allocation23_spill]] %s3489_s15 }
   0x4   :  { %20 = vsyncpa [#allocation4], 0 }
   0x5   :  { %21 = vsyncpa [#allocation7], 0 }
   0x6   :  { %22 = vsyncpa [#allocation5], 0 }
   0x7   :  { %24 = vsyncpa [#allocation5 + $0x1], 0  ;;  %s2967_s18 = smov 0   ;;  %s2969_s19 = smov 0  }
   0x8   :  { %s2971_s20 = smov 0   ;;  %s2973_s21 = smov 0  }
   0x9 LB: > { %3506 = sst [smem:[#allocation13_spill]] %s2856_s18  ;;  %s2988_s22 = sadd.s32 4294967295, %s2868_s21   ;;  %s2868_s21 = sphi %s2973_s21, %s3534_s21   ;;  %s2864_s20 = sphi %s2971_s20, %s3537_s20   ;;  %s2860_s19 = sphi %s2969_s19, %s3536_s19   ;;  %s2856_s18 = sphi %s2967_s18, %s3535_s18  }
   0xa   : > { %3507 = sst [smem:[#allocation14_spill]] %s2860_s19  ;;  %s2276_s23 = sadd.s32 4294967294, %s2868_s21  }
   0xb   : > { %3508 = sst [smem:[#allocation15_spill]] %s2864_s20  ;;  %s2992_s24 = sadd.s32 1, %s2868_s21  }
   0xc   : > { %3509 = sst [smem:[#allocation16_spill]] %s2868_s21  ;;  %s362_s25 = sadd.s32 1, %s2864_s20 }
   0xd   : > { %3510 = sst [smem:[#allocation17_spill]] %s2992_s24  ;;  %s359_s26 = ssub.s32 %s2868_s21, %s2992_s24 }
   0xe   : > { %p372_p0 = scmp.ne.s32.totalorder %s2864_s20, %s2860_s19  ;;  %p360_p1 = scmp.eq.s32.totalorder %s359_s26, 0 }
   0xf   : > { %p373_p2 = scmp.eq.s32.totalorder %s2988_s22, 1  ;;  %p378_p3 = scmp.ne.s32.totalorder %s2860_s19, %s2856_s18 }
  0x10   : > { %p379_p4 = scmp.eq.s32.totalorder %s2276_s23, 1  ;;  %p2277_p7 = scmp.ge.s32.totalorder %s2868_s21, 1 }
  0x11   : > { %s3003_s27 = scalar_select %p360_p1, %s2864_s20, %s362_s25  }
  0x12   : > { %p3005_p5 = por %p373_p2, %p372_p0  ;;  %p3009_p6 = por %p379_p4, %p378_p3 }
  0x13   : > { %3511 = sst [smem:[#allocation18_spill]] %s3003_s27  ;;  %p386_p8 = scmp.lt.s32.totalorder %s2868_s21, 3 }
  0x14   : > { %s3512_s28 = scalar_select %p3005_p5, 1, 0 }
  0x15   : > { %s3514_s29 = scalar_select %p3009_p6, 1, 0 }
  0x16   : > { %3513 = sst [smem:[#allocation19_spill]] %s3512_s28  ;;  %p3497_p9 = scmp.eq.s32.totalorder %s2988_s22, 0 }
  0x17   : > { %3515 = sst [smem:[#allocation20_spill]] %s3514_s29  ;;  %p3016_p10 = pnand %p2277_p7, %p386_p8 }
  0x18   : > { %s2870_s16 = smov [#allocation6]   ;;  %s2871_s25 = smov [#allocation3]  }
  0x19   : > { %s3516_s30 = scalar_select %p3016_p10, 1, 0 }
  0x1a   : > { %p2579_p11 = pneg %p3016_p10  ;;  %s417_s17 = sshll.u32 %s2870_s16, 4  ;;  %s3022_s17 = int_to_ptr.vmem [resolvable:$true] %s417_s17 }
  0x1b   : > { %s401_s26 = sshll.u32 %s2871_s25, 4  ;;  %s2872_s27 = smov [#allocation8]   ;;  %s3030_s26 = int_to_ptr.vmem [resolvable:$true] %s401_s26 }
  0x1c   : > { %p3026_p12 = pnand %p3497_p9, %p2579_p11  ;;  %s3032_s20 = sshll.u32 %s2872_s27, 4  ;;  %s440_s20 = int_to_ptr.vmem [resolvable:$true] %s3032_s20 }
  0x1d   : > { %s2714_s18 = scalar_lea.hbm %s3479_s5, 256 }
  0x1e   : > { %p2715_p13 = scmp.ne.s32.totalorder %s3479_s5, %s2714_s18  ;;  %p3042_p0 = pneg %p3026_p12 }
  0x1f   : > { %p2721_p3 = scmp.lt.u32.totalorder %s2714_s18, %s3479_s5 }
  0x20   : > { %p2717_p1 = pnand %p3042_p0, %p2715_p13 }
  0x22   : > { %p2718_p2 = pneg %p2717_p1 }
  0x24   : > { %p2723_p4 = pnand %p2721_p3, %p2718_p2 }
  0x26   : > { %2726 = shalt.err (!%p2723_p4)
}
  0x27   : > { %s2727_s21 = scalar_lea.vmem %s3022_s17, 256  ;;  %p2735_p9 = scmp.lt.s32.totalorder %s3022_s17, %s3022_s17 }
  0x28   : > { %p2728_p7 = scmp.ne.s32.totalorder %s3022_s17, %s2727_s21  ;;  %p2736_p6 = scmp.lt.s32.totalorder %s2727_s21, %s2727_s21 }
  0x2a   : > { %p2730_p8 = pnand %p2728_p7, %p3042_p0  ;;  %p2737_p13 = por %p2736_p6, %p2735_p9 }
  0x2c   : > { %p2731_p11 = pneg %p2730_p8 }
  0x2e   : > { %p2738_p1 = pnand %p2737_p13, %p2731_p11 }
  0x30   : > { %2741 = shalt.err (!%p2738_p1)
}
  0x31   : > { %s2873_s24 = smov 64   ;;  %s2874_s18 = smov 4  }
  0x32   : > { %2585 = dma.hbm_to_vmem [thread:$0]  (!%p3026_p12), %s3479_s5, 256, %s3022_s17, [#allocation7], %s2873_s24, %s2873_s24, %s2874_s18  }
  0x33   : > { %s2742_s21 = scalar_lea.hbm %s3477_s3, 256 }
  0x34   : > { %p2743_p6 = scmp.ne.s32.totalorder %s3477_s3, %s2742_s21  ;;  %p2749_p3 = scmp.lt.u32.totalorder %s2742_s21, %s3477_s3 }
  0x36   : > { %p2745_p9 = pnand %p2743_p6, %p3042_p0 }
  0x38   : > { %p2746_p2 = pneg %p2745_p9 }
  0x3a   : > { %p2751_p4 = pnand %p2749_p3, %p2746_p2 }
  0x3c   : > { %2754 = shalt.err (!%p2751_p4)
}
  0x3d   : > { %s2755_s17 = scalar_lea.vmem %s3030_s26, 256  ;;  %p2763_p13 = scmp.lt.s32.totalorder %s3030_s26, %s3030_s26 }
  0x3e   : > { %p2756_p7 = scmp.ne.s32.totalorder %s3030_s26, %s2755_s17  ;;  %p2764_p1 = scmp.lt.s32.totalorder %s2755_s17, %s2755_s17 }
  0x40   : > { %p2758_p8 = pnand %p2756_p7, %p3042_p0  ;;  %p2765_p6 = por %p2764_p1, %p2763_p13 }
  0x42   : > { %p2759_p11 = pneg %p2758_p8 }
  0x44   : > { %p2766_p9 = pnand %p2765_p6, %p2759_p11 }
  0x46   : > { %2769 = shalt.err (!%p2766_p9)
}
  0x47   : > { %2582 = dma.hbm_to_vmem [thread:$0]  (!%p3026_p12), %s3477_s3, 256, %s3030_s26, [#allocation4], %s2873_s24, %s2873_s24, %s2874_s18  }
  0x48   : > { %s2770_s29 = scalar_lea.hbm %s3483_s9, 2304 }
  0x49   : > { %p2771_p2 = scmp.ne.s32.totalorder %s3483_s9, %s2770_s29  ;;  %p2777_p7 = scmp.lt.u32.totalorder %s2770_s29, %s3483_s9 }
  0x4b   : > { %p2773_p3 = pnand %p2771_p2, %p3042_p0 }
  0x4d   : > { %p2774_p4 = pneg %p2773_p3 }
  0x4f   : > { %p2779_p8 = pnand %p2777_p7, %p2774_p4 }
  0x51   : > { %2782 = shalt.err (!%p2779_p8)
}
  0x52   : > { %s2783_s17 = scalar_lea.vmem %s440_s20, 2304  ;;  %p2791_p6 = scmp.lt.s32.totalorder %s440_s20, %s440_s20 }
  0x53   : > { %p2784_p11 = scmp.ne.s32.totalorder %s440_s20, %s2783_s17  ;;  %p2792_p9 = scmp.lt.s32.totalorder %s2783_s17, %s2783_s17 }
  0x55   : > { %p2786_p13 = pnand %p2784_p11, %p3042_p0  ;;  %p2793_p5 = por %p2792_p9, %p2791_p6 }
  0x57   : > { %p2787_p1 = pneg %p2786_p13 }
  0x59   : > { %p2794_p10 = pnand %p2793_p5, %p2787_p1 }
  0x5b   : > { %2797 = shalt.err (!%p2794_p10)
}
  0x5c   : > { %2588 = dma.hbm_to_vmem [thread:$0]  (!%p3026_p12), %s3483_s9, 2304, %s440_s20, [#allocation7], %s2873_s24, %s2873_s24, %s2874_s18  }
  0x5d   : > { %p3519_p2 = scmp.ne.s32.totalorder %s3516_s30, 0 }
  0x5e   : > { %p3520_p0 = scmp.eq.s32.totalorder (!%p3519_p2), %s2988_s22, 0 }
  0x5f   : > { %484 = sbr.rel (%p3519_p2) target bundleno = 2514 (0x9d2), region = 80 }
  0x66   : > { %2843 = dma.done.wait (%p3520_p0), [#allocation4], 256   ;;  %p3521_p3 = pmov %p3520_p0 }
  0x67   : > { %p3522_p5 = pmov %p3520_p0 }
  0x68   : > { %2845 = vsyncadd (%p3521_p3), [#allocation4], 4294967040 }
  0x69   : > { %2847 = dma.done.wait (%p3522_p5), [#allocation7], 2560   ;;  %p3523_p10 = pmov %p3520_p0 }
  0x6a   : > { %p543_p4 = scmp.lt.s32.totalorder %s2988_s22, 1  ;;  %v2875_v0 = vmov 0.0   ;;  %vm2876_vm0 = vmmov 0   ;;  %v2648_v1 = vld [vmem:[#allocation3] sm:$0xff]   ;;  %v2649_v2 = vld [vmem:[#allocation3 + $0x8] sm:$0xff]   ;;  %v554_v5 = vld [vmem:[%s3476_s2] sm:$0xff] }
  0x6b   : > { %2849 = vsyncadd (%p3523_p10), [#allocation7], 4294964736  ;;  %2417 = vmatprep.subr.bf16.mxu0 %v2875_v0  ;;  %2421 = vmatprep.mubr.msk.bf16.mxu0 %vm2876_vm0, %v2875_v0  ;;  %v555_v6 = vld [vmem:[%s3476_s2 + $0x8] sm:$0xff]  ;;  %vm583_vm1 = vcmask 261120   ;;  %v2289_v10 = vld [vmem:[%s3478_s4] ss:$0 sm:$0xff] }
  0x6c   : > { %s3129_s15 = scalar_select %p543_p4, %s2988_s22, 1  ;;  %2425 = vmatprep.subr.bf16.mxu1 %v2875_v0  ;;  %2427 = vmatprep.mubr.msk.bf16.mxu1 %vm2876_vm0, %v2875_v0  ;;  %vm638_vm2 = vcmask 64512   ;;  %vm855_vm3 = vcmask 130048   ;;  %vm1143_vm4 = vcmask 130112   ;;  %vm1150_vm5 = vcmask 195712  }
  0x6d   : > { %2418 = vmatpush3.bf16.msra.mxu0 %v2648_v1  ;;  %s2877_s25 = smov 104   ;;  %s2878_s27 = smov 120   ;;  %vm1157_vm6 = vcmask 261312  }
  0x6e   : > { %s2359_s20 = sshll.u32 %s3129_s15, 4  ;;  %2419 = vmatprep.subr.bf16.mxu0 %v2875_v0  ;;  %s2879_s21 = smov 96  }
  0x6f   : > { %s547_s24 = scalar_lea.vmem %s3474_s0, %s2359_s20  ;;  %s2880_s17 = smov 112  }
  0x70   : > { %v552_v3 = vld [vmem:[%s547_s24] sm:$0xff]  ;;  %v553_v4 = vld [vmem:[%s547_s24 + $0x8] sm:$0xff]  ;;  %s550_s20 = scalar_lea.vmem %s3475_s1, %s3129_s15  ;;  %s2881_s15 = smov 64  }
  0x71   : > { %v3145_v7 = vadd.f32 %v554_v5, %v552_v3  ;;  %v3147_v8 = vadd.f32 %v555_v6, %v553_v4  ;;  %2420 = vmatpush3.bf16.msra.mxu0 %v2649_v2  ;;  %v2297_v29 = vld [vmem:[%s550_s20] ss:$0 sm:$0xff]  ;;  %s2882_s30 = smov 8   ;;  %s2883_s23 = smov 16  }
  0x72   : > { %2431 = vmatprep.subr.bf16.mxu0 %v2875_v0  ;;  %s2884_s24 = smov 24   ;;  %s3524_s19 = sld [smem:[#allocation14_spill]] }
  0x73   : > { %v559_v9 = vpack.c.bf16 %v3147_v8, %v3145_v7  ;;  %s3526_s26 = sld [smem:[#allocation22_spill]]  ;;  %s2362_s20 = sshll.u32 %s2988_s22, 7 }
  0x74   : > { %s3527_s13 = sld [smem:[#allocation19_spill]]  ;;  %s3528_s14 = sld [smem:[#allocation23_spill]] }
  0x75   : > { %2422 = vmatmul.mubr.msk.bf16.vlgmr.msra.gmra.mrb[0].mxu0 %vm583_vm1, %v559_v9  ;;  %s2885_s16 = smov [#allocation9]  }
  0x76   : > { %2433 = vmatprep.mubr.msk.bf16.mxu0 %vm2876_vm0, %v2875_v0 }
  0x78   : > { %s540_s28 = sand.u32 1, %s3524_s19  }
  0x79   : > { %s3431_s29 = scalar_lea.sflag [#allocation5], %s540_s28 }
  0x7a   : > { %s3427_s19 = scalar_lea.hbm %s3528_s14, %s2362_s20  ;;  %p3529_p7 = scmp.ne.s32.totalorder %s3527_s13, 0 }
 0x148   : > { %v621_v11 = vpop.f32.mrb[0].mxu0 }
 0x149   : > { %v2423_v12 = vpop.f32.mrb[1].mxu0  ;;  %v622_v14 = vadd.f32 %v2289_v10, %v621_v11 }
 0x14a   : > { %v624_v13 = vpop.f32.mrb[2].mxu0 }
 0x14b   : > { %v625_v15 = vadd.f32 %v2289_v10, %v624_v13  ;;  %v2424_v16 = vpop.f32.mrb[3].mxu0 }
 0x14d   : > { %v3158_v17 = vpack.c.bf16 %v625_v15, %v622_v14 }
 0x14f   : > { %634 = vrot.lane.b32.xlu1 %v3158_v17, %s2877_s25  ;;  %630 = vrot.lane.b32.xlu0 %v3158_v17, %s2878_s27  ;;  %s3525_s25 = sld [smem:[#allocation21_spill]]  ;;  %s2286_s27 = sshll.u32 %s540_s28, 3 }
 0x153   : > { %636 = vrot.lane.b32.xlu1 %v3158_v17, %s2879_s21  ;;  %632 = vrot.lane.b32.xlu0 %v3158_v17, %s2880_s17 }
 0x1c1   : > { %v3164_v18 = vpop.permute.xlu1 %634  ;;  %v3166_v19 = vpop.permute.xlu0 %630 }
 0x1c2   : > { %686 = vrot.lane.b32.xlu0 %v3166_v19, %s2879_s21 }
 0x1c5   : > { %v637_v20 = vpop.permute.xlu1 %636  ;;  %v3169_v21 = vpop.permute.xlu0 %632 }
 0x1c6   : > { %784 = vrot.lane.b32.xlu0 %v3164_v18, %s2879_s21  ;;  %735 = vrot.lane.b32.xlu1 %v3169_v21, %s2879_s21  ;;  %v643_v22 = vsel %vm638_vm2, %v637_v20, 0 }
 0x1c7   : > { %2426 = vmatpush3.bf16.xpose.msra.mxu1 %v643_v22 }
 0x1c8   : > { %2437 = vmatprep.subr.bf16.mxu1 %v2875_v0 }
 0x1ce   : > { %2428 = vmatmul.mubr.msk.bf16.vlgmr.msra.gmra.mrb[0].mxu1 %vm638_vm2, %v3158_v17 }
 0x1cf   : > { %2439 = vmatprep.mubr.msk.bf16.mxu1 %vm2876_vm0, %v2875_v0 }
 0x234   : > { %v687_v23 = vpop.permute.xlu0 %686 }
 0x235   : > { %v692_v24 = vsel %vm638_vm2, %v687_v23, 0 }
 0x236   : > { %2432 = vmatpush3.bf16.xpose.msra.mxu0 %v692_v24 }
 0x237   : > { %2443 = vmatprep.subr.bf16.mxu0 %v2875_v0 }
 0x238   : > { %v736_v25 = vpop.permute.xlu1 %735  ;;  %v785_v27 = vpop.permute.xlu0 %784 }
 0x239   : > { %v741_v26 = vsel %vm638_vm2, %v736_v25, 0  ;;  %v790_v28 = vsel %vm638_vm2, %v785_v27, 0 }
 0x23a   : > { %2438 = vmatpush3.bf16.xpose.msra.mxu1 %v741_v26 }
 0x23b   : > { %2449 = vmatprep.subr.bf16.mxu1 %v2875_v0 }
 0x23d   : > { %2434 = vmatmul.mubr.msk.bf16.vlgmr.msra.gmra.mrb[4].mxu0 %vm638_vm2, %v3166_v19 }
 0x23e   : > { %2444 = vmatpush3.bf16.xpose.msra.mxu0 %v790_v28  ;;  %2445 = vmatprep.mubr.msk.bf16.mxu0 %vm2876_vm0, %v2875_v0 }
 0x23f   : > { %2455 = vmatprep.subr.bf16.mxu0 %v2875_v0 }
 0x241   : > { %2440 = vmatmul.mubr.msk.bf16.vlgmr.msra.gmra.mrb[4].mxu1 %vm638_vm2, %v3169_v21 }
 0x242   : > { %2451 = vmatprep.mubr.msk.bf16.mxu1 %vm2876_vm0, %v2875_v0 }
 0x245   : > { %2446 = vmatmul.mubr.msk.bf16.vlgmr.msra.gmra.mrb[8].mxu0 %vm638_vm2, %v3164_v18 }
 0x246   : > { %2457 = vmatprep.mubr.msk.bf16.mxu0 %vm2876_vm0, %v2875_v0 }
 0x2a1   : > { %v679_v30 = vpop.f32.mrb[0].mxu1 }
 0x2a2   : > { %v833_v31 = vmul.f32 0.35355338, %v679_v30  ;;  %v2429_v32 = vpop.f32.mrb[1].mxu1 }
 0x2a3   : > { %v682_v33 = vpop.f32.mrb[2].mxu1 }
 0x2a4   : > { %v834_v34 = vmul.f32 0.35355338, %v682_v33  ;;  %v2430_v35 = vpop.f32.mrb[3].mxu1  ;;  %v847_v36 = vadd.f32 %v2297_v29, %v833_v31 }
 0x2a6   : > { %v856_v37 = vsel %vm855_vm3, %v847_v36, -inf  ;;  %v848_v38 = vadd.f32 %v2297_v29, %v834_v34 }
 0x2a7   : > { %857 = vmax.xlane.f32.xlu1 %v856_v37 }
 0x2a8   : > { %v859_v39 = vsel %vm855_vm3, %v848_v38, -inf }
 0x2a9   : > { %860 = vmax.xlane.f32.xlu0 %v859_v39 }
 0x310   : > { %v728_v40 = vpop.f32.mrb[4].mxu0 }
 0x311   : > { %v835_v41 = vmul.f32 0.35355338, %v728_v40  ;;  %v2435_v42 = vpop.f32.mrb[5].mxu0 }
 0x312   : > { %v731_v43 = vpop.f32.mrb[6].mxu0 }
 0x313   : > { %v836_v44 = vmul.f32 0.35355338, %v731_v43  ;;  %v2436_v45 = vpop.f32.mrb[7].mxu0  ;;  %v849_v46 = vadd.f32 %v2297_v29, %v835_v41 }
 0x314   : > { %v777_v47 = vpop.f32.mrb[4].mxu1 }
 0x315   : > { %v837_v48 = vmul.f32 0.35355338, %v777_v47  ;;  %v2441_v49 = vpop.f32.mrb[5].mxu1  ;;  %v862_v50 = vsel %vm855_vm3, %v849_v46, -inf  ;;  %v850_v51 = vadd.f32 %v2297_v29, %v836_v44 }
 0x316   : > { %v780_v52 = vpop.f32.mrb[6].mxu1  ;;  %863 = vmax.xlane.f32.xlu0 %v862_v50 }
 0x317   : > { %v838_v53 = vmul.f32 0.35355338, %v780_v52  ;;  %v2442_v54 = vpop.f32.mrb[7].mxu1  ;;  %v865_v55 = vsel %vm855_vm3, %v850_v51, -inf  ;;  %v851_v56 = vadd.f32 %v2297_v29, %v837_v48 }
 0x318   : > { %866 = vmax.xlane.f32.xlu1 %v865_v55  ;;  %v826_v57 = vpop.f32.mrb[8].mxu0 }
 0x319   : > { %v839_v58 = vmul.f32 0.35355338, %v826_v57  ;;  %v2447_v59 = vpop.f32.mrb[9].mxu0  ;;  %v868_v60 = vsel %vm855_vm3, %v851_v56, -inf  ;;  %v852_v61 = vadd.f32 %v2297_v29, %v838_v53 }
 0x31a   : > { %869 = vmax.xlane.f32.xlu0 %v868_v60  ;;  %v829_v62 = vpop.f32.mrb[10].mxu0 }
 0x31b   : > { %v840_v63 = vmul.f32 0.35355338, %v829_v62  ;;  %v2448_v1 = vpop.f32.mrb[11].mxu0  ;;  %v871_v2 = vsel %vm855_vm3, %v852_v61, -inf  ;;  %v853_v3 = vadd.f32 %v2297_v29, %v839_v58 }
 0x31c   : > { %872 = vmax.xlane.f32.xlu1 %v871_v2 }
 0x31d   : > { %v874_v4 = vsel %vm855_vm3, %v853_v3, -inf  ;;  %v854_v5 = vadd.f32 %v2297_v29, %v840_v63 }
 0x31e   : > { %875 = vmax.xlane.f32.xlu0 %v874_v4 }
 0x31f   : > { %v877_v6 = vsel %vm855_vm3, %v854_v5, -inf }
 0x320   : > { %878 = vmax.xlane.f32.xlu1 %v877_v6 }
 0x331   : > { %995 = vrot.lane.b32.xlu1 %v3166_v19, %s2881_s15 }
 0x334   : > { %948 = vrot.lane.b32.xlu0 %v3158_v17, %s2881_s15  ;;  %v858_v9 = vpop.xlane.xlu1 %857 }
 0x335   : > { %v880_v11 = vsub.f32 %v847_v36, %v858_v9 }
 0x336   : > { %v861_v10 = vpop.xlane.xlu0 %860 }
 0x337   : > { %v881_v12 = vsub.f32 %v848_v38, %v861_v10  ;;  %v888_v13 = vmul.f32 1.442695, %v880_v11 }
 0x339   : > { %v890_v14 = vmul.f32 1.442695, %v881_v12  ;;  %2674 = vpow2.f32 %v888_v13 }
 0x33b   : > { %2676 = vpow2.f32 %v890_v14 }
 0x343   : > { %v2675_v15 = vpop.eup %2674 }
 0x344   : > { %v904_v20 = vsel %vm855_vm3, %v2675_v15, 0.0 }
 0x345   : > { %v2677_v16 = vpop.eup %2676 }
 0x346   : > { %v907_v22 = vsel %vm855_vm3, %v2677_v16, 0.0 }
 0x353   : > { %905 = vadd.xlane.f32.xlu0 %v904_v20 }
 0x355   : > { %908 = vadd.xlane.f32.xlu1 %v907_v22 }
 0x3a3   : > { %v864_v19 = vpop.xlane.xlu0 %863 }
 0x3a4   : > { %v882_v23 = vsub.f32 %v849_v46, %v864_v19 }
 0x3a5   : > { %v867_v24 = vpop.xlane.xlu1 %866 }
 0x3a6   : > { %v892_v17 = vmul.f32 1.442695, %v882_v23  ;;  %v883_v25 = vsub.f32 %v850_v51, %v867_v24 }
 0x3a7   : > { %v870_v26 = vpop.xlane.xlu0 %869 }
 0x3a8   : > { %2678 = vpow2.f32 %v892_v17  ;;  %v894_v27 = vmul.f32 1.442695, %v883_v25  ;;  %v884_v28 = vsub.f32 %v851_v56, %v870_v26 }
 0x3a9   : > { %v873_v29 = vpop.xlane.xlu1 %872 }
 0x3aa   : > { %2680 = vpow2.f32 %v894_v27  ;;  %v896_v30 = vmul.f32 1.442695, %v884_v28  ;;  %v885_v31 = vsub.f32 %v852_v61, %v873_v29  ;;  %v2650_v28 = vld [vmem:[#allocation6] sm:$0xff]  }
 0x3ab   : > { %v876_v32 = vpop.xlane.xlu0 %875 }
 0x3ac   : > { %2682 = vpow2.f32 %v896_v30  ;;  %v898_v33 = vmul.f32 1.442695, %v885_v31  ;;  %v886_v34 = vsub.f32 %v853_v3, %v876_v32  ;;  %v2651_v31 = vld [vmem:[#allocation6 + $0x8] sm:$0xff]  }
 0x3ad   : > { %v879_v35 = vpop.xlane.xlu1 %878 }
 0x3ae   : > { %2684 = vpow2.f32 %v898_v33  ;;  %v900_v36 = vmul.f32 1.442695, %v886_v34  ;;  %v887_v37 = vsub.f32 %v854_v5, %v879_v35 }
 0x3af   : > { %v949_v38 = vpop.permute.xlu0 %948 }
 0x3b0   : > { %2686 = vpow2.f32 %v900_v36  ;;  %v902_v39 = vmul.f32 1.442695, %v887_v37  ;;  %2450 = vmatpush3.bf16.msra.mxu1 %v949_v38 }
 0x3b1   : > { %v996_v40 = vpop.permute.xlu1 %995  ;;  %2461 = vmatprep.subr.bf16.mxu1 %v2875_v0 }
 0x3b2   : > { %v2679_v41 = vpop.eup %2678  ;;  %2688 = vpow2.f32 %v902_v39  ;;  %2456 = vmatpush3.bf16.msra.mxu0 %v996_v40 }
 0x3b3   : > { %v910_v42 = vsel %vm855_vm3, %v2679_v41, 0.0  ;;  %2467 = vmatprep.subr.bf16.mxu0 %v2875_v0 }
 0x3b4   : > { %v2681_v43 = vpop.eup %2680  ;;  %911 = vadd.xlane.f32.xlu0 %v910_v42 }
 0x3b5   : > { %v913_v44 = vsel %vm855_vm3, %v2681_v43, 0.0 }
 0x3b6   : > { %v2683_v45 = vpop.eup %2682  ;;  %914 = vadd.xlane.f32.xlu1 %v913_v44 }
 0x3b7   : > { %v916_v46 = vsel %vm855_vm3, %v2683_v45, 0.0 }
 0x3b8   : > { %v2685_v47 = vpop.eup %2684  ;;  %917 = vadd.xlane.f32.xlu0 %v916_v46 }
 0x3b9   : > { %v919_v48 = vsel %vm855_vm3, %v2685_v47, 0.0 }
 0x3ba   : > { %v2687_v49 = vpop.eup %2686  ;;  %920 = vadd.xlane.f32.xlu1 %v919_v48  ;;  %v2302_v48 = vld [vmem:[%s3480_s6] ss:$0 sm:$0xff] }
 0x3bb   : > { %v922_v50 = vsel %vm855_vm3, %v2687_v49, 0.0 }
 0x3bc   : > { %v2689_v51 = vpop.eup %2688  ;;  %923 = vadd.xlane.f32.xlu0 %v922_v50 }
 0x3bd   : > { %v925_v52 = vsel %vm855_vm3, %v2689_v51, 0.0 }
 0x3be   : > { %926 = vadd.xlane.f32.xlu1 %v925_v52 }
 0x3cf   : > { %1042 = vrot.lane.b32.xlu1 %v3169_v21, %s2881_s15 }
 0x3d2   : > { %1089 = vrot.lane.b32.xlu0 %v3164_v18, %s2881_s15 }
 0x3e0   : > { %v906_v53 = vpop.xlane.xlu0 %905 }
 0x3e1   : > { %2690 = vrcp.f32 %v906_v53 }
 0x3e2   : > { %v909_v54 = vpop.xlane.xlu1 %908 }
 0x3e3   : > { %2692 = vrcp.f32 %v909_v54 }
 0x3eb   : > { %v2691_v55 = vpop.eup %2690 }
 0x3ec   : > { %v936_v57 = vmul.f32 %v2691_v55, %v2675_v15 }
 0x3ed   : > { %v2693_v56 = vpop.eup %2692 }
 0x3ee   : > { %v937_v58 = vmul.f32 %v2693_v56, %v2677_v16 }
 0x3f0   : > { %v944_v59 = vpack.c.bf16 %v937_v58, %v936_v57 }
 0x3f2   : > { %2452 = vmatmul.mubr.msk.bf16.vlgmr.msra.gmra.mrb[8].mxu1 %vm855_vm3, %v944_v59 }
 0x3f3   : > { %2463 = vmatprep.mubr.msk.bf16.mxu1 %vm2876_vm0, %v2875_v0 }
 0x441   : > { %v912_v60 = vpop.xlane.xlu0 %911 }
 0x442   : > { %2694 = vrcp.f32 %v912_v60 }
 0x443   : > { %v915_v21 = vpop.xlane.xlu1 %914 }
 0x444   : > { %2696 = vrcp.f32 %v915_v21 }
 0x445   : > { %v918_v61 = vpop.xlane.xlu0 %917 }
 0x446   : > { %2698 = vrcp.f32 %v918_v61 }
 0x447   : > { %v921_v18 = vpop.xlane.xlu1 %920 }
 0x448   : > { %2700 = vrcp.f32 %v921_v18  ;;  %v2652_v18 = vld [vmem:[#allocation8 + $0x10] sm:$0xff]  }
 0x449   : > { %v924_v62 = vpop.xlane.xlu0 %923 }
 0x44a   : > { %2702 = vrcp.f32 %v924_v62  ;;  %v2654_v62 = vld [vmem:[#allocation8 + $0x18] sm:$0xff]  }
 0x44b   : > { %v927_v63 = vpop.xlane.xlu1 %926 }
 0x44c   : > { %v2695_v1 = vpop.eup %2694  ;;  %2704 = vrcp.f32 %v927_v63 }
 0x44d   : > { %v938_v3 = vmul.f32 %v2695_v1, %v2679_v41  ;;  %v1090_v13 = vpop.permute.xlu0 %1089 }
 0x44e   : > { %v2697_v2 = vpop.eup %2696 }
 0x44f   : > { %v939_v4 = vmul.f32 %v2697_v2, %v2681_v43  ;;  %v1043_v5 = vpop.permute.xlu1 %1042 }
 0x450   : > { %v2699_v6 = vpop.eup %2698  ;;  %2462 = vmatpush3.bf16.msra.mxu1 %v1043_v5 }
 0x451   : > { %v945_v9 = vpack.c.bf16 %v939_v4, %v938_v3  ;;  %2473 = vmatprep.subr.bf16.mxu1 %v2875_v0  ;;  %v940_v11 = vmul.f32 %v2699_v6, %v2683_v45 }
 0x452   : > { %v2701_v10 = vpop.eup %2700 }
 0x453   : > { %v941_v12 = vmul.f32 %v2701_v10, %v2685_v47  ;;  %2458 = vmatmul.mubr.msk.bf16.vlgmr.msra.gmra.mrb[12].mxu0 %vm855_vm3, %v945_v9 }
 0x454   : > { %v2703_v14 = vpop.eup %2702  ;;  %2468 = vmatpush3.bf16.msra.mxu0 %v1090_v13  ;;  %2469 = vmatprep.mubr.msk.bf16.mxu0 %vm2876_vm0, %v2875_v0 }
 0x455   : > { %v946_v15 = vpack.c.bf16 %v941_v12, %v940_v11  ;;  %2481 = vmatprep.subr.bf16.mxu0 %v2875_v0  ;;  %v942_v20 = vmul.f32 %v2703_v14, %v2687_v49 }
 0x456   : > { %v2705_v16 = vpop.eup %2704 }
 0x457   : > { %v943_v22 = vmul.f32 %v2705_v16, %v2689_v51  ;;  %2464 = vmatmul.mubr.msk.bf16.vlgmr.msra.gmra.mrb[12].mxu1 %vm855_vm3, %v946_v15 }
 0x458   : > { %2477 = vmatprep.mubr.msk.bf16.mxu1 %vm2876_vm0, %v2875_v0  ;;  %2474 = vmatpush3.bf16.msra.mxu1 %v2650_v28 }
 0x459   : > { %v947_v19 = vpack.c.bf16 %v943_v22, %v942_v20  ;;  %2475 = vmatprep.subr.bf16.mxu1 %v2875_v0  ;;  %v1280_v22 = vlaneseq }
 0x45b   : > { %2470 = vmatmul.mubr.msk.bf16.vlgmr.msra.gmra.mrb[16].mxu0 %vm855_vm3, %v947_v19 }
 0x45c   : > { %2485 = vmatprep.mubr.msk.bf16.mxu0 %vm2876_vm0, %v2875_v0  ;;  %2476 = vmatpush3.bf16.msra.mxu1 %v2651_v31  ;;  %v2307_v31 = vld [vmem:[%s3482_s8] ss:$0 sm:$0xff] }
 0x45d   : > { %2489 = vmatprep.subr.bf16.mxu1 %v2875_v0  ;;  %2482 = vmatpush3.bf16.msra.mxu0 %v2652_v18 }
 0x45e   : > { %2483 = vmatprep.subr.bf16.mxu0 %v2875_v0 }
 0x461   : > { %2484 = vmatpush3.bf16.msra.mxu0 %v2654_v62  ;;  %v2659_v62 = vld [vmem:[#allocation8 + $0x38] sm:$0xff]  }
 0x462   : > { %2497 = vmatprep.subr.bf16.mxu0 %v2875_v0 }
 0x4c5   : > { %v988_v23 = vpop.f32.mrb[8].mxu1 }
 0x4c6   : > { %v2453_v24 = vpop.f32.mrb[9].mxu1 }
 0x4c7   : > { %v991_v17 = vpop.f32.mrb[10].mxu1  ;;  %v2306_v24 = vld [vmem:[%s3481_s7] ss:$0 sm:$0xff] }
 0x4c8   : > { %v1136_v25 = vpack.c.bf16 %v991_v17, %v988_v23  ;;  %v2454_v26 = vpop.f32.mrb[11].mxu1 }
 0x4ca   : > { %1137 = vst.msk [vmem:[#allocation2] sm:$0xff] %vm638_vm2, %v1136_v25  ;;  %v3263_v25 = vshrl.u32 %v1280_v22, 7 }
 0x4cc   : > { %v1312_v28 = vadd.s32 4294967293, %v3263_v25  ;;  %vm1309_vm9 = vcmp.lt.s32.totalorder %v3263_v25, 3  ;;  %vm1285_vm10 = vcmp.lt.s32.totalorder %v3263_v25, 4  ;;  %vm1446_vm11 = vcmp.lt.s32.totalorder %v3263_v25, 2 }
 0x4cd   : > { %vm1529_vm13 = vcmp.lt.s32.totalorder %v3263_v25, 1  ;;  %vm1676_vm15 = vcmp.lt.s32.totalorder %v3263_v25, 7  ;;  %vm1759_vm3 = vcmp.lt.s32.totalorder %v3263_v25, 6 }
 0x4ce   : > { %vm1314_vm7 = vcmp.ge.s32.totalorder %v1312_v28, 0 }
 0x526   : > { %v1035_v27 = vpop.f32.mrb[12].mxu0 }
 0x527   : > { %v2459_v29 = vpop.f32.mrb[13].mxu0 }
 0x528   : > { %v1038_v30 = vpop.f32.mrb[14].mxu0  ;;  %v1288_v29 = vadd.s32 4294967292, %v3263_v25 }
 0x529   : > { %v1138_v32 = vpack.c.bf16 %v1038_v30, %v1035_v27  ;;  %v2460_v33 = vpop.f32.mrb[15].mxu0 }
 0x52a   : > { %v1082_v34 = vpop.f32.mrb[12].mxu1  ;;  %vm1290_vm8 = vcmp.ge.s32.totalorder %v1288_v29, 0 }
 0x52b   : > { %v2465_v35 = vpop.f32.mrb[13].mxu1  ;;  %1140 = vrot.lane.b32.xlu1 %v1138_v32, %s2882_s30  ;;  %s542_s30 = scalar_lea.vmem [#allocation9], %s2286_s27 }
 0x52c   : > { %v1085_v36 = vpop.f32.mrb[14].mxu1  ;;  %v1449_v35 = vadd.s32 4294967294, %v3263_v25 }
 0x52d   : > { %v1145_v37 = vpack.c.bf16 %v1085_v36, %v1082_v34  ;;  %v2466_v38 = vpop.f32.mrb[15].mxu1 }
 0x52e   : > { %v1129_v39 = vpop.f32.mrb[16].mxu0  ;;  %v2308_v38 = vsel %vm1290_vm8, 1.0, %v2875_v0  ;;  %vm1451_vm12 = vcmp.ge.s32.totalorder %v1449_v35, 0 }
 0x52f   : > { %1147 = vrot.lane.b32.xlu0 %v1145_v37, %s2883_s23  ;;  %v2471_v40 = vpop.f32.mrb[17].mxu0  ;;  %v2309_v37 = vsel %vm1314_vm7, 1.0, %v2875_v0  ;;  %s2174_s23 = sshll.u32 %s542_s30, 4  ;;  %s3429_s23 = int_to_ptr.vmem [resolvable:$true] %s2174_s23 }
 0x530   : > { %v1132_v41 = vpop.f32.mrb[18].mxu0  ;;  %s2798_s22 = scalar_lea.vmem %s3429_s23, 128 }
 0x531   : > { %v1152_v42 = vpack.c.bf16 %v1132_v41, %v1129_v39  ;;  %v2472_v43 = vpop.f32.mrb[19].mxu0  ;;  %v1532_v39 = vadd.s32 4294967295, %v3263_v25  ;;  %p2799_p12 = scmp.ne.s32.totalorder %s3429_s23, %s2798_s22 }
 0x533   : > { %1154 = vrot.lane.b32.xlu1 %v1152_v42, %s2884_s24  ;;  %vm1534_vm14 = vcmp.ge.s32.totalorder %v1532_v39, 0  ;;  %p2800_p8 = pnand %p2799_p12, %p3529_p7 }
 0x535   : > { %p2801_p11 = pneg %p2800_p8 }
 0x59d   : > { %v1141_v44 = vpop.permute.xlu1 %1140 }
 0x59e   : > { %1144 = vst.msk [vmem:[#allocation2] sm:$0xff] %vm1143_vm4, %v1141_v44  ;;  %v3286_v44 = vadd.s32 8, %v3263_v25 }
 0x5a0   : > { %v1680_v18 = vadd.s32 1, %v3286_v44  ;;  %v1924_v35 = vadd.s32 4, %v3286_v44 }
 0x5a1   : > { %v1148_v45 = vpop.permute.xlu0 %1147 }
 0x5a2   : > { %1151 = vst.msk [vmem:[#allocation2] sm:$0xff] %vm1150_vm5, %v1148_v45  ;;  %vm1684_vm2 = vcmp.lt.s32.totalorder %v1680_v18, 16  ;;  %vm1842_vm5 = vcmp.lt.s32.totalorder %v3263_v25, 5  ;;  %vm1928_vm7 = vcmp.lt.s32.totalorder %v1924_v35, 16 }
 0x5a5   : > { %v1155_v46 = vpop.permute.xlu1 %1154 }
 0x5a6   : > { %1158 = vst.msk [vmem:[#allocation2] sm:$0xff] %vm1157_vm6, %v1155_v46 }
 0x5ad   : > { %v1159_v47 = vld [vmem:[#allocation2] sm:$0xff] }
 0x5ae   : > { %2478 = vmatmul.mubr.msk.bf16.vlgmr.msra.gmra.mrb[16].mxu1 %vm583_vm1, %v1159_v47 }
 0x5af   : > { %2493 = vmatprep.mubr.msk.bf16.mxu1 %vm2876_vm0, %v2875_v0 }
 0x681   : > { %v1220_v49 = vpop.f32.mrb[16].mxu1 }
 0x682   : > { %v1221_v50 = vadd.f32 %v2302_v48, %v1220_v49  ;;  %v2479_v51 = vpop.f32.mrb[17].mxu1 }
 0x683   : > { %v1223_v52 = vpop.f32.mrb[18].mxu1 }
 0x684   : > { %v1227_v53 = vadd.f32 %v1221_v50, %v3145_v7  ;;  %v1224_v54 = vadd.f32 %v2302_v48, %v1223_v52  ;;  %v2480_v55 = vpop.f32.mrb[19].mxu1  ;;  %v2653_v7 = vld [vmem:[#allocation8] sm:$0xff]  }
 0x685   : > { %2490 = vmatpush3.bf16.msra.mxu1 %v2653_v7  ;;  %v2658_v7 = vld [vmem:[#allocation8 + $0x28] sm:$0xff]  }
 0x686   : > { %v1228_v56 = vadd.f32 %v1224_v54, %v3147_v8  ;;  %v1231_v57 = vsel %vm583_vm1, %v1227_v53, 0.0  ;;  %v1240_v58 = vmul.f32 %v1227_v53, %v1227_v53  ;;  %v2655_v8 = vld [vmem:[#allocation8 + $0x8] sm:$0xff]   ;;  %2491 = vmatprep.subr.bf16.mxu1 %v2875_v0  ;;  %v2657_v54 = vld [vmem:[#allocation8 + $0x30] sm:$0xff]  }
 0x687   : > { %1232 = vadd.xlane.f32.xlu0 %v1231_v57 }
 0x688   : > { %v1234_v59 = vsel %vm583_vm1, %v1228_v56, 0.0  ;;  %v1242_v60 = vsel %vm583_vm1, %v1240_v58, 0.0  ;;  %v1241_v21 = vmul.f32 %v1228_v56, %v1228_v56 }
 0x689   : > { %1235 = vadd.xlane.f32.xlu1 %v1234_v59  ;;  %2492 = vmatpush3.bf16.msra.mxu1 %v2655_v8 }
 0x68a   : > { %v1245_v61 = vsel %vm583_vm1, %v1241_v21, 0.0  ;;  %2505 = vmatprep.subr.bf16.mxu1 %v2875_v0 }
 0x68b   : > { %1243 = vadd.xlane.f32.xlu0 %v1242_v60  ;;  %v2316_v60 = vsel %vm1451_vm12, 1.0, %v2875_v0 }
 0x68f   : > { %1246 = vadd.xlane.f32.xlu0 %v1245_v61  ;;  %v2320_v61 = vsel %vm1534_vm14, 1.0, %v2875_v0 }
 0x714   : > { %v1233_v63 = vpop.xlane.xlu0 %1232 }
 0x715   : > { %v1238_v1 = vmul.f32 0.03125, %v1233_v63 }
 0x716   : > { %v1236_v2 = vpop.xlane.xlu1 %1235 }
 0x717   : > { %v1250_v4 = vmul.f32 %v1238_v1, %v1238_v1  ;;  %v1239_v5 = vmul.f32 0.03125, %v1236_v2  ;;  %v1256_v19 = vsub.f32 %v1227_v53, %v1238_v1  ;;  %v2656_v53 = vld [vmem:[#allocation8 + $0x20] sm:$0xff]  }
 0x718   : > { %v1244_v3 = vpop.xlane.xlu0 %1243 }
 0x719   : > { %v1248_v6 = vmul.f32 0.03125, %v1244_v3  ;;  %v1251_v11 = vmul.f32 %v1239_v5, %v1239_v5  ;;  %v1257_v26 = vsub.f32 %v1228_v56, %v1239_v5  ;;  %v2661_v5 = vld [vmem:[#allocation8 + $0x50] sm:$0xff]  }
 0x71b   : > { %v1252_v9 = vsub.f32 %v1248_v6, %v1250_v4  ;;  %v2660_v4 = vld [vmem:[#allocation8 + $0x40] sm:$0xff]  }
 0x71c   : > { %v1247_v10 = vpop.xlane.xlu0 %1246 }
 0x71d   : > { %v1254_v12 = vmax.f32 %v1252_v9, 0.0  ;;  %v1249_v13 = vmul.f32 0.03125, %v1247_v10 }
 0x71f   : > { %v1258_v14 = vadd.f32 1e-05, %v1254_v12  ;;  %v1253_v15 = vsub.f32 %v1249_v13, %v1251_v11  ;;  %v2327_v12 = vsel %vm1684_vm2, 1.0, %v2875_v0  ;;  %v1763_v13 = vadd.s32 2, %v3286_v44 }
 0x721   : > { %2706 = vrsqrt.f32 %v1258_v14  ;;  %v1255_v16 = vmax.f32 %v1253_v15, 0.0  ;;  %v1846_v14 = vadd.s32 3, %v3286_v44  ;;  %v2662_v15 = vld [vmem:[#allocation8 + $0x48] sm:$0xff]   ;;  %vm1767_vm4 = vcmp.lt.s32.totalorder %v1763_v13, 16 }
 0x723   : > { %v1259_v20 = vadd.f32 1e-05, %v1255_v16  ;;  %v2663_v16 = vld [vmem:[#allocation8 + $0x58] sm:$0xff]   ;;  %vm1850_vm6 = vcmp.lt.s32.totalorder %v1846_v14, 16 }
 0x725   : > { %2708 = vrsqrt.f32 %v1259_v20 }
 0x72b   : > { %v2707_v23 = vpop.eup %2706 }
 0x72c   : > { %v1262_v17 = vmul.f32 %v2707_v23, %v1256_v19 }
 0x72e   : > { %v1270_v27 = vmul.f32 %v2306_v24, %v1262_v17  ;;  %v2665_v17 = vld [vmem:[#allocation8 + $0x70] sm:$0xff]  }
 0x72f   : > { %v2709_v30 = vpop.eup %2708 }
 0x730   : > { %v1263_v32 = vmul.f32 %v2709_v30, %v1257_v26  ;;  %v3270_v33 = vadd.f32 %v2307_v31, %v1270_v27 }
 0x732   : > { %v1271_v34 = vmul.f32 %v2306_v24, %v1263_v32  ;;  %v1307_v40 = vrot.slane %v3270_v33, 5  ;;  %v1283_v42 = vrot.slane %v3270_v33, 4  ;;  %v1444_v55 = vrot.slane %v3270_v33, 6  ;;  %v2664_v24 = vld [vmem:[#allocation8 + $0x60] sm:$0xff]  }
 0x733   : > { %v1527_v56 = vrot.slane %v3270_v33, 7  ;;  %v1674_v6 = vrot.slane %v3270_v33, 1  ;;  %v1757_v26 = vrot.slane %v3270_v33, 2  ;;  %v1840_v27 = vrot.slane %v3270_v33, 3 }
 0x734   : > { %v3273_v36 = vadd.f32 %v2307_v31, %v1271_v34  ;;  %v2331_v31 = vsel %vm1767_vm4, 1.0, %v2875_v0  ;;  %v2335_v34 = vsel %vm1850_vm6, 1.0, %v2875_v0 }
 0x736   : > { %v1308_v41 = vrot.slane %v3273_v36, 5  ;;  %v1284_v43 = vrot.slane %v3273_v36, 4  ;;  %v1445_v47 = vrot.slane %v3273_v36, 6  ;;  %v1528_v48 = vrot.slane %v3273_v36, 7 }
 0x737   : > { %v1675_v1 = vrot.slane %v3273_v36, 1  ;;  %v1758_v22 = vrot.slane %v3273_v36, 2  ;;  %v1841_v19 = vrot.slane %v3273_v36, 3  ;;  %v1610_v28 = vpack.c.bf16 %v3273_v36, %v3270_v33 }
 0x738   : > { %v1311_v45 = vsel %vm1309_vm9, %v1308_v41, %v1307_v40  ;;  %v3292_v46 = vsel %vm1285_vm10, %v1284_v43, %v1283_v42  ;;  %v1310_v51 = vsel %vm1309_vm9, %v1307_v40, %v1308_v41  ;;  %v3302_v52 = vsel %vm1285_vm10, %v1283_v42, %v1284_v43  ;;  %v2668_v43 = vld [vmem:[#allocation8 + $0x80] sm:$0xff]  }
 0x739   : > { %v1324_v49 = vmul.f32 %v2309_v37, %v1311_v45  ;;  %v1300_v50 = vmul.f32 %v2308_v38, %v3292_v46  ;;  %v1448_v59 = vsel %vm1446_vm11, %v1445_v47, %v1444_v55  ;;  %v1531_v21 = vsel %vm1529_vm13, %v1528_v48, %v1527_v56  ;;  %v2666_v37 = vld [vmem:[#allocation8 + $0x68] sm:$0xff]   ;;  %v2667_v38 = vld [vmem:[#allocation8 + $0x78] sm:$0xff]  }
 0x73a   : > { %v1461_v8 = vmul.f32 %v2316_v60, %v1448_v59  ;;  %v1544_v63 = vmul.f32 %v2320_v61, %v1531_v21  ;;  %v1447_v2 = vsel %vm1446_vm11, %v1444_v55, %v1445_v47  ;;  %v1530_v3 = vsel %vm1529_vm13, %v1527_v56, %v1528_v48  ;;  %v2669_v48 = vld [vmem:[#allocation8 + $0x88] sm:$0xff]  }
 0x73b   : > { %v1326_v57 = vpack.c.bf16 %v1310_v51, %v1324_v49  ;;  %v1302_v58 = vpack.c.bf16 %v3302_v52, %v1300_v50  ;;  %v1678_v11 = vsel %vm1676_vm15, %v1675_v1, %v1674_v6  ;;  %v1677_v23 = vsel %vm1676_vm15, %v1674_v6, %v1675_v1  ;;  %v2670_v50 = vld [vmem:[%s3485_s11] sm:$0xff]   ;;  %v2671_v51 = vld [vmem:[%s3485_s11 + $0x8] sm:$0xff]  }
 0x73c   : > { %v1463_v9 = vpack.c.bf16 %v1447_v2, %v1461_v8  ;;  %v1546_v10 = vpack.c.bf16 %v1530_v3, %v1544_v63  ;;  %v1692_v20 = vmul.f32 %v2327_v12, %v1678_v11  ;;  %v1761_v30 = vsel %vm1759_vm3, %v1758_v22, %v1757_v26 }
 0x73d   : > { %2486 = vmatmul.mubr.msk.bf16.vlgmr.msra.gmra.mrb[20].mxu0 %vm583_vm1, %v1326_v57  ;;  %2494 = vmatmul.mubr.msk.bf16.vlgmr.msra.gmra.mrb[20].mxu1 %vm583_vm1, %v1302_v58  ;;  %v1844_v32 = vsel %vm1842_vm5, %v1841_v19, %v1840_v27  ;;  %v1775_v39 = vmul.f32 %v2331_v31, %v1761_v30  ;;  %v1760_v41 = vsel %vm1759_vm3, %v1757_v26, %v1758_v22  ;;  %v2339_v47 = vsel %vm1928_vm7, 1.0, %v2875_v0 }
 0x73e   : > { %2498 = vmatpush3.bf16.msra.mxu0 %v2656_v53  ;;  %2506 = vmatpush3.bf16.msra.mxu1 %v2657_v54  ;;  %v1693_v29 = vpack.c.bf16 %v1692_v20, %v1677_v23  ;;  %v1858_v40 = vmul.f32 %v2335_v34, %v1844_v32  ;;  %v1843_v42 = vsel %vm1842_vm5, %v1840_v27, %v1841_v19 }
 0x73f   : > { %2499 = vmatprep.subr.bf16.mxu0 %v2875_v0  ;;  %2507 = vmatprep.subr.bf16.mxu1 %v2875_v0  ;;  %v1776_v44 = vpack.c.bf16 %v1775_v39, %v1760_v41  ;;  %v1936_v25 = vmul.f32 %v2339_v47, %v3292_v46  ;;  %v2672_v46 = vld [vmem:[%s3485_s11 + $0x10] sm:$0xff]   ;;  %v2343_v39 = vld [vmem:[%s3484_s10] ss:$0 sm:$0xff] }
 0x740   : > { %2501 = vmatprep.mubr.msk.bf16.mxu0 %vm2876_vm0, %v2875_v0  ;;  %2509 = vmatprep.mubr.msk.bf16.mxu1 %vm2876_vm0, %v2875_v0  ;;  %v1859_v45 = vpack.c.bf16 %v1858_v40, %v1843_v42 }
 0x741   : > { %v1937_v49 = vpack.c.bf16 %v1936_v25, %v3302_v52  ;;  %v2673_v52 = vld [vmem:[%s3485_s11 + $0x18] sm:$0xff]  }
 0x742   : > { %2500 = vmatpush3.bf16.msra.mxu0 %v2658_v7  ;;  %2508 = vmatpush3.bf16.msra.mxu1 %v2659_v62 }
 0x743   : > { %2513 = vmatprep.subr.bf16.mxu0 %v2875_v0  ;;  %2521 = vmatprep.subr.bf16.mxu1 %v2875_v0 }
 0x745   : > { %2502 = vmatmul.mubr.msk.bf16.vlgmr.msra.gmra.mrb[24].mxu0 %vm583_vm1, %v1463_v9  ;;  %2510 = vmatmul.mubr.msk.bf16.vlgmr.msra.gmra.mrb[24].mxu1 %vm583_vm1, %v1546_v10 }
 0x746   : > { %2514 = vmatpush3.bf16.msra.mxu0 %v2660_v4  ;;  %2522 = vmatpush3.bf16.msra.mxu1 %v2661_v5 }
 0x747   : > { %2515 = vmatprep.subr.bf16.mxu0 %v2875_v0  ;;  %2523 = vmatprep.subr.bf16.mxu1 %v2875_v0 }
 0x748   : > { %2517 = vmatprep.mubr.msk.bf16.mxu0 %vm2876_vm0, %v2875_v0  ;;  %2525 = vmatprep.mubr.msk.bf16.mxu1 %vm2876_vm0, %v2875_v0 }
 0x74a   : > { %2516 = vmatpush3.bf16.msra.mxu0 %v2662_v15  ;;  %2524 = vmatpush3.bf16.msra.mxu1 %v2663_v16 }
 0x74b   : > { %2529 = vmatprep.subr.bf16.mxu0 %v2875_v0  ;;  %2537 = vmatprep.subr.bf16.mxu1 %v2875_v0 }
 0x74d   : > { %2518 = vmatmul.mubr.msk.bf16.vlgmr.msra.gmra.mrb[28].mxu0 %vm583_vm1, %v1610_v28  ;;  %2526 = vmatmul.mubr.msk.bf16.vlgmr.msra.gmra.mrb[28].mxu1 %vm583_vm1, %v1693_v29 }
 0x74e   : > { %2530 = vmatpush3.bf16.msra.mxu0 %v2664_v24  ;;  %2538 = vmatpush3.bf16.msra.mxu1 %v2665_v17 }
 0x74f   : > { %2531 = vmatprep.subr.bf16.mxu0 %v2875_v0  ;;  %2539 = vmatprep.subr.bf16.mxu1 %v2875_v0 }
 0x750   : > { %2533 = vmatprep.mubr.msk.bf16.mxu0 %vm2876_vm0, %v2875_v0  ;;  %2541 = vmatprep.mubr.msk.bf16.mxu1 %vm2876_vm0, %v2875_v0 }
 0x752   : > { %2532 = vmatpush3.bf16.msra.mxu0 %v2666_v37  ;;  %2540 = vmatpush3.bf16.msra.mxu1 %v2667_v38 }
 0x753   : > { %2545 = vmatprep.subr.bf16.mxu0 %v2875_v0  ;;  %2553 = vmatprep.subr.bf16.mxu1 %v2875_v0 }
 0x755   : > { %2534 = vmatmul.mubr.msk.bf16.vlgmr.msra.gmra.mrb[32].mxu0 %vm583_vm1, %v1776_v44  ;;  %2542 = vmatmul.mubr.msk.bf16.vlgmr.msra.gmra.mrb[32].mxu1 %vm583_vm1, %v1859_v45 }
 0x756   : > { %2546 = vmatpush3.bf16.msra.mxu0 %v2668_v43  ;;  %2549 = vmatprep.mubr.msk.bf16.mxu0 %vm2876_vm0, %v2875_v0 }
 0x757   : > { %2547 = vmatprep.subr.bf16.mxu0 %v2875_v0  ;;  %2561 = vmatprep.mubr.msk.bf16.mxu1 %vm2876_vm0, %v2875_v0  ;;  %vm2052_vm0 = vcmask 523264  }
 0x758   : > { %2554 = vmatpush3.bf16.msra.mxu1 %v2670_v50  ;;  %v2344_v50 = vld [vmem:[%s3486_s12] ss:$0 sm:$0xff] }
 0x759   : > { %2555 = vmatprep.subr.bf16.mxu1 %v2875_v0 }
 0x75a   : > { %2548 = vmatpush3.bf16.msra.mxu0 %v2669_v48 }
 0x75c   : > { %2556 = vmatpush3.bf16.msra.mxu1 %v2671_v51 }
 0x75d   : > { %2550 = vmatmul.mubr.msk.bf16.vlgmr.msra.gmra.mrb[36].mxu0 %vm583_vm1, %v1937_v49  ;;  %2557 = vmatprep.subr.bf16.mxu1 %v2875_v0 }
 0x760   : > { %2558 = vmatpush3.bf16.msra.mxu1 %v2672_v46 }
 0x761   : > { %2559 = vmatprep.subr.bf16.mxu1 %v2875_v0 }
 0x764   : > { %2560 = vmatpush3.bf16.msra.mxu1 %v2673_v52 }
 0x810   : > { %v1381_v53 = vpop.f32.mrb[20].mxu0  ;;  %v1437_v54 = vpop.f32.mrb[20].mxu1 }
 0x811   : > { %v1438_v55 = vadd.f32 %v1437_v54, %v1381_v53  ;;  %v2487_v56 = vpop.f32.mrb[21].mxu0  ;;  %v2495_v57 = vpop.f32.mrb[21].mxu1 }
 0x812   : > { %v1384_v58 = vpop.f32.mrb[22].mxu0  ;;  %v1440_v59 = vpop.f32.mrb[22].mxu1 }
 0x813   : > { %v1441_v60 = vadd.f32 %v1440_v59, %v1384_v58  ;;  %v2488_v21 = vpop.f32.mrb[23].mxu0  ;;  %v2496_v61 = vpop.f32.mrb[23].mxu1 }
 0x818   : > { %v1518_v18 = vpop.f32.mrb[24].mxu0  ;;  %v1601_v7 = vpop.f32.mrb[24].mxu1 }
 0x819   : > { %v1525_v62 = vadd.f32 %v1518_v18, %v1438_v55  ;;  %v2503_v8 = vpop.f32.mrb[25].mxu0  ;;  %v2511_v63 = vpop.f32.mrb[25].mxu1 }
 0x81a   : > { %v1521_v1 = vpop.f32.mrb[26].mxu0  ;;  %v1604_v2 = vpop.f32.mrb[26].mxu1 }
 0x81b   : > { %v1608_v3 = vadd.f32 %v1601_v7, %v1525_v62  ;;  %v1526_v0 = vadd.f32 %v1521_v1, %v1441_v60  ;;  %v2504_v4 = vpop.f32.mrb[27].mxu0  ;;  %v2512_v5 = vpop.f32.mrb[27].mxu1 }
 0x81d   : > { %v1609_v6 = vadd.f32 %v1604_v2, %v1526_v0 }
 0x820   : > { %v1665_v9 = vpop.f32.mrb[28].mxu0  ;;  %v1748_v10 = vpop.f32.mrb[28].mxu1 }
 0x821   : > { %v1672_v11 = vadd.f32 %v1665_v9, %v1608_v3  ;;  %v2519_v12 = vpop.f32.mrb[29].mxu0  ;;  %v2527_v13 = vpop.f32.mrb[29].mxu1 }
 0x822   : > { %v1668_v14 = vpop.f32.mrb[30].mxu0  ;;  %v1751_v15 = vpop.f32.mrb[30].mxu1 }
 0x823   : > { %v1755_v16 = vadd.f32 %v1748_v10, %v1672_v11  ;;  %v1673_v20 = vadd.f32 %v1668_v14, %v1609_v6  ;;  %v2520_v22 = vpop.f32.mrb[31].mxu0  ;;  %v2528_v19 = vpop.f32.mrb[31].mxu1  ;;  %v2350_v14 = vld [vmem:[%s3525_s25] ss:$0 sm:$0xff]  ;;  %s2802_s25 = sshll.u32 %s2885_s16, 4  ;;  %s2803_s25 = int_to_ptr.vmem [resolvable:$false] %s2802_s25 }
 0x824   : > { %v2351_v22 = vld [vmem:[%s3526_s26] ss:$0 sm:$0xff]  ;;  %s2804_s27 = scalar_lea.vmem %s2803_s25, 256  ;;  %p2805_p13 = scmp.lt.s32.totalorder %s3429_s23, %s2803_s25 }
 0x825   : > { %v1756_v23 = vadd.f32 %v1751_v15, %v1673_v20  ;;  %p2806_p1 = scmp.lt.s32.totalorder %s2804_s27, %s2798_s22 }
 0x827   : > { %p2807_p6 = por %p2806_p1, %p2805_p13 }
 0x828   : > { %v1831_v24 = vpop.f32.mrb[32].mxu0  ;;  %v1914_v17 = vpop.f32.mrb[32].mxu1 }
 0x829   : > { %v1838_v26 = vadd.f32 %v1831_v24, %v1755_v16  ;;  %v2535_v27 = vpop.f32.mrb[33].mxu0  ;;  %v2543_v28 = vpop.f32.mrb[33].mxu1  ;;  %p2808_p9 = pnand %p2807_p6, %p2801_p11 }
 0x82a   : > { %v1834_v29 = vpop.f32.mrb[34].mxu0  ;;  %v1917_v30 = vpop.f32.mrb[34].mxu1 }
 0x82b   : > { %v1921_v31 = vadd.f32 %v1914_v17, %v1838_v26  ;;  %v1839_v32 = vadd.f32 %v1834_v29, %v1756_v23  ;;  %v2536_v34 = vpop.f32.mrb[35].mxu0  ;;  %v2544_v35 = vpop.f32.mrb[35].mxu1 }
 0x82d   : > { %v1922_v37 = vadd.f32 %v1917_v30, %v1839_v32 }
 0x830   : > { %v1992_v38 = vpop.f32.mrb[36].mxu0 }
 0x831   : > { %v1999_v40 = vadd.f32 %v1992_v38, %v1921_v31  ;;  %v2551_v41 = vpop.f32.mrb[37].mxu0 }
 0x832   : > { %v1995_v42 = vpop.f32.mrb[38].mxu0 }
 0x833   : > { %v2008_v43 = vadd.f32 %v2343_v39, %v1999_v40  ;;  %v2000_v44 = vadd.f32 %v1995_v42, %v1922_v37  ;;  %v2552_v45 = vpop.f32.mrb[39].mxu0 }
 0x835   : > { %v2009_v47 = vadd.f32 %v2343_v39, %v2000_v44  ;;  %v2010_v48 = vmax.f32 %v2008_v43, 0.0 }
 0x837   : > { %v2011_v25 = vmax.f32 %v2009_v47, 0.0 }
 0x839   : > { %v2012_v49 = vpack.c.bf16 %v2011_v25, %v2010_v48 }
 0x83b   : > { %2562 = vmatmul.mubr.msk.bf16.vlgmr.msra.gmra.mrb[36].mxu1 %vm2052_vm0, %v2012_v49 }
 0x90e   : > { %v2090_v51 = vpop.f32.mrb[36].mxu1 }
 0x90f   : > { %v2091_v46 = vadd.f32 %v2344_v50, %v2090_v51  ;;  %v2563_v52 = vpop.f32.mrb[37].mxu1 }
 0x910   : > { %v2093_v53 = vpop.f32.mrb[38].mxu1 }
 0x911   : > { %v2097_v54 = vadd.f32 %v2091_v46, %v3270_v33  ;;  %v2094_v55 = vadd.f32 %v2344_v50, %v2093_v53  ;;  %v2564_v56 = vpop.f32.mrb[39].mxu1 }
 0x913   : > { %v2098_v57 = vadd.f32 %v2094_v55, %v3273_v36  ;;  %v2101_v58 = vsel %vm583_vm1, %v2097_v54, 0.0  ;;  %v2109_v59 = vmul.f32 %v2097_v54, %v2097_v54 }
 0x914   : > { %2102 = vadd.xlane.f32.xlu1 %v2101_v58 }
 0x915   : > { %v2104_v60 = vsel %vm583_vm1, %v2098_v57, 0.0  ;;  %v2110_v21 = vmul.f32 %v2098_v57, %v2098_v57  ;;  %v2111_v61 = vsel %vm583_vm1, %v2109_v59, 0.0 }
 0x916   : > { %2105 = vadd.xlane.f32.xlu0 %v2104_v60 }
 0x917   : > { %v2114_v18 = vsel %vm583_vm1, %v2110_v21, 0.0  ;;  %vm2157_vm1 = vcmask 257024  }
 0x918   : > { %2112 = vadd.xlane.f32.xlu1 %v2111_v61 }
 0x91a   : > { %2115 = vadd.xlane.f32.xlu0 %v2114_v18 }
 0x9a1   : > { %v2103_v7 = vpop.xlane.xlu1 %2102 }
 0x9a2   : > { %v2107_v33 = vmul.f32 0.03125, %v2103_v7 }
 0x9a3   : > { %v2106_v62 = vpop.xlane.xlu0 %2105 }
 0x9a4   : > { %v2108_v8 = vmul.f32 0.03125, %v2106_v62  ;;  %v2119_v63 = vmul.f32 %v2107_v33, %v2107_v33  ;;  %v2125_v12 = vsub.f32 %v2097_v54, %v2107_v33 }
 0x9a5   : > { %v2113_v36 = vpop.xlane.xlu1 %2112 }
 0x9a6   : > { %v2117_v1 = vmul.f32 0.03125, %v2113_v36  ;;  %v2120_v3 = vmul.f32 %v2108_v8, %v2108_v8  ;;  %v2126_v15 = vsub.f32 %v2098_v57, %v2108_v8 }
 0x9a7   : > { %v2116_v2 = vpop.xlane.xlu0 %2115 }
 0x9a8   : > { %v2121_v0 = vsub.f32 %v2117_v1, %v2119_v63  ;;  %v2118_v4 = vmul.f32 0.03125, %v2116_v2 }
 0x9aa   : > { %v2123_v5 = vmax.f32 %v2121_v0, 0.0  ;;  %v2122_v6 = vsub.f32 %v2118_v4, %v2120_v3 }
 0x9ac   : > { %v2127_v9 = vadd.f32 1e-05, %v2123_v5  ;;  %v2124_v10 = vmax.f32 %v2122_v6, 0.0 }
 0x9ae   : > { %2710 = vrsqrt.f32 %v2127_v9  ;;  %v2128_v11 = vadd.f32 1e-05, %v2124_v10 }
 0x9b0   : > { %2712 = vrsqrt.f32 %v2128_v11 }
 0x9b8   : > { %v2711_v13 = vpop.eup %2710 }
 0x9b9   : > { %v2131_v16 = vmul.f32 %v2711_v13, %v2125_v12 }
 0x9ba   : > { %v2713_v20 = vpop.eup %2712 }
 0x9bb   : > { %v2139_v19 = vmul.f32 %v2350_v14, %v2131_v16  ;;  %v2132_v23 = vmul.f32 %v2713_v20, %v2126_v15 }
 0x9bd   : > { %v2147_v24 = vadd.f32 %v2351_v22, %v2139_v19  ;;  %v2140_v17 = vmul.f32 %v2350_v14, %v2132_v23 }
 0x9bf   : > { %v2360_v26 = vpack.c.bf16 %v2147_v24, %v2147_v24  ;;  %v2148_v27 = vadd.f32 %v2351_v22, %v2140_v17 }
 0x9c1   : > { %v2361_v28 = vpack.c.bf16 %v2148_v27, %v2148_v27  ;;  %2158 = vst.msk [vmem:[%s542_s30] sm:$0xf] %vm2157_vm1, %v2360_v26 }
 0x9c3   : > { %2159 = vst.msk [vmem:[%s542_s30 + $0x4] sm:$0xf] %vm2157_vm1, %v2361_v28 }
 0x9c4   : > { %2811 = shalt.err (!%p2808_p9)
}
 0x9c5   : > { %s2812_s28 = scalar_lea.hbm %s3427_s19, 128  ;;  %s2816_s26 = scalar_lea.hbm %s3528_s14, 256 }
 0x9c6   : > { %p2813_p2 = scmp.ne.s32.totalorder %s3427_s19, %s2812_s28  ;;  %p2817_p5 = scmp.lt.u32.totalorder %s3427_s19, %s3528_s14 }
 0x9c7   : > { %p2818_p10 = scmp.lt.u32.totalorder %s2816_s26, %s2812_s28  ;;  %p2820_p12 = scmp.lt.u32.totalorder %s2812_s28, %s3427_s19 }
 0x9c8   : > { %p2814_p0 = pnand %p2813_p2, %p3529_p7 }
 0x9c9   : > { %p2819_p4 = por %p2818_p10, %p2817_p5 }
 0x9ca   : > { %p2815_p3 = pneg %p2814_p0 }
 0x9cb   : > { %p2821_p8 = por %p2820_p12, %p2819_p4 }
 0x9cd   : > { %p2822_p11 = pnand %p2821_p8, %p2815_p3 }
 0x9cf   : > { %2825 = shalt.err (!%p2822_p11)
}
 0x9d0   : > { %s2886_s24 = smov 4  }
 0x9d1   : > { %2577 = dma.vmem_to_hbm [thread:$0]  (%p3529_p7), %s3429_s23, 128, %s3427_s19, %s3431_s29, %s2881_s15, %s2881_s15, %s2886_s24  }
 0x9d2 PF: > { %s3530_s18 = sld [smem:[#allocation16_spill]]  ;;  %s3531_s22 = sld [smem:[#allocation13_spill]] }
 0x9d3   : > { %s3532_s16 = sld [smem:[#allocation20_spill]] }
 0x9d8   : > { %p2599_p13 = scmp.ge.s32.totalorder %s3530_s18, 2  ;;  %s2189_s25 = sand.u32 1, %s3531_s22  }
 0x9d9   : > { %p3533_p1 = scmp.ne.s32.totalorder %s3532_s16, 0  ;;  %s2190_s27 = scalar_lea.sflag [#allocation5], %s2189_s25 }
 0x9db   : > { %p2590_p6 = pnand %p2599_p13, %p3533_p1 }
 0x9dd   : > { %2851 = dma.done.wait (!%p2590_p6), %s2190_s27, 128  }
 0x9de   : > { %2853 = vsyncadd (!%p2590_p6), %s2190_s27, 4294967168  ;;  %s3534_s21 = sld [smem:[#allocation17_spill]]  ;;  %s3535_s18 = sld [smem:[#allocation14_spill]] }
 0x9df   : > { %s3536_s19 = sld [smem:[#allocation15_spill]]  ;;  %s3537_s20 = sld [smem:[#allocation18_spill]] }
 0x9e4   : > { %p27_p9 = scmp.ge.s32.totalorder %s3534_s21, 4  }
 0x9e6   :  { %29 = sbr.rel (!%p27_p9) target bundleno = 9 (0x9), region = 139 }
 0x9ed   :  { %2195 = vsyncpa [#allocation4], 1 }
 0x9ee   :  { %2197 = vsyncpa [#allocation4 + $0x1], 1 }
 0x9ef   :  { %2198 = vsyncpa [#allocation7], 1 }
 0x9f0   :  { %2199 = vsyncpa [#allocation5], 1 }
 0x9f1   :  { %2201 = vsyncpa [#allocation5 + $0x1], 1 }

// kernel: tpu_custom_call.1
= control target key start
LH: loop header
LB: loop body
LE: loop exit
PB: predicated region body
PF: predicated region fallthrough
CT: control target
= control target key end

     0   :  { %s3474_s0 = inlined_call_operand.vmem [shape: f32[2,16,32], index: 0, kind: input, shape index: {}]   ;;  %s3475_s1 = inlined_call_operand.vmem [shape: f32[2,1,16], index: 1, kind: input, shape index: {}]   ;;  %s3476_s2 = inlined_call_operand.vmem [shape: f32[16,32], index: 2, kind: input, shape index: {}]   ;;  %s3477_s3 = inlined_call_operand.hbm [shape: bf16[32,96], index: 3, kind: input, shape index: {}]   ;;  %s3478_s4 = inlined_call_operand.vmem [shape: f32[1,96], index: 4, kind: input, shape index: {}]   ;;  %s3479_s5 = inlined_call_operand.hbm [shape: bf16[32,32], index: 5, kind: input, shape index: {}]   ;;  %s3480_s6 = inlined_call_operand.vmem [shape: f32[1,32], index: 6, kind: input, shape index: {}]   ;;  %s3481_s7 = inlined_call_operand.vmem [shape: f32[1,32], index: 7, kind: input, shape index: {}]   ;;  %s3482_s8 = inlined_call_operand.vmem [shape: f32[1,32], index: 8, kind: input, shape index: {}]   ;;  %s3483_s9 = inlined_call_operand.hbm [shape: bf16[9,32,64], index: 9, kind: input, shape index: {}]   ;;  %s3484_s10 = inlined_call_operand.vmem [shape: f32[1,64], index: 10, kind: input, shape index: {}]   ;;  %s3485_s11 = inlined_call_operand.vmem [shape: bf16[64,32], index: 11, kind: input, shape index: {}]   ;;  %s3486_s12 = inlined_call_operand.vmem [shape: f32[1,32], index: 12, kind: input, shape index: {}]   ;;  %s3487_s13 = inlined_call_operand.vmem [shape: f32[1,32], index: 13, kind: input, shape index: {}]   ;;  %s3488_s14 = inlined_call_operand.vmem [shape: f32[1,32], index: 14, kind: input, shape index: {}]   ;;  %s3489_s15 = inlined_call_operand.hbm [shape: bf16[2,16,32], index: 15, kind: output, shape index: {}]  }
   0x1   :  { %3503 = sst [smem:[#allocation21_spill]] %s3487_s13 }
   0x2   :  { %3504 = sst [smem:[#allocation22_spill]] %s3488_s14 }
   0x3   :  { %3505 = sst [smem:[#allocation23_spill]] %s3489_s15 }
   0x4   :  { %20 = vsyncpa [#allocation4], 0 }
   0x5   :  { %21 = vsyncpa [#allocation7], 0 }
   0x6   :  { %22 = vsyncpa [#allocation5], 0 }
   0x7   :  { %24 = vsyncpa [#allocation5 + $0x1], 0  ;;  %s2967_s18 = smov 0   ;;  %s2969_s19 = smov 0  }
   0x8   :  { %s2971_s20 = smov 0   ;;  %s2973_s21 = smov 0  }
   0x9 LB: > { %3506 = sst [smem:[#allocation13_spill]] %s2856_s18  ;;  %s2988_s22 = sadd.s32 4294967295, %s2868_s21   ;;  %s2868_s21 = sphi %s2973_s21, %s3534_s21   ;;  %s2864_s20 = sphi %s2971_s20, %s3537_s20   ;;  %s2860_s19 = sphi %s2969_s19, %s3536_s19   ;;  %s2856_s18 = sphi %s2967_s18, %s3535_s18  }
   0xa   : > { %3507 = sst [smem:[#allocation14_spill]] %s2860_s19  ;;  %s2276_s23 = sadd.s32 4294967294, %s2868_s21  }
   0xb   : > { %3508 = sst [smem:[#allocation15_spill]] %s2864_s20  ;;  %s2992_s24 = sadd.s32 1, %s2868_s21  }
   0xc   : > { %3509 = sst [smem:[#allocation16_spill]] %s2868_s21  ;;  %s362_s25 = sadd.s32 1, %s2864_s20 }
   0xd   : > { %3510 = sst [smem:[#allocation17_spill]] %s2992_s24  ;;  %s359_s26 = ssub.s32 %s2868_s21, %s2992_s24 }
   0xe   : > { %p372_p0 = scmp.ne.s32.totalorder %s2864_s20, %s2860_s19  ;;  %p360_p1 = scmp.eq.s32.totalorder %s359_s26, 0 }
   0xf   : > { %p373_p2 = scmp.eq.s32.totalorder %s2988_s22, 1  ;;  %p378_p3 = scmp.ne.s32.totalorder %s2860_s19, %s2856_s18 }
  0x10   : > { %p379_p4 = scmp.eq.s32.totalorder %s2276_s23, 1  ;;  %p2277_p7 = scmp.ge.s32.totalorder %s2868_s21, 1 }
  0x11   : > { %s3003_s27 = scalar_select %p360_p1, %s2864_s20, %s362_s25  }
  0x12   : > { %p3005_p5 = por %p373_p2, %p372_p0  ;;  %p3009_p6 = por %p379_p4, %p378_p3 }
  0x13   : > { %3511 = sst [smem:[#allocation18_spill]] %s3003_s27  ;;  %p386_p8 = scmp.lt.s32.totalorder %s2868_s21, 3 }
  0x14   : > { %s3512_s28 = scalar_select %p3005_p5, 1, 0 }
  0x15   : > { %s3514_s29 = scalar_select %p3009_p6, 1, 0 }
  0x16   : > { %3513 = sst [smem:[#allocation19_spill]] %s3512_s28  ;;  %p3497_p9 = scmp.eq.s32.totalorder %s2988_s22, 0 }
  0x17   : > { %3515 = sst [smem:[#allocation20_spill]] %s3514_s29  ;;  %p3016_p10 = pnand %p2277_p7, %p386_p8 }
  0x18   : > { %s2870_s16 = smov [#allocation6]   ;;  %s2871_s25 = smov [#allocation3]  }
  0x19   : > { %s3516_s30 = scalar_select %p3016_p10, 1, 0 }
  0x1a   : > { %p2579_p11 = pneg %p3016_p10  ;;  %s417_s17 = sshll.u32 %s2870_s16, 4  ;;  %s3022_s17 = int_to_ptr.vmem [resolvable:$true] %s417_s17 }
  0x1b   : > { %s401_s26 = sshll.u32 %s2871_s25, 4  ;;  %s2872_s27 = smov [#allocation8]   ;;  %s3030_s26 = int_to_ptr.vmem [resolvable:$true] %s401_s26 }
  0x1c   : > { %p3026_p12 = pnand %p3497_p9, %p2579_p11  ;;  %s3032_s20 = sshll.u32 %s2872_s27, 4  ;;  %s440_s20 = int_to_ptr.vmem [resolvable:$true] %s3032_s20 }
  0x1d   : > { %s2714_s18 = scalar_lea.hbm %s3479_s5, 256 }
  0x1e   : > { %p2715_p13 = scmp.ne.s32.totalorder %s3479_s5, %s2714_s18  ;;  %p3042_p0 = pneg %p3026_p12 }
  0x1f   : > { %p2721_p3 = scmp.lt.u32.totalorder %s2714_s18, %s3479_s5 }
  0x20   : > { %p2717_p1 = pnand %p3042_p0, %p2715_p13 }
  0x22   : > { %p2718_p2 = pneg %p2717_p1 }
  0x24   : > { %p2723_p4 = pnand %p2721_p3, %p2718_p2 }
  0x26   : > { %2726 = shalt.err (!%p2723_p4)
}
  0x27   : > { %s2727_s21 = scalar_lea.vmem %s3022_s17, 256  ;;  %p2735_p9 = scmp.lt.s32.totalorder %s3022_s17, %s3022_s17 }
  0x28   : > { %p2728_p7 = scmp.ne.s32.totalorder %s3022_s17, %s2727_s21  ;;  %p2736_p6 = scmp.lt.s32.totalorder %s2727_s21, %s2727_s21 }
  0x2a   : > { %p2730_p8 = pnand %p2728_p7, %p3042_p0  ;;  %p2737_p13 = por %p2736_p6, %p2735_p9 }
  0x2c   : > { %p2731_p11 = pneg %p2730_p8 }
  0x2e   : > { %p2738_p1 = pnand %p2737_p13, %p2731_p11 }
  0x30   : > { %2741 = shalt.err (!%p2738_p1)
}
  0x31   : > { %s2873_s24 = smov 64   ;;  %s2874_s18 = smov 4  }
  0x32   : > { %2585 = dma.hbm_to_vmem [thread:$0]  (!%p3026_p12), %s3479_s5, 256, %s3022_s17, [#allocation7], %s2873_s24, %s2873_s24, %s2874_s18  }
  0x33   : > { %s2742_s21 = scalar_lea.hbm %s3477_s3, 256 }
  0x34   : > { %p2743_p6 = scmp.ne.s32.totalorder %s3477_s3, %s2742_s21  ;;  %p2749_p3 = scmp.lt.u32.totalorder %s2742_s21, %s3477_s3 }
  0x36   : > { %p2745_p9 = pnand %p2743_p6, %p3042_p0 }
  0x38   : > { %p2746_p2 = pneg %p2745_p9 }
  0x3a   : > { %p2751_p4 = pnand %p2749_p3, %p2746_p2 }
  0x3c   : > { %2754 = shalt.err (!%p2751_p4)
}
  0x3d   : > { %s2755_s17 = scalar_lea.vmem %s3030_s26, 256  ;;  %p2763_p13 = scmp.lt.s32.totalorder %s3030_s26, %s3030_s26 }
  0x3e   : > { %p2756_p7 = scmp.ne.s32.totalorder %s3030_s26, %s2755_s17  ;;  %p2764_p1 = scmp.lt.s32.totalorder %s2755_s17, %s2755_s17 }
  0x40   : > { %p2758_p8 = pnand %p2756_p7, %p3042_p0  ;;  %p2765_p6 = por %p2764_p1, %p2763_p13 }
  0x42   : > { %p2759_p11 = pneg %p2758_p8 }
  0x44   : > { %p2766_p9 = pnand %p2765_p6, %p2759_p11 }
  0x46   : > { %2769 = shalt.err (!%p2766_p9)
}
  0x47   : > { %2582 = dma.hbm_to_vmem [thread:$0]  (!%p3026_p12), %s3477_s3, 256, %s3030_s26, [#allocation4], %s2873_s24, %s2873_s24, %s2874_s18  }
  0x48   : > { %s2770_s29 = scalar_lea.hbm %s3483_s9, 2304 }
  0x49   : > { %p2771_p2 = scmp.ne.s32.totalorder %s3483_s9, %s2770_s29  ;;  %p2777_p7 = scmp.lt.u32.totalorder %s2770_s29, %s3483_s9 }
  0x4b   : > { %p2773_p3 = pnand %p2771_p2, %p3042_p0 }
  0x4d   : > { %p2774_p4 = pneg %p2773_p3 }
  0x4f   : > { %p2779_p8 = pnand %p2777_p7, %p2774_p4 }
  0x51   : > { %2782 = shalt.err (!%p2779_p8)
}
  0x52   : > { %s2783_s17 = scalar_lea.vmem %s440_s20, 2304  ;;  %p2791_p6 = scmp.lt.s32.totalorder %s440_s20, %s440_s20 }
  0x53   : > { %p2784_p11 = scmp.ne.s32.totalorder %s440_s20, %s2783_s17  ;;  %p2792_p9 = scmp.lt.s32.totalorder %s2783_s17, %s2783_s17 }
  0x55   : > { %p2786_p13 = pnand %p2784_p11, %p3042_p0  ;;  %p2793_p5 = por %p2792_p9, %p2791_p6 }
  0x57   : > { %p2787_p1 = pneg %p2786_p13 }
  0x59   : > { %p2794_p10 = pnand %p2793_p5, %p2787_p1 }
  0x5b   : > { %2797 = shalt.err (!%p2794_p10)
}
  0x5c   : > { %2588 = dma.hbm_to_vmem [thread:$0]  (!%p3026_p12), %s3483_s9, 2304, %s440_s20, [#allocation7], %s2873_s24, %s2873_s24, %s2874_s18  }
  0x5d   : > { %p3519_p2 = scmp.ne.s32.totalorder %s3516_s30, 0 }
  0x5e   : > { %p3520_p0 = scmp.eq.s32.totalorder (!%p3519_p2), %s2988_s22, 0 }
  0x5f   : > { %484 = sbr.rel (%p3519_p2) target bundleno = 2514 (0x9d2), region = 80 }
  0x66   : > { %2843 = dma.done.wait (%p3520_p0), [#allocation4], 256   ;;  %p3521_p3 = pmov %p3520_p0 }
  0x67   : > { %p3522_p5 = pmov %p3520_p0 }
  0x68   : > { %2845 = vsyncadd (%p3521_p3), [#allocation4], 4294967040 }
  0x69   : > { %2847 = dma.done.wait (%p3522_p5), [#allocation7], 2560   ;;  %p3523_p10 = pmov %p3520_p0 }
  0x6a   : > { %p543_p4 = scmp.lt.s32.totalorder %s2988_s22, 1  ;;  %v2875_v0 = vmov 0.0   ;;  %vm2876_vm0 = vmmov 0   ;;  %v2648_v1 = vld [vmem:[#allocation3] sm:$0xff]   ;;  %v2649_v2 = vld [vmem:[#allocation3 + $0x8] sm:$0xff]   ;;  %v554_v5 = vld [vmem:[%s3476_s2] sm:$0xff] }
  0x6b   : > { %2849 = vsyncadd (%p3523_p10), [#allocation7], 4294964736  ;;  %2417 = vmatprep.subr.bf16.mxu0 %v2875_v0  ;;  %2421 = vmatprep.mubr.msk.bf16.mxu0 %vm2876_vm0, %v2875_v0  ;;  %v555_v6 = vld [vmem:[%s3476_s2 + $0x8] sm:$0xff]  ;;  %vm583_vm1 = vcmask 261120   ;;  %v2289_v10 = vld [vmem:[%s3478_s4] ss:$0 sm:$0xff] }
  0x6c   : > { %s3129_s15 = scalar_select %p543_p4, %s2988_s22, 1  ;;  %2425 = vmatprep.subr.bf16.mxu1 %v2875_v0  ;;  %2427 = vmatprep.mubr.msk.bf16.mxu1 %vm2876_vm0, %v2875_v0  ;;  %vm638_vm2 = vcmask 64512   ;;  %vm855_vm3 = vcmask 130048   ;;  %vm1143_vm4 = vcmask 130112   ;;  %vm1150_vm5 = vcmask 195712  }
  0x6d   : > { %2418 = vmatpush3.bf16.msra.mxu0 %v2648_v1  ;;  %s2877_s25 = smov 104   ;;  %s2878_s27 = smov 120   ;;  %vm1157_vm6 = vcmask 261312  }
  0x6e   : > { %s2359_s20 = sshll.u32 %s3129_s15, 4  ;;  %2419 = vmatprep.subr.bf16.mxu0 %v2875_v0  ;;  %s2879_s21 = smov 96  }
  0x6f   : > { %s547_s24 = scalar_lea.vmem %s3474_s0, %s2359_s20  ;;  %s2880_s17 = smov 112  }
  0x70   : > { %v552_v3 = vld [vmem:[%s547_s24] sm:$0xff]  ;;  %v553_v4 = vld [vmem:[%s547_s24 + $0x8] sm:$0xff]  ;;  %s550_s20 = scalar_lea.vmem %s3475_s1, %s3129_s15  ;;  %s2881_s15 = smov 64  }
  0x71   : > { %v3145_v7 = vadd.f32 %v554_v5, %v552_v3  ;;  %v3147_v8 = vadd.f32 %v555_v6, %v553_v4  ;;  %2420 = vmatpush3.bf16.msra.mxu0 %v2649_v2  ;;  %v2297_v29 = vld [vmem:[%s550_s20] ss:$0 sm:$0xff]  ;;  %s2882_s30 = smov 8   ;;  %s2883_s23 = smov 16  }
  0x72   : > { %2431 = vmatprep.subr.bf16.mxu0 %v2875_v0  ;;  %s2884_s24 = smov 24   ;;  %s3524_s19 = sld [smem:[#allocation14_spill]] }
  0x73   : > { %v559_v9 = vpack.c.bf16 %v3147_v8, %v3145_v7  ;;  %s3526_s26 = sld [smem:[#allocation22_spill]]  ;;  %s2362_s20 = sshll.u32 %s2988_s22, 7 }
  0x74   : > { %s3527_s13 = sld [smem:[#allocation19_spill]]  ;;  %s3528_s14 = sld [smem:[#allocation23_spill]] }
  0x75   : > { %2422 = vmatmul.mubr.msk.bf16.vlgmr.msra.gmra.mrb[0].mxu0 %vm583_vm1, %v559_v9  ;;  %s2885_s16 = smov [#allocation9]  }
  0x76   : > { %2433 = vmatprep.mubr.msk.bf16.mxu0 %vm2876_vm0, %v2875_v0 }
  0x78   : > { %s540_s28 = sand.u32 1, %s3524_s19  }
  0x79   : > { %s3431_s29 = scalar_lea.sflag [#allocation5], %s540_s28 }
  0x7a   : > { %s3427_s19 = scalar_lea.hbm %s3528_s14, %s2362_s20  ;;  %p3529_p7 = scmp.ne.s32.totalorder %s3527_s13, 0 }
 0x148   : > { %v621_v11 = vpop.f32.mrb[0].mxu0 }
 0x149   : > { %v2423_v12 = vpop.f32.mrb[1].mxu0  ;;  %v622_v14 = vadd.f32 %v2289_v10, %v621_v11 }
 0x14a   : > { %v624_v13 = vpop.f32.mrb[2].mxu0 }
 0x14b   : > { %v625_v15 = vadd.f32 %v2289_v10, %v624_v13  ;;  %v2424_v16 = vpop.f32.mrb[3].mxu0 }
 0x14d   : > { %v3158_v17 = vpack.c.bf16 %v625_v15, %v622_v14 }
 0x14f   : > { %634 = vrot.lane.b32.xlu1 %v3158_v17, %s2877_s25  ;;  %630 = vrot.lane.b32.xlu0 %v3158_v17, %s2878_s27  ;;  %s3525_s25 = sld [smem:[#allocation21_spill]]  ;;  %s2286_s27 = sshll.u32 %s540_s28, 3 }
 0x153   : > { %636 = vrot.lane.b32.xlu1 %v3158_v17, %s2879_s21  ;;  %632 = vrot.lane.b32.xlu0 %v3158_v17, %s2880_s17 }
 0x1c1   : > { %v3164_v18 = vpop.permute.xlu1 %634  ;;  %v3166_v19 = vpop.permute.xlu0 %630 }
 0x1c2   : > { %686 = vrot.lane.b32.xlu0 %v3166_v19, %s2879_s21 }
 0x1c5   : > { %v637_v20 = vpop.permute.xlu1 %636  ;;  %v3169_v21 = vpop.permute.xlu0 %632 }
 0x1c6   : > { %784 = vrot.lane.b32.xlu0 %v3164_v18, %s2879_s21  ;;  %735 = vrot.lane.b32.xlu1 %v3169_v21, %s2879_s21  ;;  %v643_v22 = vsel %vm638_vm2, %v637_v20, 0 }
 0x1c7   : > { %2426 = vmatpush3.bf16.xpose.msra.mxu1 %v643_v22 }
 0x1c8   : > { %2437 = vmatprep.subr.bf16.mxu1 %v2875_v0 }
 0x1ce   : > { %2428 = vmatmul.mubr.msk.bf16.vlgmr.msra.gmra.mrb[0].mxu1 %vm638_vm2, %v3158_v17 }
 0x1cf   : > { %2439 = vmatprep.mubr.msk.bf16.mxu1 %vm2876_vm0, %v2875_v0 }
 0x234   : > { %v687_v23 = vpop.permute.xlu0 %686 }
 0x235   : > { %v692_v24 = vsel %vm638_vm2, %v687_v23, 0 }
 0x236   : > { %2432 = vmatpush3.bf16.xpose.msra.mxu0 %v692_v24 }
 0x237   : > { %2443 = vmatprep.subr.bf16.mxu0 %v2875_v0 }
 0x238   : > { %v736_v25 = vpop.permute.xlu1 %735  ;;  %v785_v27 = vpop.permute.xlu0 %784 }
 0x239   : > { %v741_v26 = vsel %vm638_vm2, %v736_v25, 0  ;;  %v790_v28 = vsel %vm638_vm2, %v785_v27, 0 }
 0x23a   : > { %2438 = vmatpush3.bf16.xpose.msra.mxu1 %v741_v26 }
 0x23b   : > { %2449 = vmatprep.subr.bf16.mxu1 %v2875_v0 }
 0x23d   : > { %2434 = vmatmul.mubr.msk.bf16.vlgmr.msra.gmra.mrb[4].mxu0 %vm638_vm2, %v3166_v19 }
 0x23e   : > { %2444 = vmatpush3.bf16.xpose.msra.mxu0 %v790_v28  ;;  %2445 = vmatprep.mubr.msk.bf16.mxu0 %vm2876_vm0, %v2875_v0 }
 0x23f   : > { %2455 = vmatprep.subr.bf16.mxu0 %v2875_v0 }
 0x241   : > { %2440 = vmatmul.mubr.msk.bf16.vlgmr.msra.gmra.mrb[4].mxu1 %vm638_vm2, %v3169_v21 }
 0x242   : > { %2451 = vmatprep.mubr.msk.bf16.mxu1 %vm2876_vm0, %v2875_v0 }
 0x245   : > { %2446 = vmatmul.mubr.msk.bf16.vlgmr.msra.gmra.mrb[8].mxu0 %vm638_vm2, %v3164_v18 }
 0x246   : > { %2457 = vmatprep.mubr.msk.bf16.mxu0 %vm2876_vm0, %v2875_v0 }
 0x2a1   : > { %v679_v30 = vpop.f32.mrb[0].mxu1 }
 0x2a2   : > { %v833_v31 = vmul.f32 0.35355338, %v679_v30  ;;  %v2429_v32 = vpop.f32.mrb[1].mxu1 }
 0x2a3   : > { %v682_v33 = vpop.f32.mrb[2].mxu1 }
 0x2a4   : > { %v834_v34 = vmul.f32 0.35355338, %v682_v33  ;;  %v2430_v35 = vpop.f32.mrb[3].mxu1  ;;  %v847_v36 = vadd.f32 %v2297_v29, %v833_v31 }
 0x2a6   : > { %v856_v37 = vsel %vm855_vm3, %v847_v36, -inf  ;;  %v848_v38 = vadd.f32 %v2297_v29, %v834_v34 }
 0x2a7   : > { %857 = vmax.xlane.f32.xlu1 %v856_v37 }
 0x2a8   : > { %v859_v39 = vsel %vm855_vm3, %v848_v38, -inf }
 0x2a9   : > { %860 = vmax.xlane.f32.xlu0 %v859_v39 }
 0x310   : > { %v728_v40 = vpop.f32.mrb[4].mxu0 }
 0x311   : > { %v835_v41 = vmul.f32 0.35355338, %v728_v40  ;;  %v2435_v42 = vpop.f32.mrb[5].mxu0 }
 0x312   : > { %v731_v43 = vpop.f32.mrb[6].mxu0 }
 0x313   : > { %v836_v44 = vmul.f32 0.35355338, %v731_v43  ;;  %v2436_v45 = vpop.f32.mrb[7].mxu0  ;;  %v849_v46 = vadd.f32 %v2297_v29, %v835_v41 }
 0x314   : > { %v777_v47 = vpop.f32.mrb[4].mxu1 }
 0x315   : > { %v837_v48 = vmul.f32 0.35355338, %v777_v47  ;;  %v2441_v49 = vpop.f32.mrb[5].mxu1  ;;  %v862_v50 = vsel %vm855_vm3, %v849_v46, -inf  ;;  %v850_v51 = vadd.f32 %v2297_v29, %v836_v44 }
 0x316   : > { %v780_v52 = vpop.f32.mrb[6].mxu1  ;;  %863 = vmax.xlane.f32.xlu0 %v862_v50 }
 0x317   : > { %v838_v53 = vmul.f32 0.35355338, %v780_v52  ;;  %v2442_v54 = vpop.f32.mrb[7].mxu1  ;;  %v865_v55 = vsel %vm855_vm3, %v850_v51, -inf  ;;  %v851_v56 = vadd.f32 %v2297_v29, %v837_v48 }
 0x318   : > { %866 = vmax.xlane.f32.xlu1 %v865_v55  ;;  %v826_v57 = vpop.f32.mrb[8].mxu0 }
 0x319   : > { %v839_v58 = vmul.f32 0.35355338, %v826_v57  ;;  %v2447_v59 = vpop.f32.mrb[9].mxu0  ;;  %v868_v60 = vsel %vm855_vm3, %v851_v56, -inf  ;;  %v852_v61 = vadd.f32 %v2297_v29, %v838_v53 }
 0x31a   : > { %869 = vmax.xlane.f32.xlu0 %v868_v60  ;;  %v829_v62 = vpop.f32.mrb[10].mxu0 }
 0x31b   : > { %v840_v63 = vmul.f32 0.35355338, %v829_v62  ;;  %v2448_v1 = vpop.f32.mrb[11].mxu0  ;;  %v871_v2 = vsel %vm855_vm3, %v852_v61, -inf  ;;  %v853_v3 = vadd.f32 %v2297_v29, %v839_v58 }
 0x31c   : > { %872 = vmax.xlane.f32.xlu1 %v871_v2 }
 0x31d   : > { %v874_v4 = vsel %vm855_vm3, %v853_v3, -inf  ;;  %v854_v5 = vadd.f32 %v2297_v29, %v840_v63 }
 0x31e   : > { %875 = vmax.xlane.f32.xlu0 %v874_v4 }
 0x31f   : > { %v877_v6 = vsel %vm855_vm3, %v854_v5, -inf }
 0x320   : > { %878 = vmax.xlane.f32.xlu1 %v877_v6 }
 0x331   : > { %995 = vrot.lane.b32.xlu1 %v3166_v19, %s2881_s15 }
 0x334   : > { %948 = vrot.lane.b32.xlu0 %v3158_v17, %s2881_s15  ;;  %v858_v9 = vpop.xlane.xlu1 %857 }
 0x335   : > { %v880_v11 = vsub.f32 %v847_v36, %v858_v9 }
 0x336   : > { %v861_v10 = vpop.xlane.xlu0 %860 }
 0x337   : > { %v881_v12 = vsub.f32 %v848_v38, %v861_v10  ;;  %v888_v13 = vmul.f32 1.442695, %v880_v11 }
 0x339   : > { %v890_v14 = vmul.f32 1.442695, %v881_v12  ;;  %2674 = vpow2.f32 %v888_v13 }
 0x33b   : > { %2676 = vpow2.f32 %v890_v14 }
 0x343   : > { %v2675_v15 = vpop.eup %2674 }
 0x344   : > { %v904_v20 = vsel %vm855_vm3, %v2675_v15, 0.0 }
 0x345   : > { %v2677_v16 = vpop.eup %2676 }
 0x346   : > { %v907_v22 = vsel %vm855_vm3, %v2677_v16, 0.0 }
 0x353   : > { %905 = vadd.xlane.f32.xlu0 %v904_v20 }
 0x355   : > { %908 = vadd.xlane.f32.xlu1 %v907_v22 }
 0x3a3   : > { %v864_v19 = vpop.xlane.xlu0 %863 }
 0x3a4   : > { %v882_v23 = vsub.f32 %v849_v46, %v864_v19 }
 0x3a5   : > { %v867_v24 = vpop.xlane.xlu1 %866 }
 0x3a6   : > { %v892_v17 = vmul.f32 1.442695, %v882_v23  ;;  %v883_v25 = vsub.f32 %v850_v51, %v867_v24 }
 0x3a7   : > { %v870_v26 = vpop.xlane.xlu0 %869 }
 0x3a8   : > { %2678 = vpow2.f32 %v892_v17  ;;  %v894_v27 = vmul.f32 1.442695, %v883_v25  ;;  %v884_v28 = vsub.f32 %v851_v56, %v870_v26 }
 0x3a9   : > { %v873_v29 = vpop.xlane.xlu1 %872 }
 0x3aa   : > { %2680 = vpow2.f32 %v894_v27  ;;  %v896_v30 = vmul.f32 1.442695, %v884_v28  ;;  %v885_v31 = vsub.f32 %v852_v61, %v873_v29  ;;  %v2650_v28 = vld [vmem:[#allocation6] sm:$0xff]  }
 0x3ab   : > { %v876_v32 = vpop.xlane.xlu0 %875 }
 0x3ac   : > { %2682 = vpow2.f32 %v896_v30  ;;  %v898_v33 = vmul.f32 1.442695, %v885_v31  ;;  %v886_v34 = vsub.f32 %v853_v3, %v876_v32  ;;  %v2651_v31 = vld [vmem:[#allocation6 + $0x8] sm:$0xff]  }
 0x3ad   : > { %v879_v35 = vpop.xlane.xlu1 %878 }
 0x3ae   : > { %2684 = vpow2.f32 %v898_v33  ;;  %v900_v36 = vmul.f32 1.442695, %v886_v34  ;;  %v887_v37 = vsub.f32 %v854_v5, %v879_v35 }
 0x3af   : > { %v949_v38 = vpop.permute.xlu0 %948 }
 0x3b0   : > { %2686 = vpow2.f32 %v900_v36  ;;  %v902_v39 = vmul.f32 1.442695, %v887_v37  ;;  %2450 = vmatpush3.bf16.msra.mxu1 %v949_v38 }
 0x3b1   : > { %v996_v40 = vpop.permute.xlu1 %995  ;;  %2461 = vmatprep.subr.bf16.mxu1 %v2875_v0 }
 0x3b2   : > { %v2679_v41 = vpop.eup %2678  ;;  %2688 = vpow2.f32 %v902_v39  ;;  %2456 = vmatpush3.bf16.msra.mxu0 %v996_v40 }
 0x3b3   : > { %v910_v42 = vsel %vm855_vm3, %v2679_v41, 0.0  ;;  %2467 = vmatprep.subr.bf16.mxu0 %v2875_v0 }
 0x3b4   : > { %v2681_v43 = vpop.eup %2680  ;;  %911 = vadd.xlane.f32.xlu0 %v910_v42 }
 0x3b5   : > { %v913_v44 = vsel %vm855_vm3, %v2681_v43, 0.0 }
 0x3b6   : > { %v2683_v45 = vpop.eup %2682  ;;  %914 = vadd.xlane.f32.xlu1 %v913_v44 }
 0x3b7   : > { %v916_v46 = vsel %vm855_vm3, %v2683_v45, 0.0 }
 0x3b8   : > { %v2685_v47 = vpop.eup %2684  ;;  %917 = vadd.xlane.f32.xlu0 %v916_v46 }
 0x3b9   : > { %v919_v48 = vsel %vm855_vm3, %v2685_v47, 0.0 }
 0x3ba   : > { %v2687_v49 = vpop.eup %2686  ;;  %920 = vadd.xlane.f32.xlu1 %v919_v48  ;;  %v2302_v48 = vld [vmem:[%s3480_s6] ss:$0 sm:$0xff] }
 0x3bb   : > { %v922_v50 = vsel %vm855_vm3, %v2687_v49, 0.0 }
 0x3bc   : > { %v2689_v51 = vpop.eup %2688  ;;  %923 = vadd.xlane.f32.xlu0 %v922_v50 }
 0x3bd   : > { %v925_v52 = vsel %vm855_vm3, %v2689_v51, 0.0 }
 0x3be   : > { %926 = vadd.xlane.f32.xlu1 %v925_v52 }
 0x3cf   : > { %1042 = vrot.lane.b32.xlu1 %v3169_v21, %s2881_s15 }
 0x3d2   : > { %1089 = vrot.lane.b32.xlu0 %v3164_v18, %s2881_s15 }
 0x3e0   : > { %v906_v53 = vpop.xlane.xlu0 %905 }
 0x3e1   : > { %2690 = vrcp.f32 %v906_v53 }
 0x3e2   : > { %v909_v54 = vpop.xlane.xlu1 %908 }
 0x3e3   : > { %2692 = vrcp.f32 %v909_v54 }
 0x3eb   : > { %v2691_v55 = vpop.eup %2690 }
 0x3ec   : > { %v936_v57 = vmul.f32 %v2691_v55, %v2675_v15 }
 0x3ed   : > { %v2693_v56 = vpop.eup %2692 }
 0x3ee   : > { %v937_v58 = vmul.f32 %v2693_v56, %v2677_v16 }
 0x3f0   : > { %v944_v59 = vpack.c.bf16 %v937_v58, %v936_v57 }
 0x3f2   : > { %2452 = vmatmul.mubr.msk.bf16.vlgmr.msra.gmra.mrb[8].mxu1 %vm855_vm3, %v944_v59 }
 0x3f3   : > { %2463 = vmatprep.mubr.msk.bf16.mxu1 %vm2876_vm0, %v2875_v0 }
 0x441   : > { %v912_v60 = vpop.xlane.xlu0 %911 }
 0x442   : > { %2694 = vrcp.f32 %v912_v60 }
 0x443   : > { %v915_v21 = vpop.xlane.xlu1 %914 }
 0x444   : > { %2696 = vrcp.f32 %v915_v21 }
 0x445   : > { %v918_v61 = vpop.xlane.xlu0 %917 }
 0x446   : > { %2698 = vrcp.f32 %v918_v61 }
 0x447   : > { %v921_v18 = vpop.xlane.xlu1 %920 }
 0x448   : > { %2700 = vrcp.f32 %v921_v18  ;;  %v2652_v18 = vld [vmem:[#allocation8 + $0x10] sm:$0xff]  }
 0x449   : > { %v924_v62 = vpop.xlane.xlu0 %923 }
 0x44a   : > { %2702 = vrcp.f32 %v924_v62  ;;  %v2654_v62 = vld [vmem:[#allocation8 + $0x18] sm:$0xff]  }
 0x44b   : > { %v927_v63 = vpop.xlane.xlu1 %926 }
 0x44c   : > { %v2695_v1 = vpop.eup %2694  ;;  %2704 = vrcp.f32 %v927_v63 }
 0x44d   : > { %v938_v3 = vmul.f32 %v2695_v1, %v2679_v41  ;;  %v1090_v13 = vpop.permute.xlu0 %1089 }
 0x44e   : > { %v2697_v2 = vpop.eup %2696 }
 0x44f   : > { %v939_v4 = vmul.f32 %v2697_v2, %v2681_v43  ;;  %v1043_v5 = vpop.permute.xlu1 %1042 }
 0x450   : > { %v2699_v6 = vpop.eup %2698  ;;  %2462 = vmatpush3.bf16.msra.mxu1 %v1043_v5 }
 0x451   : > { %v945_v9 = vpack.c.bf16 %v939_v4, %v938_v3  ;;  %2473 = vmatprep.subr.bf16.mxu1 %v2875_v0  ;;  %v940_v11 = vmul.f32 %v2699_v6, %v2683_v45 }
 0x452   : > { %v2701_v10 = vpop.eup %2700 }
 0x453   : > { %v941_v12 = vmul.f32 %v2701_v10, %v2685_v47  ;;  %2458 = vmatmul.mubr.msk.bf16.vlgmr.msra.gmra.mrb[12].mxu0 %vm855_vm3, %v945_v9 }
 0x454   : > { %v2703_v14 = vpop.eup %2702  ;;  %2468 = vmatpush3.bf16.msra.mxu0 %v1090_v13  ;;  %2469 = vmatprep.mubr.msk.bf16.mxu0 %vm2876_vm0, %v2875_v0 }
 0x455   : > { %v946_v15 = vpack.c.bf16 %v941_v12, %v940_v11  ;;  %2481 = vmatprep.subr.bf16.mxu0 %v2875_v0  ;;  %v942_v20 = vmul.f32 %v2703_v14, %v2687_v49 }
 0x456   : > { %v2705_v16 = vpop.eup %2704 }
 0x457   : > { %v943_v22 = vmul.f32 %v2705_v16, %v2689_v51  ;;  %2464 = vmatmul.mubr.msk.bf16.vlgmr.msra.gmra.mrb[12].mxu1 %vm855_vm3, %v946_v15 }
 0x458   : > { %2477 = vmatprep.mubr.msk.bf16.mxu1 %vm2876_vm0, %v2875_v0  ;;  %2474 = vmatpush3.bf16.msra.mxu1 %v2650_v28 }
 0x459   : > { %v947_v19 = vpack.c.bf16 %v943_v22, %v942_v20  ;;  %2475 = vmatprep.subr.bf16.mxu1 %v2875_v0  ;;  %v1280_v22 = vlaneseq }
 0x45b   : > { %2470 = vmatmul.mubr.msk.bf16.vlgmr.msra.gmra.mrb[16].mxu0 %vm855_vm3, %v947_v19 }
 0x45c   : > { %2485 = vmatprep.mubr.msk.bf16.mxu0 %vm2876_vm0, %v2875_v0  ;;  %2476 = vmatpush3.bf16.msra.mxu1 %v2651_v31  ;;  %v2307_v31 = vld [vmem:[%s3482_s8] ss:$0 sm:$0xff] }
 0x45d   : > { %2489 = vmatprep.subr.bf16.mxu1 %v2875_v0  ;;  %2482 = vmatpush3.bf16.msra.mxu0 %v2652_v18 }
 0x45e   : > { %2483 = vmatprep.subr.bf16.mxu0 %v2875_v0 }
 0x461   : > { %2484 = vmatpush3.bf16.msra.mxu0 %v2654_v62  ;;  %v2659_v62 = vld [vmem:[#allocation8 + $0x38] sm:$0xff]  }
 0x462   : > { %2497 = vmatprep.subr.bf16.mxu0 %v2875_v0 }
 0x4c5   : > { %v988_v23 = vpop.f32.mrb[8].mxu1 }
 0x4c6   : > { %v2453_v24 = vpop.f32.mrb[9].mxu1 }
 0x4c7   : > { %v991_v17 = vpop.f32.mrb[10].mxu1  ;;  %v2306_v24 = vld [vmem:[%s3481_s7] ss:$0 sm:$0xff] }
 0x4c8   : > { %v1136_v25 = vpack.c.bf16 %v991_v17, %v988_v23  ;;  %v2454_v26 = vpop.f32.mrb[11].mxu1 }
 0x4ca   : > { %1137 = vst.msk [vmem:[#allocation2] sm:$0xff] %vm638_vm2, %v1136_v25  ;;  %v3263_v25 = vshrl.u32 %v1280_v22, 7 }
 0x4cc   : > { %v1312_v28 = vadd.s32 4294967293, %v3263_v25  ;;  %vm1309_vm9 = vcmp.lt.s32.totalorder %v3263_v25, 3  ;;  %vm1285_vm10 = vcmp.lt.s32.totalorder %v3263_v25, 4  ;;  %vm1446_vm11 = vcmp.lt.s32.totalorder %v3263_v25, 2 }
 0x4cd   : > { %vm1529_vm13 = vcmp.lt.s32.totalorder %v3263_v25, 1  ;;  %vm1676_vm15 = vcmp.lt.s32.totalorder %v3263_v25, 7  ;;  %vm1759_vm3 = vcmp.lt.s32.totalorder %v3263_v25, 6 }
 0x4ce   : > { %vm1314_vm7 = vcmp.ge.s32.totalorder %v1312_v28, 0 }
 0x526   : > { %v1035_v27 = vpop.f32.mrb[12].mxu0 }
 0x527   : > { %v2459_v29 = vpop.f32.mrb[13].mxu0 }
 0x528   : > { %v1038_v30 = vpop.f32.mrb[14].mxu0  ;;  %v1288_v29 = vadd.s32 4294967292, %v3263_v25 }
 0x529   : > { %v1138_v32 = vpack.c.bf16 %v1038_v30, %v1035_v27  ;;  %v2460_v33 = vpop.f32.mrb[15].mxu0 }
 0x52a   : > { %v1082_v34 = vpop.f32.mrb[12].mxu1  ;;  %vm1290_vm8 = vcmp.ge.s32.totalorder %v1288_v29, 0 }
 0x52b   : > { %v2465_v35 = vpop.f32.mrb[13].mxu1  ;;  %1140 = vrot.lane.b32.xlu1 %v1138_v32, %s2882_s30  ;;  %s542_s30 = scalar_lea.vmem [#allocation9], %s2286_s27 }
 0x52c   : > { %v1085_v36 = vpop.f32.mrb[14].mxu1  ;;  %v1449_v35 = vadd.s32 4294967294, %v3263_v25 }
 0x52d   : > { %v1145_v37 = vpack.c.bf16 %v1085_v36, %v1082_v34  ;;  %v2466_v38 = vpop.f32.mrb[15].mxu1 }
 0x52e   : > { %v1129_v39 = vpop.f32.mrb[16].mxu0  ;;  %v2308_v38 = vsel %vm1290_vm8, 1.0, %v2875_v0  ;;  %vm1451_vm12 = vcmp.ge.s32.totalorder %v1449_v35, 0 }
 0x52f   : > { %1147 = vrot.lane.b32.xlu0 %v1145_v37, %s2883_s23  ;;  %v2471_v40 = vpop.f32.mrb[17].mxu0  ;;  %v2309_v37 = vsel %vm1314_vm7, 1.0, %v2875_v0  ;;  %s2174_s23 = sshll.u32 %s542_s30, 4  ;;  %s3429_s23 = int_to_ptr.vmem [resolvable:$true] %s2174_s23 }
 0x530   : > { %v1132_v41 = vpop.f32.mrb[18].mxu0  ;;  %s2798_s22 = scalar_lea.vmem %s3429_s23, 128 }
 0x531   : > { %v1152_v42 = vpack.c.bf16 %v1132_v41, %v1129_v39  ;;  %v2472_v43 = vpop.f32.mrb[19].mxu0  ;;  %v1532_v39 = vadd.s32 4294967295, %v3263_v25  ;;  %p2799_p12 = scmp.ne.s32.totalorder %s3429_s23, %s2798_s22 }
 0x533   : > { %1154 = vrot.lane.b32.xlu1 %v1152_v42, %s2884_s24  ;;  %vm1534_vm14 = vcmp.ge.s32.totalorder %v1532_v39, 0  ;;  %p2800_p8 = pnand %p2799_p12, %p3529_p7 }
 0x535   : > { %p2801_p11 = pneg %p2800_p8 }
 0x59d   : > { %v1141_v44 = vpop.permute.xlu1 %1140 }
 0x59e   : > { %1144 = vst.msk [vmem:[#allocation2] sm:$0xff] %vm1143_vm4, %v1141_v44  ;;  %v3286_v44 = vadd.s32 8, %v3263_v25 }
 0x5a0   : > { %v1680_v18 = vadd.s32 1, %v3286_v44  ;;  %v1924_v35 = vadd.s32 4, %v3286_v44 }
 0x5a1   : > { %v1148_v45 = vpop.permute.xlu0 %1147 }
 0x5a2   : > { %1151 = vst.msk [vmem:[#allocation2] sm:$0xff] %vm1150_vm5, %v1148_v45  ;;  %vm1684_vm2 = vcmp.lt.s32.totalorder %v1680_v18, 16  ;;  %vm1842_vm5 = vcmp.lt.s32.totalorder %v3263_v25, 5  ;;  %vm1928_vm7 = vcmp.lt.s32.totalorder %v1924_v35, 16 }
 0x5a5   : > { %v1155_v46 = vpop.permute.xlu1 %1154 }
 0x5a6   : > { %1158 = vst.msk [vmem:[#allocation2] sm:$0xff] %vm1157_vm6, %v1155_v46 }
 0x5ad   : > { %v1159_v47 = vld [vmem:[#allocation2] sm:$0xff] }
 0x5ae   : > { %2478 = vmatmul.mubr.msk.bf16.vlgmr.msra.gmra.mrb[16].mxu1 %vm583_vm1, %v1159_v47 }
 0x5af   : > { %2493 = vmatprep.mubr.msk.bf16.mxu1 %vm2876_vm0, %v2875_v0 }
 0x681   : > { %v1220_v49 = vpop.f32.mrb[16].mxu1 }
 0x682   : > { %v1221_v50 = vadd.f32 %v2302_v48, %v1220_v49  ;;  %v2479_v51 = vpop.f32.mrb[17].mxu1 }
 0x683   : > { %v1223_v52 = vpop.f32.mrb[18].mxu1 }
 0x684   : > { %v1227_v53 = vadd.f32 %v1221_v50, %v3145_v7  ;;  %v1224_v54 = vadd.f32 %v2302_v48, %v1223_v52  ;;  %v2480_v55 = vpop.f32.mrb[19].mxu1  ;;  %v2653_v7 = vld [vmem:[#allocation8] sm:$0xff]  }
 0x685   : > { %2490 = vmatpush3.bf16.msra.mxu1 %v2653_v7  ;;  %v2658_v7 = vld [vmem:[#allocation8 + $0x28] sm:$0xff]  }
 0x686   : > { %v1228_v56 = vadd.f32 %v1224_v54, %v3147_v8  ;;  %v1231_v57 = vsel %vm583_vm1, %v1227_v53, 0.0  ;;  %v1240_v58 = vmul.f32 %v1227_v53, %v1227_v53  ;;  %v2655_v8 = vld [vmem:[#allocation8 + $0x8] sm:$0xff]   ;;  %2491 = vmatprep.subr.bf16.mxu1 %v2875_v0  ;;  %v2657_v54 = vld [vmem:[#allocation8 + $0x30] sm:$0xff]  }
 0x687   : > { %1232 = vadd.xlane.f32.xlu0 %v1231_v57 }
 0x688   : > { %v1234_v59 = vsel %vm583_vm1, %v1228_v56, 0.0  ;;  %v1242_v60 = vsel %vm583_vm1, %v1240_v58, 0.0  ;;  %v1241_v21 = vmul.f32 %v1228_v56, %v1228_v56 }
 0x689   : > { %1235 = vadd.xlane.f32.xlu1 %v1234_v59  ;;  %2492 = vmatpush3.bf16.msra.mxu1 %v2655_v8 }
 0x68a   : > { %v1245_v61 = vsel %vm583_vm1, %v1241_v21, 0.0  ;;  %2505 = vmatprep.subr.bf16.mxu1 %v2875_v0 }
 0x68b   : > { %1243 = vadd.xlane.f32.xlu0 %v1242_v60  ;;  %v2316_v60 = vsel %vm1451_vm12, 1.0, %v2875_v0 }
 0x68f   : > { %1246 = vadd.xlane.f32.xlu0 %v1245_v61  ;;  %v2320_v61 = vsel %vm1534_vm14, 1.0, %v2875_v0 }
 0x714   : > { %v1233_v63 = vpop.xlane.xlu0 %1232 }
 0x715   : > { %v1238_v1 = vmul.f32 0.03125, %v1233_v63 }
 0x716   : > { %v1236_v2 = vpop.xlane.xlu1 %1235 }
 0x717   : > { %v1250_v4 = vmul.f32 %v1238_v1, %v1238_v1  ;;  %v1239_v5 = vmul.f32 0.03125, %v1236_v2  ;;  %v1256_v19 = vsub.f32 %v1227_v53, %v1238_v1  ;;  %v2656_v53 = vld [vmem:[#allocation8 + $0x20] sm:$0xff]  }
 0x718   : > { %v1244_v3 = vpop.xlane.xlu0 %1243 }
 0x719   : > { %v1248_v6 = vmul.f32 0.03125, %v1244_v3  ;;  %v1251_v11 = vmul.f32 %v1239_v5, %v1239_v5  ;;  %v1257_v26 = vsub.f32 %v1228_v56, %v1239_v5  ;;  %v2661_v5 = vld [vmem:[#allocation8 + $0x50] sm:$0xff]  }
 0x71b   : > { %v1252_v9 = vsub.f32 %v1248_v6, %v1250_v4  ;;  %v2660_v4 = vld [vmem:[#allocation8 + $0x40] sm:$0xff]  }
 0x71c   : > { %v1247_v10 = vpop.xlane.xlu0 %1246 }
 0x71d   : > { %v1254_v12 = vmax.f32 %v1252_v9, 0.0  ;;  %v1249_v13 = vmul.f32 0.03125, %v1247_v10 }
 0x71f   : > { %v1258_v14 = vadd.f32 1e-05, %v1254_v12  ;;  %v1253_v15 = vsub.f32 %v1249_v13, %v1251_v11  ;;  %v2327_v12 = vsel %vm1684_vm2, 1.0, %v2875_v0  ;;  %v1763_v13 = vadd.s32 2, %v3286_v44 }
 0x721   : > { %2706 = vrsqrt.f32 %v1258_v14  ;;  %v1255_v16 = vmax.f32 %v1253_v15, 0.0  ;;  %v1846_v14 = vadd.s32 3, %v3286_v44  ;;  %v2662_v15 = vld [vmem:[#allocation8 + $0x48] sm:$0xff]   ;;  %vm1767_vm4 = vcmp.lt.s32.totalorder %v1763_v13, 16 }
 0x723   : > { %v1259_v20 = vadd.f32 1e-05, %v1255_v16  ;;  %v2663_v16 = vld [vmem:[#allocation8 + $0x58] sm:$0xff]   ;;  %vm1850_vm6 = vcmp.lt.s32.totalorder %v1846_v14, 16 }
 0x725   : > { %2708 = vrsqrt.f32 %v1259_v20 }
 0x72b   : > { %v2707_v23 = vpop.eup %2706 }
 0x72c   : > { %v1262_v17 = vmul.f32 %v2707_v23, %v1256_v19 }
 0x72e   : > { %v1270_v27 = vmul.f32 %v2306_v24, %v1262_v17  ;;  %v2665_v17 = vld [vmem:[#allocation8 + $0x70] sm:$0xff]  }
 0x72f   : > { %v2709_v30 = vpop.eup %2708 }
 0x730   : > { %v1263_v32 = vmul.f32 %v2709_v30, %v1257_v26  ;;  %v3270_v33 = vadd.f32 %v2307_v31, %v1270_v27 }
 0x732   : > { %v1271_v34 = vmul.f32 %v2306_v24, %v1263_v32  ;;  %v1307_v40 = vrot.slane %v3270_v33, 5  ;;  %v1283_v42 = vrot.slane %v3270_v33, 4  ;;  %v1444_v55 = vrot.slane %v3270_v33, 6  ;;  %v2664_v24 = vld [vmem:[#allocation8 + $0x60] sm:$0xff]  }
 0x733   : > { %v1527_v56 = vrot.slane %v3270_v33, 7  ;;  %v1674_v6 = vrot.slane %v3270_v33, 1  ;;  %v1757_v26 = vrot.slane %v3270_v33, 2  ;;  %v1840_v27 = vrot.slane %v3270_v33, 3 }
 0x734   : > { %v3273_v36 = vadd.f32 %v2307_v31, %v1271_v34  ;;  %v2331_v31 = vsel %vm1767_vm4, 1.0, %v2875_v0  ;;  %v2335_v34 = vsel %vm1850_vm6, 1.0, %v2875_v0 }
 0x736   : > { %v1308_v41 = vrot.slane %v3273_v36, 5  ;;  %v1284_v43 = vrot.slane %v3273_v36, 4  ;;  %v1445_v47 = vrot.slane %v3273_v36, 6  ;;  %v1528_v48 = vrot.slane %v3273_v36, 7 }
 0x737   : > { %v1675_v1 = vrot.slane %v3273_v36, 1  ;;  %v1758_v22 = vrot.slane %v3273_v36, 2  ;;  %v1841_v19 = vrot.slane %v3273_v36, 3  ;;  %v1610_v28 = vpack.c.bf16 %v3273_v36, %v3270_v33 }
 0x738   : > { %v1311_v45 = vsel %vm1309_vm9, %v1308_v41, %v1307_v40  ;;  %v3292_v46 = vsel %vm1285_vm10, %v1284_v43, %v1283_v42  ;;  %v1310_v51 = vsel %vm1309_vm9, %v1307_v40, %v1308_v41  ;;  %v3302_v52 = vsel %vm1285_vm10, %v1283_v42, %v1284_v43  ;;  %v2668_v43 = vld [vmem:[#allocation8 + $0x80] sm:$0xff]  }
 0x739   : > { %v1324_v49 = vmul.f32 %v2309_v37, %v1311_v45  ;;  %v1300_v50 = vmul.f32 %v2308_v38, %v3292_v46  ;;  %v1448_v59 = vsel %vm1446_vm11, %v1445_v47, %v1444_v55  ;;  %v1531_v21 = vsel %vm1529_vm13, %v1528_v48, %v1527_v56  ;;  %v2666_v37 = vld [vmem:[#allocation8 + $0x68] sm:$0xff]   ;;  %v2667_v38 = vld [vmem:[#allocation8 + $0x78] sm:$0xff]  }
 0x73a   : > { %v1461_v8 = vmul.f32 %v2316_v60, %v1448_v59  ;;  %v1544_v63 = vmul.f32 %v2320_v61, %v1531_v21  ;;  %v1447_v2 = vsel %vm1446_vm11, %v1444_v55, %v1445_v47  ;;  %v1530_v3 = vsel %vm1529_vm13, %v1527_v56, %v1528_v48  ;;  %v2669_v48 = vld [vmem:[#allocation8 + $0x88] sm:$0xff]  }
 0x73b   : > { %v1326_v57 = vpack.c.bf16 %v1310_v51, %v1324_v49  ;;  %v1302_v58 = vpack.c.bf16 %v3302_v52, %v1300_v50  ;;  %v1678_v11 = vsel %vm1676_vm15, %v1675_v1, %v1674_v6  ;;  %v1677_v23 = vsel %vm1676_vm15, %v1674_v6, %v1675_v1  ;;  %v2670_v50 = vld [vmem:[%s3485_s11] sm:$0xff]   ;;  %v2671_v51 = vld [vmem:[%s3485_s11 + $0x8] sm:$0xff]  }
 0x73c   : > { %v1463_v9 = vpack.c.bf16 %v1447_v2, %v1461_v8  ;;  %v1546_v10 = vpack.c.bf16 %v1530_v3, %v1544_v63  ;;  %v1692_v20 = vmul.f32 %v2327_v12, %v1678_v11  ;;  %v1761_v30 = vsel %vm1759_vm3, %v1758_v22, %v1757_v26 }
 0x73d   : > { %2486 = vmatmul.mubr.msk.bf16.vlgmr.msra.gmra.mrb[20].mxu0 %vm583_vm1, %v1326_v57  ;;  %2494 = vmatmul.mubr.msk.bf16.vlgmr.msra.gmra.mrb[20].mxu1 %vm583_vm1, %v1302_v58  ;;  %v1844_v32 = vsel %vm1842_vm5, %v1841_v19, %v1840_v27  ;;  %v1775_v39 = vmul.f32 %v2331_v31, %v1761_v30  ;;  %v1760_v41 = vsel %vm1759_vm3, %v1757_v26, %v1758_v22  ;;  %v2339_v47 = vsel %vm1928_vm7, 1.0, %v2875_v0 }
 0x73e   : > { %2498 = vmatpush3.bf16.msra.mxu0 %v2656_v53  ;;  %2506 = vmatpush3.bf16.msra.mxu1 %v2657_v54  ;;  %v1693_v29 = vpack.c.bf16 %v1692_v20, %v1677_v23  ;;  %v1858_v40 = vmul.f32 %v2335_v34, %v1844_v32  ;;  %v1843_v42 = vsel %vm1842_vm5, %v1840_v27, %v1841_v19 }
 0x73f   : > { %2499 = vmatprep.subr.bf16.mxu0 %v2875_v0  ;;  %2507 = vmatprep.subr.bf16.mxu1 %v2875_v0  ;;  %v1776_v44 = vpack.c.bf16 %v1775_v39, %v1760_v41  ;;  %v1936_v25 = vmul.f32 %v2339_v47, %v3292_v46  ;;  %v2672_v46 = vld [vmem:[%s3485_s11 + $0x10] sm:$0xff]   ;;  %v2343_v39 = vld [vmem:[%s3484_s10] ss:$0 sm:$0xff] }
 0x740   : > { %2501 = vmatprep.mubr.msk.bf16.mxu0 %vm2876_vm0, %v2875_v0  ;;  %2509 = vmatprep.mubr.msk.bf16.mxu1 %vm2876_vm0, %v2875_v0  ;;  %v1859_v45 = vpack.c.bf16 %v1858_v40, %v1843_v42 }
 0x741   : > { %v1937_v49 = vpack.c.bf16 %v1936_v25, %v3302_v52  ;;  %v2673_v52 = vld [vmem:[%s3485_s11 + $0x18] sm:$0xff]  }
 0x742   : > { %2500 = vmatpush3.bf16.msra.mxu0 %v2658_v7  ;;  %2508 = vmatpush3.bf16.msra.mxu1 %v2659_v62 }
 0x743   : > { %2513 = vmatprep.subr.bf16.mxu0 %v2875_v0  ;;  %2521 = vmatprep.subr.bf16.mxu1 %v2875_v0 }
 0x745   : > { %2502 = vmatmul.mubr.msk.bf16.vlgmr.msra.gmra.mrb[24].mxu0 %vm583_vm1, %v1463_v9  ;;  %2510 = vmatmul.mubr.msk.bf16.vlgmr.msra.gmra.mrb[24].mxu1 %vm583_vm1, %v1546_v10 }
 0x746   : > { %2514 = vmatpush3.bf16.msra.mxu0 %v2660_v4  ;;  %2522 = vmatpush3.bf16.msra.mxu1 %v2661_v5 }
 0x747   : > { %2515 = vmatprep.subr.bf16.mxu0 %v2875_v0  ;;  %2523 = vmatprep.subr.bf16.mxu1 %v2875_v0 }
 0x748   : > { %2517 = vmatprep.mubr.msk.bf16.mxu0 %vm2876_vm0, %v2875_v0  ;;  %2525 = vmatprep.mubr.msk.bf16.mxu1 %vm2876_vm0, %v2875_v0 }
 0x74a   : > { %2516 = vmatpush3.bf16.msra.mxu0 %v2662_v15  ;;  %2524 = vmatpush3.bf16.msra.mxu1 %v2663_v16 }
 0x74b   : > { %2529 = vmatprep.subr.bf16.mxu0 %v2875_v0  ;;  %2537 = vmatprep.subr.bf16.mxu1 %v2875_v0 }
 0x74d   : > { %2518 = vmatmul.mubr.msk.bf16.vlgmr.msra.gmra.mrb[28].mxu0 %vm583_vm1, %v1610_v28  ;;  %2526 = vmatmul.mubr.msk.bf16.vlgmr.msra.gmra.mrb[28].mxu1 %vm583_vm1, %v1693_v29 }
 0x74e   : > { %2530 = vmatpush3.bf16.msra.mxu0 %v2664_v24  ;;  %2538 = vmatpush3.bf16.msra.mxu1 %v2665_v17 }
 0x74f   : > { %2531 = vmatprep.subr.bf16.mxu0 %v2875_v0  ;;  %2539 = vmatprep.subr.bf16.mxu1 %v2875_v0 }
 0x750   : > { %2533 = vmatprep.mubr.msk.bf16.mxu0 %vm2876_vm0, %v2875_v0  ;;  %2541 = vmatprep.mubr.msk.bf16.mxu1 %vm2876_vm0, %v2875_v0 }
 0x752   : > { %2532 = vmatpush3.bf16.msra.mxu0 %v2666_v37  ;;  %2540 = vmatpush3.bf16.msra.mxu1 %v2667_v38 }
 0x753   : > { %2545 = vmatprep.subr.bf16.mxu0 %v2875_v0  ;;  %2553 = vmatprep.subr.bf16.mxu1 %v2875_v0 }
 0x755   : > { %2534 = vmatmul.mubr.msk.bf16.vlgmr.msra.gmra.mrb[32].mxu0 %vm583_vm1, %v1776_v44  ;;  %2542 = vmatmul.mubr.msk.bf16.vlgmr.msra.gmra.mrb[32].mxu1 %vm583_vm1, %v1859_v45 }
 0x756   : > { %2546 = vmatpush3.bf16.msra.mxu0 %v2668_v43  ;;  %2549 = vmatprep.mubr.msk.bf16.mxu0 %vm2876_vm0, %v2875_v0 }
 0x757   : > { %2547 = vmatprep.subr.bf16.mxu0 %v2875_v0  ;;  %2561 = vmatprep.mubr.msk.bf16.mxu1 %vm2876_vm0, %v2875_v0  ;;  %vm2052_vm0 = vcmask 523264  }
 0x758   : > { %2554 = vmatpush3.bf16.msra.mxu1 %v2670_v50  ;;  %v2344_v50 = vld [vmem:[%s3486_s12] ss:$0 sm:$0xff] }
 0x759   : > { %2555 = vmatprep.subr.bf16.mxu1 %v2875_v0 }
 0x75a   : > { %2548 = vmatpush3.bf16.msra.mxu0 %v2669_v48 }
 0x75c   : > { %2556 = vmatpush3.bf16.msra.mxu1 %v2671_v51 }
 0x75d   : > { %2550 = vmatmul.mubr.msk.bf16.vlgmr.msra.gmra.mrb[36].mxu0 %vm583_vm1, %v1937_v49  ;;  %2557 = vmatprep.subr.bf16.mxu1 %v2875_v0 }
 0x760   : > { %2558 = vmatpush3.bf16.msra.mxu1 %v2672_v46 }
 0x761   : > { %2559 = vmatprep.subr.bf16.mxu1 %v2875_v0 }
 0x764   : > { %2560 = vmatpush3.bf16.msra.mxu1 %v2673_v52 }
 0x810   : > { %v1381_v53 = vpop.f32.mrb[20].mxu0  ;;  %v1437_v54 = vpop.f32.mrb[20].mxu1 }
 0x811   : > { %v1438_v55 = vadd.f32 %v1437_v54, %v1381_v53  ;;  %v2487_v56 = vpop.f32.mrb[21].mxu0  ;;  %v2495_v57 = vpop.f32.mrb[21].mxu1 }
 0x812   : > { %v1384_v58 = vpop.f32.mrb[22].mxu0  ;;  %v1440_v59 = vpop.f32.mrb[22].mxu1 }
 0x813   : > { %v1441_v60 = vadd.f32 %v1440_v59, %v1384_v58  ;;  %v2488_v21 = vpop.f32.mrb[23].mxu0  ;;  %v2496_v61 = vpop.f32.mrb[23].mxu1 }
 0x818   : > { %v1518_v18 = vpop.f32.mrb[24].mxu0  ;;  %v1601_v7 = vpop.f32.mrb[24].mxu1 }
 0x819   : > { %v1525_v62 = vadd.f32 %v1518_v18, %v1438_v55  ;;  %v2503_v8 = vpop.f32.mrb[25].mxu0  ;;  %v2511_v63 = vpop.f32.mrb[25].mxu1 }
 0x81a   : > { %v1521_v1 = vpop.f32.mrb[26].mxu0  ;;  %v1604_v2 = vpop.f32.mrb[26].mxu1 }
 0x81b   : > { %v1608_v3 = vadd.f32 %v1601_v7, %v1525_v62  ;;  %v1526_v0 = vadd.f32 %v1521_v1, %v1441_v60  ;;  %v2504_v4 = vpop.f32.mrb[27].mxu0  ;;  %v2512_v5 = vpop.f32.mrb[27].mxu1 }
 0x81d   : > { %v1609_v6 = vadd.f32 %v1604_v2, %v1526_v0 }
 0x820   : > { %v1665_v9 = vpop.f32.mrb[28].mxu0  ;;  %v1748_v10 = vpop.f32.mrb[28].mxu1 }
 0x821   : > { %v1672_v11 = vadd.f32 %v1665_v9, %v1608_v3  ;;  %v2519_v12 = vpop.f32.mrb[29].mxu0  ;;  %v2527_v13 = vpop.f32.mrb[29].mxu1 }
 0x822   : > { %v1668_v14 = vpop.f32.mrb[30].mxu0  ;;  %v1751_v15 = vpop.f32.mrb[30].mxu1 }
 0x823   : > { %v1755_v16 = vadd.f32 %v1748_v10, %v1672_v11  ;;  %v1673_v20 = vadd.f32 %v1668_v14, %v1609_v6  ;;  %v2520_v22 = vpop.f32.mrb[31].mxu0  ;;  %v2528_v19 = vpop.f32.mrb[31].mxu1  ;;  %v2350_v14 = vld [vmem:[%s3525_s25] ss:$0 sm:$0xff]  ;;  %s2802_s25 = sshll.u32 %s2885_s16, 4  ;;  %s2803_s25 = int_to_ptr.vmem [resolvable:$false] %s2802_s25 }
 0x824   : > { %v2351_v22 = vld [vmem:[%s3526_s26] ss:$0 sm:$0xff]  ;;  %s2804_s27 = scalar_lea.vmem %s2803_s25, 256  ;;  %p2805_p13 = scmp.lt.s32.totalorder %s3429_s23, %s2803_s25 }
 0x825   : > { %v1756_v23 = vadd.f32 %v1751_v15, %v1673_v20  ;;  %p2806_p1 = scmp.lt.s32.totalorder %s2804_s27, %s2798_s22 }
 0x827   : > { %p2807_p6 = por %p2806_p1, %p2805_p13 }
 0x828   : > { %v1831_v24 = vpop.f32.mrb[32].mxu0  ;;  %v1914_v17 = vpop.f32.mrb[32].mxu1 }
 0x829   : > { %v1838_v26 = vadd.f32 %v1831_v24, %v1755_v16  ;;  %v2535_v27 = vpop.f32.mrb[33].mxu0  ;;  %v2543_v28 = vpop.f32.mrb[33].mxu1  ;;  %p2808_p9 = pnand %p2807_p6, %p2801_p11 }
 0x82a   : > { %v1834_v29 = vpop.f32.mrb[34].mxu0  ;;  %v1917_v30 = vpop.f32.mrb[34].mxu1 }
 0x82b   : > { %v1921_v31 = vadd.f32 %v1914_v17, %v1838_v26  ;;  %v1839_v32 = vadd.f32 %v1834_v29, %v1756_v23  ;;  %v2536_v34 = vpop.f32.mrb[35].mxu0  ;;  %v2544_v35 = vpop.f32.mrb[35].mxu1 }
 0x82d   : > { %v1922_v37 = vadd.f32 %v1917_v30, %v1839_v32 }
 0x830   : > { %v1992_v38 = vpop.f32.mrb[36].mxu0 }
 0x831   : > { %v1999_v40 = vadd.f32 %v1992_v38, %v1921_v31  ;;  %v2551_v41 = vpop.f32.mrb[37].mxu0 }
 0x832   : > { %v1995_v42 = vpop.f32.mrb[38].mxu0 }
 0x833   : > { %v2008_v43 = vadd.f32 %v2343_v39, %v1999_v40  ;;  %v2000_v44 = vadd.f32 %v1995_v42, %v1922_v37  ;;  %v2552_v45 = vpop.f32.mrb[39].mxu0 }
 0x835   : > { %v2009_v47 = vadd.f32 %v2343_v39, %v2000_v44  ;;  %v2010_v48 = vmax.f32 %v2008_v43, 0.0 }
 0x837   : > { %v2011_v25 = vmax.f32 %v2009_v47, 0.0 }
 0x839   : > { %v2012_v49 = vpack.c.bf16 %v2011_v25, %v2010_v48 }
 0x83b   : > { %2562 = vmatmul.mubr.msk.bf16.vlgmr.msra.gmra.mrb[36].mxu1 %vm2052_vm0, %v2012_v49 }
 0x90e   : > { %v2090_v51 = vpop.f32.mrb[36].mxu1 }
 0x90f   : > { %v2091_v46 = vadd.f32 %v2344_v50, %v2090_v51  ;;  %v2563_v52 = vpop.f32.mrb[37].mxu1 }
 0x910   : > { %v2093_v53 = vpop.f32.mrb[38].mxu1 }
 0x911   : > { %v2097_v54 = vadd.f32 %v2091_v46, %v3270_v33  ;;  %v2094_v55 = vadd.f32 %v2344_v50, %v2093_v53  ;;  %v2564_v56 = vpop.f32.mrb[39].mxu1 }
 0x913   : > { %v2098_v57 = vadd.f32 %v2094_v55, %v3273_v36  ;;  %v2101_v58 = vsel %vm583_vm1, %v2097_v54, 0.0  ;;  %v2109_v59 = vmul.f32 %v2097_v54, %v2097_v54 }
 0x914   : > { %2102 = vadd.xlane.f32.xlu1 %v2101_v58 }
 0x915   : > { %v2104_v60 = vsel %vm583_vm1, %v2098_v57, 0.0  ;;  %v2110_v21 = vmul.f32 %v2098_v57, %v2098_v57  ;;  %v2111_v61 = vsel %vm583_vm1, %v2109_v59, 0.0 }
 0x916   : > { %2105 = vadd.xlane.f32.xlu0 %v2104_v60 }
 0x917   : > { %v2114_v18 = vsel %vm583_vm1, %v2110_v21, 0.0  ;;  %vm2157_vm1 = vcmask 257024  }
 0x918   : > { %2112 = vadd.xlane.f32.xlu1 %v2111_v61 }
 0x91a   : > { %2115 = vadd.xlane.f32.xlu0 %v2114_v18 }
 0x9a1   : > { %v2103_v7 = vpop.xlane.xlu1 %2102 }
 0x9a2   : > { %v2107_v33 = vmul.f32 0.03125, %v2103_v7 }
 0x9a3   : > { %v2106_v62 = vpop.xlane.xlu0 %2105 }
 0x9a4   : > { %v2108_v8 = vmul.f32 0.03125, %v2106_v62  ;;  %v2119_v63 = vmul.f32 %v2107_v33, %v2107_v33  ;;  %v2125_v12 = vsub.f32 %v2097_v54, %v2107_v33 }
 0x9a5   : > { %v2113_v36 = vpop.xlane.xlu1 %2112 }
 0x9a6   : > { %v2117_v1 = vmul.f32 0.03125, %v2113_v36  ;;  %v2120_v3 = vmul.f32 %v2108_v8, %v2108_v8  ;;  %v2126_v15 = vsub.f32 %v2098_v57, %v2108_v8 }
 0x9a7   : > { %v2116_v2 = vpop.xlane.xlu0 %2115 }
 0x9a8   : > { %v2121_v0 = vsub.f32 %v2117_v1, %v2119_v63  ;;  %v2118_v4 = vmul.f32 0.03125, %v2116_v2 }
 0x9aa   : > { %v2123_v5 = vmax.f32 %v2121_v0, 0.0  ;;  %v2122_v6 = vsub.f32 %v2118_v4, %v2120_v3 }
 0x9ac   : > { %v2127_v9 = vadd.f32 1e-05, %v2123_v5  ;;  %v2124_v10 = vmax.f32 %v2122_v6, 0.0 }
 0x9ae   : > { %2710 = vrsqrt.f32 %v2127_v9  ;;  %v2128_v11 = vadd.f32 1e-05, %v2124_v10 }
 0x9b0   : > { %2712 = vrsqrt.f32 %v2128_v11 }
 0x9b8   : > { %v2711_v13 = vpop.eup %2710 }
 0x9b9   : > { %v2131_v16 = vmul.f32 %v2711_v13, %v2125_v12 }
 0x9ba   : > { %v2713_v20 = vpop.eup %2712 }
 0x9bb   : > { %v2139_v19 = vmul.f32 %v2350_v14, %v2131_v16  ;;  %v2132_v23 = vmul.f32 %v2713_v20, %v2126_v15 }
 0x9bd   : > { %v2147_v24 = vadd.f32 %v2351_v22, %v2139_v19  ;;  %v2140_v17 = vmul.f32 %v2350_v14, %v2132_v23 }
 0x9bf   : > { %v2360_v26 = vpack.c.bf16 %v2147_v24, %v2147_v24  ;;  %v2148_v27 = vadd.f32 %v2351_v22, %v2140_v17 }
 0x9c1   : > { %v2361_v28 = vpack.c.bf16 %v2148_v27, %v2148_v27  ;;  %2158 = vst.msk [vmem:[%s542_s30] sm:$0xf] %vm2157_vm1, %v2360_v26 }
 0x9c3   : > { %2159 = vst.msk [vmem:[%s542_s30 + $0x4] sm:$0xf] %vm2157_vm1, %v2361_v28 }
 0x9c4   : > { %2811 = shalt.err (!%p2808_p9)
}
 0x9c5   : > { %s2812_s28 = scalar_lea.hbm %s3427_s19, 128  ;;  %s2816_s26 = scalar_lea.hbm %s3528_s14, 256 }
 0x9c6   : > { %p2813_p2 = scmp.ne.s32.totalorder %s3427_s19, %s2812_s28  ;;  %p2817_p5 = scmp.lt.u32.totalorder %s3427_s19, %s3528_s14 }
 0x9c7   : > { %p2818_p10 = scmp.lt.u32.totalorder %s2816_s26, %s2812_s28  ;;  %p2820_p12 = scmp.lt.u32.totalorder %s2812_s28, %s3427_s19 }
 0x9c8   : > { %p2814_p0 = pnand %p2813_p2, %p3529_p7 }
 0x9c9   : > { %p2819_p4 = por %p2818_p10, %p2817_p5 }
 0x9ca   : > { %p2815_p3 = pneg %p2814_p0 }
 0x9cb   : > { %p2821_p8 = por %p2820_p12, %p2819_p4 }
 0x9cd   : > { %p2822_p11 = pnand %p2821_p8, %p2815_p3 }
 0x9cf   : > { %2825 = shalt.err (!%p2822_p11)
}
 0x9d0   : > { %s2886_s24 = smov 4  }
 0x9d1   : > { %2577 = dma.vmem_to_hbm [thread:$0]  (%p3529_p7), %s3429_s23, 128, %s3427_s19, %s3431_s29, %s2881_s15, %s2881_s15, %s2886_s24  }
 0x9d2 PF: > { %s3530_s18 = sld [smem:[#allocation16_spill]]  ;;  %s3531_s22 = sld [smem:[#allocation13_spill]] }
 0x9d3   : > { %s3532_s16 = sld [smem:[#allocation20_spill]] }
 0x9d8   : > { %p2599_p13 = scmp.ge.s32.totalorder %s3530_s18, 2  ;;  %s2189_s25 = sand.u32 1, %s3531_s22  }
 0x9d9   : > { %p3533_p1 = scmp.ne.s32.totalorder %s3532_s16, 0  ;;  %s2190_s27 = scalar_lea.sflag [#allocation5], %s2189_s25 }
 0x9db   : > { %p2590_p6 = pnand %p2599_p13, %p3533_p1 }
 0x9dd   : > { %2851 = dma.done.wait (!%p2590_p6), %s2190_s27, 128  }
 0x9de   : > { %2853 = vsyncadd (!%p2590_p6), %s2190_s27, 4294967168  ;;  %s3534_s21 = sld [smem:[#allocation17_spill]]  ;;  %s3535_s18 = sld [smem:[#allocation14_spill]] }
 0x9df   : > { %s3536_s19 = sld [smem:[#allocation15_spill]]  ;;  %s3537_s20 = sld [smem:[#allocation18_spill]] }
 0x9e4   : > { %p27_p9 = scmp.ge.s32.totalorder %s3534_s21, 4  }
 0x9e6   :  { %29 = sbr.rel (!%p27_p9) target bundleno = 9 (0x9), region = 139 }
 0x9ed   :  { %2195 = vsyncpa [#allocation4], 1 }
 0x9ee   :  { %2197 = vsyncpa [#allocation4 + $0x1], 1 }
 0x9ef   :  { %2198 = vsyncpa [#allocation7], 1 }
 0x9f0   :  { %2199 = vsyncpa [#allocation5], 1 }
 0x9f1   :  { %2201 = vsyncpa [#allocation5 + $0x1], 1 }

</bundles_post_ra>
